<compile_context>
chip_gen: v7x
topology: tpu7x:2x2x1
jax: 0.10.0
libtpu: 0.0.40
codegen_flags: <defaults>
</compile_context>

<pallas_src>
import functools

import jax
import jax.numpy as jnp
from jax.experimental import pallas as pl
from jax.experimental.pallas import tpu as pltpu

EPS = 1e-5          # nn.GroupNorm default eps
SLOPE = 0.1         # LeakyReLU negative slope
GROUPS = 16


def _leaky(y):
    return jnp.where(y > 0, y, SLOPE * y)


def _split_bf16(a):
    """f32 -> (hi, lo) bf16 pair with hi + lo ~= a to ~2^-17 relative."""
    hi = a.astype(jnp.bfloat16)
    lo = (a - hi.astype(jnp.float32)).astype(jnp.bfloat16)
    return hi, lo


def _dot3(a_hi, a_lo, b_hi, b_lo):
    """~f32-accurate matmul from three bf16 MXU passes, f32 accumulation."""
    d = lambda p, q: jnp.dot(p, q, preferred_element_type=jnp.float32)
    return d(a_hi, b_hi) + d(a_hi, b_lo) + d(a_lo, b_hi)


def _group_norm_leaky(x, gamma, beta, gm_scaled, inv_n):
    """GroupNorm + LeakyReLU on one sample's (C, HW) f32 matrix.

    Per-channel sums are lane reductions; group aggregation is ONE
    (C, C) @ (C, 2) matmul with the same-group matrix pre-scaled by 1/n
    (skipped entirely when channels-per-group == 1).  Stats stay in f32.
    """
    s1 = jnp.sum(x, axis=1, keepdims=True)           # (C, 1)
    s2 = jnp.sum(x * x, axis=1, keepdims=True)       # (C, 1)
    stats = jnp.concatenate([s1, s2], axis=1)        # (C, 2)
    if gm_scaled is None:                            # cg == 1: per-channel stats
        stats = stats * inv_n
    else:                                            # 1/n folded into gm_scaled
        stats = jnp.dot(gm_scaled, stats, preferred_element_type=jnp.float32)
    mean = stats[:, 0:1]
    var = stats[:, 1:2] - mean * mean                # E[x^2] - E[x]^2 (f32)
    inv = jax.lax.rsqrt(var + EPS)
    return _leaky((x - mean) * (inv * gamma) + beta)


def residual_block_kernel(*refs, H, W, B, cg1, cg2, C1, C2):
    HW = H * W

    it = iter(refs)
    x_ref = next(it)                                  # (B, Cin, HW)
    w1_ref = next(it)                                 # (2, C1, Cin)  bf16 hi/lo
    w2_ref = next(it)                                 # (2, C2, 9*C1) bf16 hi/lo
    gb_ref = next(it)                                 # (C1+C2, 2)    f32 (gamma, beta)
    gm1_ref = next(it) if cg1 > 1 else None           # (C1, C1) / n  f32
    gm2_ref = next(it) if cg2 > 1 else None           # (C2, C2) / n  f32
    o_ref = next(it)                                  # (B, C2, HW)

    # Grid-invariant operands: constant block index => DMA'd once, loaded once
    # per step here and shared by all B samples in this step.
    w1_hi, w1_lo = w1_ref[0], w1_ref[1]
    w2_hi, w2_lo = w2_ref[0], w2_ref[1]
    gb = gb_ref[...]
    g1, b1 = gb[:C1, 0:1], gb[:C1, 1:2]
    g2, b2 = gb[C1:, 0:1], gb[C1:, 1:2]
    gm1 = gm1_ref[...] if gm1_ref is not None else None
    gm2 = gm2_ref[...] if gm2_ref is not None else None

    # ---- 3x3 boundary masks (built once, shared across the B samples) ------
    # Row predicates need no divide; the w index uses a bitwise AND when W is
    # a power of two.
    col = jax.lax.broadcasted_iota(jnp.int32, (1, HW), 1)
    if (W & (W - 1)) == 0:
        w_idx = jnp.bitwise_and(col, W - 1)
    else:
        w_idx = jax.lax.rem(col, W)
    row_mask = {-1: col >= W, 0: None, 1: col < (H - 1) * W}
    col_mask = {-1: w_idx >= 1, 0: None, 1: w_idx < W - 1}

    taps_meta = []                                    # (lane offset, mask) per tap
    for ky in range(3):
        for kx in range(3):
            off = (ky - 1) * W + (kx - 1)
            parts = [m for m in (row_mask[ky - 1], col_mask[kx - 1]) if m is not None]
            mask = None
            if parts:
                mask = parts[0] if len(parts) == 1 else parts[0] & parts[1]
            taps_meta.append((off, mask))

    # ---- per-sample pipeline (B samples per grid step) ----------------------
    for b in range(B):
        xb = x_ref[b].astype(jnp.float32)             # (Cin, HW)

        # conv1 (1x1) == (C1, Cin) @ (Cin, HW); bf16x3 on the MXU, f32 acc.
        xb_hi, xb_lo = _split_bf16(xb)
        out1 = _dot3(w1_hi, w1_lo, xb_hi, xb_lo)      # (C1, HW) f32
        out1 = _group_norm_leaky(out1, g1, b1, gm1, 1.0 / (HW * cg1))

        # conv2 (3x3, pad=1) as ONE im2col matmul with K = 9*C1.  Taps come
        # from pltpu.roll (XLU slot) along the flat HW lane axis + boundary
        # masks, then are packed to bf16 hi/lo before the concat so the
        # (9*C1, HW) operands are half the bytes of an f32 im2col.
        taps_hi, taps_lo = [], []
        for off, mask in taps_meta:
            t = out1 if off == 0 else pltpu.roll(out1, shift=(-off) % HW, axis=1)
            if mask is not None:
                t = jnp.where(mask, t, 0.0)
            t_hi, t_lo = _split_bf16(t)
            taps_hi.append(t_hi)
            taps_lo.append(t_lo)
        tap_hi = jnp.concatenate(taps_hi, axis=0)     # (9*C1, HW) bf16
        tap_lo = jnp.concatenate(taps_lo, axis=0)     # (9*C1, HW) bf16

        out2 = _dot3(w2_hi, w2_lo, tap_hi, tap_lo)    # (C2, HW) f32
        out2 = _group_norm_leaky(out2, g2, b2, gm2, 1.0 / (HW * cg2))

        # residual add + lane-dense (HW on lanes) store for sample b.
        o_ref[b] = (out2 + xb).astype(o_ref.dtype)


def _same_group_matrix(c, groups):
    cg = c // groups
    idx = jnp.arange(c) // cg
    return (idx[:, None] == idx[None, :]).astype(jnp.float32)


def _split_weight(w_mat_f32):
    """Pack an f32 weight matrix as a (2, ...) bf16 hi/lo stack (one operand)."""
    hi = w_mat_f32.astype(jnp.bfloat16)
    lo = (w_mat_f32 - hi.astype(jnp.float32)).astype(jnp.bfloat16)
    return jnp.stack([hi, lo], axis=0)


def _vmem_limit_bytes():
    # Generation-aware limit (v7x has 64 MiB VMEM vs 128 MiB on v5e/v6e).
    try:
        cap = int(pltpu.get_tpu_info().vmem_capacity_bytes)
    except Exception:
        cap = 64 * 1024 * 1024
    return min((cap * 3) // 4, 96 * 1024 * 1024)


def residual_block(x_nchw, w1, w2, g1, b1, g2, b2):
    """x_nchw: (N, Cin, H, W); w1: (C1, Cin, 1, 1); w2: (C2, C1, 3, 3)."""
    N, Cin, H, W = x_nchw.shape
    C1 = w1.shape[0]
    C2 = w2.shape[0]
    HW = H * W
    assert C2 == Cin, "residual add requires planes[1] == inplanes"
    assert C1 % GROUPS == 0 and C2 % GROUPS == 0, "GroupNorm: C % 16 must be 0"
    cg1 = C1 // GROUPS
    cg2 = C2 // GROUPS

    # Batch B samples per grid step, but keep >= 2 grid steps so the
    # ("parallel",) axis can be sharded across both TensorCores on v7x.
    num_steps = 2 if (N >= 2 and N % 2 == 0) else 1
    B = N // num_steps
    assert B * num_steps == N

    # Lane-dense per-sample layout: (C, H*W).  Pure reshapes, no HBM transposes.
    x_flat = x_nchw.reshape(N, Cin, HW)
    w1_pk = _split_weight(w1.reshape(C1, Cin).astype(jnp.float32))
    # (C2, 3, 3, C1) -> (C2, 9*C1): row-major matches the kernel's tap order.
    w2_mat = jnp.transpose(w2, (0, 2, 3, 1)).reshape(C2, 9 * C1).astype(jnp.float32)
    w2_pk = _split_weight(w2_mat)
    gb = jnp.concatenate(
        [jnp.stack([g1.astype(jnp.float32), b1.astype(jnp.float32)], axis=1),
         jnp.stack([g2.astype(jnp.float32), b2.astype(jnp.float32)], axis=1)],
        axis=0)                                       # (C1+C2, 2)

    rep3 = lambda s: (0, 0, 0)
    rep2 = lambda s: (0, 0)
    operands = [x_flat, w1_pk, w2_pk, gb]
    in_specs = [
        pl.BlockSpec((B, Cin, HW), lambda s: (s, 0, 0)),
        pl.BlockSpec((2, C1, Cin), rep3),
        pl.BlockSpec((2, C2, 9 * C1), rep3),
        pl.BlockSpec((C1 + C2, 2), rep2),
    ]
    # Group-aggregation matrices (1/n folded in); omitted when cg == 1.
    if cg1 > 1:
        operands.append(_same_group_matrix(C1, GROUPS) / float(HW * cg1))
        in_specs.append(pl.BlockSpec((C1, C1), rep2))
    if cg2 > 1:
        operands.append(_same_group_matrix(C2, GROUPS) / float(HW * cg2))
        in_specs.append(pl.BlockSpec((C2, C2), rep2))

    kernel = functools.partial(residual_block_kernel, H=H, W=W, B=B,
                               cg1=cg1, cg2=cg2, C1=C1, C2=C2)

    out_flat = pl.pallas_call(
        kernel,
        out_shape=jax.ShapeDtypeStruct((N, C2, HW), x_nchw.dtype),
        grid=(num_steps,),
        in_specs=in_specs,
        out_specs=pl.BlockSpec((B, C2, HW), lambda s: (s, 0, 0)),
        compiler_params=pltpu.CompilerParams(
            dimension_semantics=("parallel",),
            vmem_limit_bytes=_vmem_limit_bytes()),
    )(*operands)

    # TODO(synk): for large darknet resolutions (e.g. 208x208x128) add a
    # row-tiled conv2 + two-pass GroupNorm variant (accumulate s1/s2 across HW
    # row tiles with a +/-W halo, then normalize), with per-ky im2col
    # accumulation — required to fit v7x's 64 MiB VMEM at production sizes.
    return out_flat.reshape(N, C2, H, W)


# ---------------- pure-JAX reference (PyTorch semantics) ----------------
def _ref_group_norm(x, groups, gamma, beta):
    N, C, H, W = x.shape
    t = x.reshape(N, groups, -1)
    mean = t.mean(axis=2, keepdims=True)
    var = ((t - mean) ** 2).mean(axis=2, keepdims=True)
    t = (t - mean) / jnp.sqrt(var + EPS)
    t = t.reshape(N, C, H, W)
    return t * gamma.reshape(1, C, 1, 1) + beta.reshape(1, C, 1, 1)


def ref_forward(x, w1, w2, g1, b1, g2, b2):
    dn = ("NCHW", "OIHW", "NCHW")
    hp = jax.lax.Precision.HIGHEST
    out = jax.lax.conv_general_dilated(x, w1, (1, 1), "VALID",
                                       dimension_numbers=dn, precision=hp)
    out = _leaky(_ref_group_norm(out, GROUPS, g1, b1))
    out = jax.lax.conv_general_dilated(out, w2, (1, 1), ((1, 1), (1, 1)),
                                       dimension_numbers=dn, precision=hp)
    out = _leaky(_ref_group_norm(out, GROUPS, g2, b2))
    return out + x


if __name__ == "__main__":
    key = jax.random.PRNGKey(0)
    N, Cin, H, W = 4, 32, 16, 16          # N=4 -> 2 grid steps x 2 samples/step
    planes = (16, 32)                     # planes[1] == inplanes for residual
    C1, C2 = planes

    ks = jax.random.split(key, 7)
    x = jax.random.normal(ks[0], (N, Cin, H, W), jnp.float32)
    w1 = 0.1 * jax.random.normal(ks[1], (C1, Cin, 1, 1), jnp.float32)
    w2 = 0.1 * jax.random.normal(ks[2], (C2, C1, 3, 3), jnp.float32)
    g1 = 1.0 + 0.1 * jax.random.normal(ks[3], (C1,), jnp.float32)
    b1 = 0.1 * jax.random.normal(ks[4], (C1,), jnp.float32)
    g2 = 1.0 + 0.1 * jax.random.normal(ks[5], (C2,), jnp.float32)
    b2 = 0.1 * jax.random.normal(ks[6], (C2,), jnp.float32)

    out = residual_block(x, w1, w2, g1, b1, g2, b2)
    out = jax.block_until_ready(out)

    ref = ref_forward(x, w1, w2, g1, b1, g2, b2)
    assert out.shape == ref.shape == (N, C2, H, W)
    err = float(jnp.max(jnp.abs(out - ref)))
    assert err < 2e-3, f"max abs err {err}"
    print("KERNEL_OK")
</pallas_src>

<mosaic_0001>
module attributes {stable_mosaic.version = 11 : i64} {
  func.func @residual_block_kernel(%arg0: i32, %arg1: memref<2x32x256xf32, #tpu.memory_space<vmem>>, %arg2: memref<2x16x32xbf16, #tpu.memory_space<vmem>>, %arg3: memref<2x32x144xbf16, #tpu.memory_space<vmem>>, %arg4: memref<48x2xf32, #tpu.memory_space<vmem>>, %arg5: memref<32x32xf32, #tpu.memory_space<vmem>>, %arg6: memref<2x32x256xf32, #tpu.memory_space<vmem>>) attributes {dimension_semantics = [#tpu.dimension_semantics<parallel>], iteration_bounds = array<i64: 2>, scalar_prefetch = 0 : i64, scratch_operands = 0 : i64, tpu.core_type = #tpu.core_type<tc>, window_params = [{transform_indices = @transform_0, window_bounds = array<i64: 2, 32, 256>}, {pipeline_mode = #tpu.pipeline_mode<synchronous>, transform_indices = @transform_1, window_bounds = array<i64: 2, 16, 32>}, {pipeline_mode = #tpu.pipeline_mode<synchronous>, transform_indices = @transform_2, window_bounds = array<i64: 2, 32, 144>}, {pipeline_mode = #tpu.pipeline_mode<synchronous>, transform_indices = @transform_3, window_bounds = array<i64: 48, 2>}, {pipeline_mode = #tpu.pipeline_mode<synchronous>, transform_indices = @transform_4, window_bounds = array<i64: 32, 32>}, {transform_indices = @transform_5, window_bounds = array<i64: 2, 32, 256>}]} {
    %c0 = arith.constant 0 : index
    %c0_0 = arith.constant 0 : index
    %c0_1 = arith.constant 0 : index
    %0 = vector.load %arg2[%c0, %c0_0, %c0_1] : memref<2x16x32xbf16, #tpu.memory_space<vmem>>, vector<1x16x32xbf16>
    %1 = vector.shape_cast %0 : vector<1x16x32xbf16> to vector<16x32xbf16>
    %c1 = arith.constant 1 : index
    %c0_2 = arith.constant 0 : index
    %c0_3 = arith.constant 0 : index
    %2 = vector.load %arg2[%c1, %c0_2, %c0_3] : memref<2x16x32xbf16, #tpu.memory_space<vmem>>, vector<1x16x32xbf16>
    %3 = vector.shape_cast %2 : vector<1x16x32xbf16> to vector<16x32xbf16>
    %c0_4 = arith.constant 0 : index
    %c0_5 = arith.constant 0 : index
    %c0_6 = arith.constant 0 : index
    %4 = vector.load %arg3[%c0_4, %c0_5, %c0_6] : memref<2x32x144xbf16, #tpu.memory_space<vmem>>, vector<1x32x144xbf16>
    %5 = vector.shape_cast %4 : vector<1x32x144xbf16> to vector<32x144xbf16>
    %c1_7 = arith.constant 1 : index
    %c0_8 = arith.constant 0 : index
    %c0_9 = arith.constant 0 : index
    %6 = vector.load %arg3[%c1_7, %c0_8, %c0_9] : memref<2x32x144xbf16, #tpu.memory_space<vmem>>, vector<1x32x144xbf16>
    %7 = vector.shape_cast %6 : vector<1x32x144xbf16> to vector<32x144xbf16>
    %c0_10 = arith.constant 0 : index
    %c0_11 = arith.constant 0 : index
    %8 = vector.load %arg4[%c0_10, %c0_11] : memref<48x2xf32, #tpu.memory_space<vmem>>, vector<48x2xf32>
    %9 = vector.extract_strided_slice %8 {offsets = [0, 0], sizes = [16, 1], strides = [1, 1]} : vector<48x2xf32> to vector<16x1xf32>
    %10 = vector.extract_strided_slice %8 {offsets = [0, 1], sizes = [16, 1], strides = [1, 1]} : vector<48x2xf32> to vector<16x1xf32>
    %11 = vector.extract_strided_slice %8 {offsets = [16, 0], sizes = [32, 1], strides = [1, 1]} : vector<48x2xf32> to vector<32x1xf32>
    %12 = vector.extract_strided_slice %8 {offsets = [16, 1], sizes = [32, 1], strides = [1, 1]} : vector<48x2xf32> to vector<32x1xf32>
    %c0_12 = arith.constant 0 : index
    %c0_13 = arith.constant 0 : index
    %13 = vector.load %arg5[%c0_12, %c0_13] : memref<32x32xf32, #tpu.memory_space<vmem>>, vector<32x32xf32>
    %14 = tpu.iota {dimensions = array<i32: 1>} : vector<1x256xi32>
    %c15_i32 = arith.constant 15 : i32
    %15 = vector.broadcast %c15_i32 : i32 to vector<1x256xi32>
    %16 = arith.andi %14, %15 : vector<1x256xi32>
    %c16_i32 = arith.constant 16 : i32
    %17 = vector.broadcast %c16_i32 : i32 to vector<1x256xi32>
    %18 = arith.cmpi sge, %14, %17 : vector<1x256xi32>
    %c240_i32 = arith.constant 240 : i32
    %19 = vector.broadcast %c240_i32 : i32 to vector<1x256xi32>
    %20 = arith.cmpi slt, %14, %19 : vector<1x256xi32>
    %c1_i32 = arith.constant 1 : i32
    %21 = vector.broadcast %c1_i32 : i32 to vector<1x256xi32>
    %22 = arith.cmpi sge, %16, %21 : vector<1x256xi32>
    %c15_i32_14 = arith.constant 15 : i32
    %23 = vector.broadcast %c15_i32_14 : i32 to vector<1x256xi32>
    %24 = arith.cmpi slt, %16, %23 : vector<1x256xi32>
    %25 = arith.andi %18, %22 : vector<1x256xi1>
    %26 = arith.andi %18, %24 : vector<1x256xi1>
    %27 = arith.andi %20, %22 : vector<1x256xi1>
    %28 = arith.andi %20, %24 : vector<1x256xi1>
    %c0_15 = arith.constant 0 : index
    %c0_16 = arith.constant 0 : index
    %c0_17 = arith.constant 0 : index
    %29 = vector.load %arg1[%c0_15, %c0_16, %c0_17] : memref<2x32x256xf32, #tpu.memory_space<vmem>>, vector<1x32x256xf32>
    %30 = vector.shape_cast %29 : vector<1x32x256xf32> to vector<32x256xf32>
    %31 = arith.truncf %30 : vector<32x256xf32> to vector<32x256xbf16>
    %32 = arith.extf %31 : vector<32x256xbf16> to vector<32x256xf32>
    %33 = arith.subf %30, %32 : vector<32x256xf32>
    %34 = arith.truncf %33 : vector<32x256xf32> to vector<32x256xbf16>
    %cst = arith.constant dense<0.000000e+00> : vector<16x256xf32>
    %35 = tpu.matmul %1, %31, %cst {dimension_numbers = #tpu.dot_dimension_numbers<[1], [0], [0], [1], [0, 0, 1, 1], [], []>} : vector<16x32xbf16>, vector<32x256xbf16>, vector<16x256xf32> -> vector<16x256xf32>
    %cst_18 = arith.constant dense<0.000000e+00> : vector<16x256xf32>
    %36 = tpu.matmul %1, %34, %cst_18 {dimension_numbers = #tpu.dot_dimension_numbers<[1], [0], [0], [1], [0, 0, 1, 1], [], []>} : vector<16x32xbf16>, vector<32x256xbf16>, vector<16x256xf32> -> vector<16x256xf32>
    %37 = arith.addf %35, %36 : vector<16x256xf32>
    %cst_19 = arith.constant dense<0.000000e+00> : vector<16x256xf32>
    %38 = tpu.matmul %3, %31, %cst_19 {dimension_numbers = #tpu.dot_dimension_numbers<[1], [0], [0], [1], [0, 0, 1, 1], [], []>} : vector<16x32xbf16>, vector<32x256xbf16>, vector<16x256xf32> -> vector<16x256xf32>
    %39 = arith.addf %37, %38 : vector<16x256xf32>
    %cst_20 = arith.constant dense<0.000000e+00> : vector<16xf32>
    %40 = vector.multi_reduction <add>, %39, %cst_20 [1] : vector<16x256xf32> to vector<16xf32>
    %41 = vector.shape_cast %40 : vector<16xf32> to vector<16x1xf32>
    %42 = arith.mulf %39, %39 : vector<16x256xf32>
    %cst_21 = arith.constant dense<0.000000e+00> : vector<16xf32>
    %43 = vector.multi_reduction <add>, %42, %cst_21 [1] : vector<16x256xf32> to vector<16xf32>
    %44 = vector.shape_cast %43 : vector<16xf32> to vector<16x1xf32>
    %45 = tpu.concatenate %41, %44 in 1 : vector<16x1xf32>, vector<16x1xf32> -> vector<16x2xf32>
    %cst_22 = arith.constant 3.906250e-03 : f32
    %46 = vector.broadcast %cst_22 : f32 to vector<16x2xf32>
    %47 = arith.mulf %45, %46 : vector<16x2xf32>
    %48 = vector.extract_strided_slice %47 {offsets = [0, 0], sizes = [16, 1], strides = [1, 1]} : vector<16x2xf32> to vector<16x1xf32>
    %49 = vector.extract_strided_slice %47 {offsets = [0, 1], sizes = [16, 1], strides = [1, 1]} : vector<16x2xf32> to vector<16x1xf32>
    %50 = arith.mulf %48, %48 : vector<16x1xf32>
    %51 = arith.subf %49, %50 : vector<16x1xf32>
    %cst_23 = arith.constant 9.99999974E-6 : f32
    %52 = vector.broadcast %cst_23 : f32 to vector<16x1xf32>
    %53 = arith.addf %51, %52 : vector<16x1xf32>
    %54 = math.rsqrt %53 : vector<16x1xf32>
    %55 = vector.broadcast %48 : vector<16x1xf32> to vector<16x256xf32>
    %56 = arith.subf %39, %55 : vector<16x256xf32>
    %57 = arith.mulf %54, %9 : vector<16x1xf32>
    %58 = vector.broadcast %57 : vector<16x1xf32> to vector<16x256xf32>
    %59 = arith.mulf %56, %58 : vector<16x256xf32>
    %60 = vector.broadcast %10 : vector<16x1xf32> to vector<16x256xf32>
    %61 = arith.addf %59, %60 : vector<16x256xf32>
    %cst_24 = arith.constant 0.000000e+00 : f32
    %62 = vector.broadcast %cst_24 : f32 to vector<16x256xf32>
    %63 = arith.cmpf ogt, %61, %62 : vector<16x256xf32>
    %cst_25 = arith.constant 1.000000e-01 : f32
    %64 = vector.broadcast %cst_25 : f32 to vector<16x256xf32>
    %65 = arith.mulf %64, %61 : vector<16x256xf32>
    %66 = arith.select %63, %61, %65 : vector<16x256xi1>, vector<16x256xf32>
    %c17_i32 = arith.constant 17 : i32
    %67 = tpu.dynamic_rotate %66 by %c17_i32 dim 1 : vector<16x256xf32>, i32 -> vector<16x256xf32>
    %cst_26 = arith.constant 0.000000e+00 : f32
    %68 = vector.shape_cast %25 : vector<1x256xi1> to vector<1x256xi1>
    %69 = vector.broadcast %68 : vector<1x256xi1> to vector<16x256xi1>
    %70 = vector.broadcast %cst_26 : f32 to vector<16x256xf32>
    %71 = arith.select %69, %67, %70 : vector<16x256xi1>, vector<16x256xf32>
    %72 = arith.truncf %71 : vector<16x256xf32> to vector<16x256xbf16>
    %73 = arith.extf %72 : vector<16x256xbf16> to vector<16x256xf32>
    %74 = arith.subf %71, %73 : vector<16x256xf32>
    %75 = arith.truncf %74 : vector<16x256xf32> to vector<16x256xbf16>
    %c16_i32_27 = arith.constant 16 : i32
    %76 = tpu.dynamic_rotate %66 by %c16_i32_27 dim 1 : vector<16x256xf32>, i32 -> vector<16x256xf32>
    %cst_28 = arith.constant 0.000000e+00 : f32
    %77 = vector.shape_cast %18 : vector<1x256xi1> to vector<1x256xi1>
    %78 = vector.broadcast %77 : vector<1x256xi1> to vector<16x256xi1>
    %79 = vector.broadcast %cst_28 : f32 to vector<16x256xf32>
    %80 = arith.select %78, %76, %79 : vector<16x256xi1>, vector<16x256xf32>
    %81 = arith.truncf %80 : vector<16x256xf32> to vector<16x256xbf16>
    %82 = arith.extf %81 : vector<16x256xbf16> to vector<16x256xf32>
    %83 = arith.subf %80, %82 : vector<16x256xf32>
    %84 = arith.truncf %83 : vector<16x256xf32> to vector<16x256xbf16>
    %c15_i32_29 = arith.constant 15 : i32
    %85 = tpu.dynamic_rotate %66 by %c15_i32_29 dim 1 : vector<16x256xf32>, i32 -> vector<16x256xf32>
    %cst_30 = arith.constant 0.000000e+00 : f32
    %86 = vector.shape_cast %26 : vector<1x256xi1> to vector<1x256xi1>
    %87 = vector.broadcast %86 : vector<1x256xi1> to vector<16x256xi1>
    %88 = vector.broadcast %cst_30 : f32 to vector<16x256xf32>
    %89 = arith.select %87, %85, %88 : vector<16x256xi1>, vector<16x256xf32>
    %90 = arith.truncf %89 : vector<16x256xf32> to vector<16x256xbf16>
    %91 = arith.extf %90 : vector<16x256xbf16> to vector<16x256xf32>
    %92 = arith.subf %89, %91 : vector<16x256xf32>
    %93 = arith.truncf %92 : vector<16x256xf32> to vector<16x256xbf16>
    %c1_i32_31 = arith.constant 1 : i32
    %94 = tpu.dynamic_rotate %66 by %c1_i32_31 dim 1 : vector<16x256xf32>, i32 -> vector<16x256xf32>
    %cst_32 = arith.constant 0.000000e+00 : f32
    %95 = vector.shape_cast %22 : vector<1x256xi1> to vector<1x256xi1>
    %96 = vector.broadcast %95 : vector<1x256xi1> to vector<16x256xi1>
    %97 = vector.broadcast %cst_32 : f32 to vector<16x256xf32>
    %98 = arith.select %96, %94, %97 : vector<16x256xi1>, vector<16x256xf32>
    %99 = arith.truncf %98 : vector<16x256xf32> to vector<16x256xbf16>
    %100 = arith.extf %99 : vector<16x256xbf16> to vector<16x256xf32>
    %101 = arith.subf %98, %100 : vector<16x256xf32>
    %102 = arith.truncf %101 : vector<16x256xf32> to vector<16x256xbf16>
    %103 = arith.truncf %66 : vector<16x256xf32> to vector<16x256xbf16>
    %104 = arith.extf %103 : vector<16x256xbf16> to vector<16x256xf32>
    %105 = arith.subf %66, %104 : vector<16x256xf32>
    %106 = arith.truncf %105 : vector<16x256xf32> to vector<16x256xbf16>
    %c255_i32 = arith.constant 255 : i32
    %107 = tpu.dynamic_rotate %66 by %c255_i32 dim 1 : vector<16x256xf32>, i32 -> vector<16x256xf32>
    %cst_33 = arith.constant 0.000000e+00 : f32
    %108 = vector.shape_cast %24 : vector<1x256xi1> to vector<1x256xi1>
    %109 = vector.broadcast %108 : vector<1x256xi1> to vector<16x256xi1>
    %110 = vector.broadcast %cst_33 : f32 to vector<16x256xf32>
    %111 = arith.select %109, %107, %110 : vector<16x256xi1>, vector<16x256xf32>
    %112 = arith.truncf %111 : vector<16x256xf32> to vector<16x256xbf16>
    %113 = arith.extf %112 : vector<16x256xbf16> to vector<16x256xf32>
    %114 = arith.subf %111, %113 : vector<16x256xf32>
    %115 = arith.truncf %114 : vector<16x256xf32> to vector<16x256xbf16>
    %c241_i32 = arith.constant 241 : i32
    %116 = tpu.dynamic_rotate %66 by %c241_i32 dim 1 : vector<16x256xf32>, i32 -> vector<16x256xf32>
    %cst_34 = arith.constant 0.000000e+00 : f32
    %117 = vector.shape_cast %27 : vector<1x256xi1> to vector<1x256xi1>
    %118 = vector.broadcast %117 : vector<1x256xi1> to vector<16x256xi1>
    %119 = vector.broadcast %cst_34 : f32 to vector<16x256xf32>
    %120 = arith.select %118, %116, %119 : vector<16x256xi1>, vector<16x256xf32>
    %121 = arith.truncf %120 : vector<16x256xf32> to vector<16x256xbf16>
    %122 = arith.extf %121 : vector<16x256xbf16> to vector<16x256xf32>
    %123 = arith.subf %120, %122 : vector<16x256xf32>
    %124 = arith.truncf %123 : vector<16x256xf32> to vector<16x256xbf16>
    %c240_i32_35 = arith.constant 240 : i32
    %125 = tpu.dynamic_rotate %66 by %c240_i32_35 dim 1 : vector<16x256xf32>, i32 -> vector<16x256xf32>
    %cst_36 = arith.constant 0.000000e+00 : f32
    %126 = vector.shape_cast %20 : vector<1x256xi1> to vector<1x256xi1>
    %127 = vector.broadcast %126 : vector<1x256xi1> to vector<16x256xi1>
    %128 = vector.broadcast %cst_36 : f32 to vector<16x256xf32>
    %129 = arith.select %127, %125, %128 : vector<16x256xi1>, vector<16x256xf32>
    %130 = arith.truncf %129 : vector<16x256xf32> to vector<16x256xbf16>
    %131 = arith.extf %130 : vector<16x256xbf16> to vector<16x256xf32>
    %132 = arith.subf %129, %131 : vector<16x256xf32>
    %133 = arith.truncf %132 : vector<16x256xf32> to vector<16x256xbf16>
    %c239_i32 = arith.constant 239 : i32
    %134 = tpu.dynamic_rotate %66 by %c239_i32 dim 1 : vector<16x256xf32>, i32 -> vector<16x256xf32>
    %cst_37 = arith.constant 0.000000e+00 : f32
    %135 = vector.shape_cast %28 : vector<1x256xi1> to vector<1x256xi1>
    %136 = vector.broadcast %135 : vector<1x256xi1> to vector<16x256xi1>
    %137 = vector.broadcast %cst_37 : f32 to vector<16x256xf32>
    %138 = arith.select %136, %134, %137 : vector<16x256xi1>, vector<16x256xf32>
    %139 = arith.truncf %138 : vector<16x256xf32> to vector<16x256xbf16>
    %140 = arith.extf %139 : vector<16x256xbf16> to vector<16x256xf32>
    %141 = arith.subf %138, %140 : vector<16x256xf32>
    %142 = arith.truncf %141 : vector<16x256xf32> to vector<16x256xbf16>
    %143 = tpu.concatenate %72, %81, %90, %99, %103, %112, %121, %130, %139 in 0 : vector<16x256xbf16>, vector<16x256xbf16>, vector<16x256xbf16>, vector<16x256xbf16>, vector<16x256xbf16>, vector<16x256xbf16>, vector<16x256xbf16>, vector<16x256xbf16>, vector<16x256xbf16> -> vector<144x256xbf16>
    %144 = tpu.concatenate %75, %84, %93, %102, %106, %115, %124, %133, %142 in 0 : vector<16x256xbf16>, vector<16x256xbf16>, vector<16x256xbf16>, vector<16x256xbf16>, vector<16x256xbf16>, vector<16x256xbf16>, vector<16x256xbf16>, vector<16x256xbf16>, vector<16x256xbf16> -> vector<144x256xbf16>
    %cst_38 = arith.constant dense<0.000000e+00> : vector<32x256xf32>
    %145 = tpu.matmul %5, %143, %cst_38 {dimension_numbers = #tpu.dot_dimension_numbers<[1], [0], [0], [1], [0, 0, 1, 1], [], []>} : vector<32x144xbf16>, vector<144x256xbf16>, vector<32x256xf32> -> vector<32x256xf32>
    %cst_39 = arith.constant dense<0.000000e+00> : vector<32x256xf32>
    %146 = tpu.matmul %5, %144, %cst_39 {dimension_numbers = #tpu.dot_dimension_numbers<[1], [0], [0], [1], [0, 0, 1, 1], [], []>} : vector<32x144xbf16>, vector<144x256xbf16>, vector<32x256xf32> -> vector<32x256xf32>
    %147 = arith.addf %145, %146 : vector<32x256xf32>
    %cst_40 = arith.constant dense<0.000000e+00> : vector<32x256xf32>
    %148 = tpu.matmul %7, %143, %cst_40 {dimension_numbers = #tpu.dot_dimension_numbers<[1], [0], [0], [1], [0, 0, 1, 1], [], []>} : vector<32x144xbf16>, vector<144x256xbf16>, vector<32x256xf32> -> vector<32x256xf32>
    %149 = arith.addf %147, %148 : vector<32x256xf32>
    %cst_41 = arith.constant dense<0.000000e+00> : vector<32xf32>
    %150 = vector.multi_reduction <add>, %149, %cst_41 [1] : vector<32x256xf32> to vector<32xf32>
    %151 = vector.shape_cast %150 : vector<32xf32> to vector<32x1xf32>
    %152 = arith.mulf %149, %149 : vector<32x256xf32>
    %cst_42 = arith.constant dense<0.000000e+00> : vector<32xf32>
    %153 = vector.multi_reduction <add>, %152, %cst_42 [1] : vector<32x256xf32> to vector<32xf32>
    %154 = vector.shape_cast %153 : vector<32xf32> to vector<32x1xf32>
    %155 = tpu.concatenate %151, %154 in 1 : vector<32x1xf32>, vector<32x1xf32> -> vector<32x2xf32>
    %cst_43 = arith.constant dense<0.000000e+00> : vector<32x2xf32>
    %156 = tpu.matmul %13, %155, %cst_43 {dimension_numbers = #tpu.dot_dimension_numbers<[1], [0], [0], [1], [0, 0, 1, 1], [], []>} : vector<32x32xf32>, vector<32x2xf32>, vector<32x2xf32> -> vector<32x2xf32>
    %157 = vector.extract_strided_slice %156 {offsets = [0, 0], sizes = [32, 1], strides = [1, 1]} : vector<32x2xf32> to vector<32x1xf32>
    %158 = vector.extract_strided_slice %156 {offsets = [0, 1], sizes = [32, 1], strides = [1, 1]} : vector<32x2xf32> to vector<32x1xf32>
    %159 = arith.mulf %157, %157 : vector<32x1xf32>
    %160 = arith.subf %158, %159 : vector<32x1xf32>
    %cst_44 = arith.constant 9.99999974E-6 : f32
    %161 = vector.broadcast %cst_44 : f32 to vector<32x1xf32>
    %162 = arith.addf %160, %161 : vector<32x1xf32>
    %163 = math.rsqrt %162 : vector<32x1xf32>
    %164 = vector.broadcast %157 : vector<32x1xf32> to vector<32x256xf32>
    %165 = arith.subf %149, %164 : vector<32x256xf32>
    %166 = arith.mulf %163, %11 : vector<32x1xf32>
    %167 = vector.broadcast %166 : vector<32x1xf32> to vector<32x256xf32>
    %168 = arith.mulf %165, %167 : vector<32x256xf32>
    %169 = vector.broadcast %12 : vector<32x1xf32> to vector<32x256xf32>
    %170 = arith.addf %168, %169 : vector<32x256xf32>
    %cst_45 = arith.constant 0.000000e+00 : f32
    %171 = vector.broadcast %cst_45 : f32 to vector<32x256xf32>
    %172 = arith.cmpf ogt, %170, %171 : vector<32x256xf32>
    %cst_46 = arith.constant 1.000000e-01 : f32
    %173 = vector.broadcast %cst_46 : f32 to vector<32x256xf32>
    %174 = arith.mulf %173, %170 : vector<32x256xf32>
    %175 = arith.select %172, %170, %174 : vector<32x256xi1>, vector<32x256xf32>
    %176 = arith.addf %175, %30 : vector<32x256xf32>
    %c0_47 = arith.constant 0 : index
    %c0_48 = arith.constant 0 : index
    %c0_49 = arith.constant 0 : index
    %177 = vector.load %arg6[%c0_47, %c0_48, %c0_49] : memref<2x32x256xf32, #tpu.memory_space<vmem>>, vector<1x32x256xf32>
    %178 = vector.shape_cast %177 : vector<1x32x256xf32> to vector<32x256xf32>
    %179 = vector.shape_cast %176 : vector<32x256xf32> to vector<1x32x256xf32>
    tpu.vector_store %arg6[%c0_47, %c0_48, %c0_49], %179 {strides = array<i32>} : memref<2x32x256xf32, #tpu.memory_space<vmem>>, vector<1x32x256xf32>,
    %c1_50 = arith.constant 1 : index
    %c0_51 = arith.constant 0 : index
    %c0_52 = arith.constant 0 : index
    %180 = vector.load %arg1[%c1_50, %c0_51, %c0_52] : memref<2x32x256xf32, #tpu.memory_space<vmem>>, vector<1x32x256xf32>
    %181 = vector.shape_cast %180 : vector<1x32x256xf32> to vector<32x256xf32>
    %182 = arith.truncf %181 : vector<32x256xf32> to vector<32x256xbf16>
    %183 = arith.extf %182 : vector<32x256xbf16> to vector<32x256xf32>
    %184 = arith.subf %181, %183 : vector<32x256xf32>
    %185 = arith.truncf %184 : vector<32x256xf32> to vector<32x256xbf16>
    %cst_53 = arith.constant dense<0.000000e+00> : vector<16x256xf32>
    %186 = tpu.matmul %1, %182, %cst_53 {dimension_numbers = #tpu.dot_dimension_numbers<[1], [0], [0], [1], [0, 0, 1, 1], [], []>} : vector<16x32xbf16>, vector<32x256xbf16>, vector<16x256xf32> -> vector<16x256xf32>
    %cst_54 = arith.constant dense<0.000000e+00> : vector<16x256xf32>
    %187 = tpu.matmul %1, %185, %cst_54 {dimension_numbers = #tpu.dot_dimension_numbers<[1], [0], [0], [1], [0, 0, 1, 1], [], []>} : vector<16x32xbf16>, vector<32x256xbf16>, vector<16x256xf32> -> vector<16x256xf32>
    %188 = arith.addf %186, %187 : vector<16x256xf32>
    %cst_55 = arith.constant dense<0.000000e+00> : vector<16x256xf32>
    %189 = tpu.matmul %3, %182, %cst_55 {dimension_numbers = #tpu.dot_dimension_numbers<[1], [0], [0], [1], [0, 0, 1, 1], [], []>} : vector<16x32xbf16>, vector<32x256xbf16>, vector<16x256xf32> -> vector<16x256xf32>
    %190 = arith.addf %188, %189 : vector<16x256xf32>
    %cst_56 = arith.constant dense<0.000000e+00> : vector<16xf32>
    %191 = vector.multi_reduction <add>, %190, %cst_56 [1] : vector<16x256xf32> to vector<16xf32>
    %192 = vector.shape_cast %191 : vector<16xf32> to vector<16x1xf32>
    %193 = arith.mulf %190, %190 : vector<16x256xf32>
    %cst_57 = arith.constant dense<0.000000e+00> : vector<16xf32>
    %194 = vector.multi_reduction <add>, %193, %cst_57 [1] : vector<16x256xf32> to vector<16xf32>
    %195 = vector.shape_cast %194 : vector<16xf32> to vector<16x1xf32>
    %196 = tpu.concatenate %192, %195 in 1 : vector<16x1xf32>, vector<16x1xf32> -> vector<16x2xf32>
    %cst_58 = arith.constant 3.906250e-03 : f32
    %197 = vector.broadcast %cst_58 : f32 to vector<16x2xf32>
    %198 = arith.mulf %196, %197 : vector<16x2xf32>
    %199 = vector.extract_strided_slice %198 {offsets = [0, 0], sizes = [16, 1], strides = [1, 1]} : vector<16x2xf32> to vector<16x1xf32>
    %200 = vector.extract_strided_slice %198 {offsets = [0, 1], sizes = [16, 1], strides = [1, 1]} : vector<16x2xf32> to vector<16x1xf32>
    %201 = arith.mulf %199, %199 : vector<16x1xf32>
    %202 = arith.subf %200, %201 : vector<16x1xf32>
    %cst_59 = arith.constant 9.99999974E-6 : f32
    %203 = vector.broadcast %cst_59 : f32 to vector<16x1xf32>
    %204 = arith.addf %202, %203 : vector<16x1xf32>
    %205 = math.rsqrt %204 : vector<16x1xf32>
    %206 = vector.broadcast %199 : vector<16x1xf32> to vector<16x256xf32>
    %207 = arith.subf %190, %206 : vector<16x256xf32>
    %208 = arith.mulf %205, %9 : vector<16x1xf32>
    %209 = vector.broadcast %208 : vector<16x1xf32> to vector<16x256xf32>
    %210 = arith.mulf %207, %209 : vector<16x256xf32>
    %211 = vector.broadcast %10 : vector<16x1xf32> to vector<16x256xf32>
    %212 = arith.addf %210, %211 : vector<16x256xf32>
    %cst_60 = arith.constant 0.000000e+00 : f32
    %213 = vector.broadcast %cst_60 : f32 to vector<16x256xf32>
    %214 = arith.cmpf ogt, %212, %213 : vector<16x256xf32>
    %cst_61 = arith.constant 1.000000e-01 : f32
    %215 = vector.broadcast %cst_61 : f32 to vector<16x256xf32>
    %216 = arith.mulf %215, %212 : vector<16x256xf32>
    %217 = arith.select %214, %212, %216 : vector<16x256xi1>, vector<16x256xf32>
    %c17_i32_62 = arith.constant 17 : i32
    %218 = tpu.dynamic_rotate %217 by %c17_i32_62 dim 1 : vector<16x256xf32>, i32 -> vector<16x256xf32>
    %cst_63 = arith.constant 0.000000e+00 : f32
    %219 = vector.shape_cast %25 : vector<1x256xi1> to vector<1x256xi1>
    %220 = vector.broadcast %219 : vector<1x256xi1> to vector<16x256xi1>
    %221 = vector.broadcast %cst_63 : f32 to vector<16x256xf32>
    %222 = arith.select %220, %218, %221 : vector<16x256xi1>, vector<16x256xf32>
    %223 = arith.truncf %222 : vector<16x256xf32> to vector<16x256xbf16>
    %224 = arith.extf %223 : vector<16x256xbf16> to vector<16x256xf32>
    %225 = arith.subf %222, %224 : vector<16x256xf32>
    %226 = arith.truncf %225 : vector<16x256xf32> to vector<16x256xbf16>
    %c16_i32_64 = arith.constant 16 : i32
    %227 = tpu.dynamic_rotate %217 by %c16_i32_64 dim 1 : vector<16x256xf32>, i32 -> vector<16x256xf32>
    %cst_65 = arith.constant 0.000000e+00 : f32
    %228 = vector.shape_cast %18 : vector<1x256xi1> to vector<1x256xi1>
    %229 = vector.broadcast %228 : vector<1x256xi1> to vector<16x256xi1>
    %230 = vector.broadcast %cst_65 : f32 to vector<16x256xf32>
    %231 = arith.select %229, %227, %230 : vector<16x256xi1>, vector<16x256xf32>
    %232 = arith.truncf %231 : vector<16x256xf32> to vector<16x256xbf16>
    %233 = arith.extf %232 : vector<16x256xbf16> to vector<16x256xf32>
    %234 = arith.subf %231, %233 : vector<16x256xf32>
    %235 = arith.truncf %234 : vector<16x256xf32> to vector<16x256xbf16>
    %c15_i32_66 = arith.constant 15 : i32
    %236 = tpu.dynamic_rotate %217 by %c15_i32_66 dim 1 : vector<16x256xf32>, i32 -> vector<16x256xf32>
    %cst_67 = arith.constant 0.000000e+00 : f32
    %237 = vector.shape_cast %26 : vector<1x256xi1> to vector<1x256xi1>
    %238 = vector.broadcast %237 : vector<1x256xi1> to vector<16x256xi1>
    %239 = vector.broadcast %cst_67 : f32 to vector<16x256xf32>
    %240 = arith.select %238, %236, %239 : vector<16x256xi1>, vector<16x256xf32>
    %241 = arith.truncf %240 : vector<16x256xf32> to vector<16x256xbf16>
    %242 = arith.extf %241 : vector<16x256xbf16> to vector<16x256xf32>
    %243 = arith.subf %240, %242 : vector<16x256xf32>
    %244 = arith.truncf %243 : vector<16x256xf32> to vector<16x256xbf16>
    %c1_i32_68 = arith.constant 1 : i32
    %245 = tpu.dynamic_rotate %217 by %c1_i32_68 dim 1 : vector<16x256xf32>, i32 -> vector<16x256xf32>
    %cst_69 = arith.constant 0.000000e+00 : f32
    %246 = vector.shape_cast %22 : vector<1x256xi1> to vector<1x256xi1>
    %247 = vector.broadcast %246 : vector<1x256xi1> to vector<16x256xi1>
    %248 = vector.broadcast %cst_69 : f32 to vector<16x256xf32>
    %249 = arith.select %247, %245, %248 : vector<16x256xi1>, vector<16x256xf32>
    %250 = arith.truncf %249 : vector<16x256xf32> to vector<16x256xbf16>
    %251 = arith.extf %250 : vector<16x256xbf16> to vector<16x256xf32>
    %252 = arith.subf %249, %251 : vector<16x256xf32>
    %253 = arith.truncf %252 : vector<16x256xf32> to vector<16x256xbf16>
    %254 = arith.truncf %217 : vector<16x256xf32> to vector<16x256xbf16>
    %255 = arith.extf %254 : vector<16x256xbf16> to vector<16x256xf32>
    %256 = arith.subf %217, %255 : vector<16x256xf32>
    %257 = arith.truncf %256 : vector<16x256xf32> to vector<16x256xbf16>
    %c255_i32_70 = arith.constant 255 : i32
    %258 = tpu.dynamic_rotate %217 by %c255_i32_70 dim 1 : vector<16x256xf32>, i32 -> vector<16x256xf32>
    %cst_71 = arith.constant 0.000000e+00 : f32
    %259 = vector.shape_cast %24 : vector<1x256xi1> to vector<1x256xi1>
    %260 = vector.broadcast %259 : vector<1x256xi1> to vector<16x256xi1>
    %261 = vector.broadcast %cst_71 : f32 to vector<16x256xf32>
    %262 = arith.select %260, %258, %261 : vector<16x256xi1>, vector<16x256xf32>
    %263 = arith.truncf %262 : vector<16x256xf32> to vector<16x256xbf16>
    %264 = arith.extf %263 : vector<16x256xbf16> to vector<16x256xf32>
    %265 = arith.subf %262, %264 : vector<16x256xf32>
    %266 = arith.truncf %265 : vector<16x256xf32> to vector<16x256xbf16>
    %c241_i32_72 = arith.constant 241 : i32
    %267 = tpu.dynamic_rotate %217 by %c241_i32_72 dim 1 : vector<16x256xf32>, i32 -> vector<16x256xf32>
    %cst_73 = arith.constant 0.000000e+00 : f32
    %268 = vector.shape_cast %27 : vector<1x256xi1> to vector<1x256xi1>
    %269 = vector.broadcast %268 : vector<1x256xi1> to vector<16x256xi1>
    %270 = vector.broadcast %cst_73 : f32 to vector<16x256xf32>
    %271 = arith.select %269, %267, %270 : vector<16x256xi1>, vector<16x256xf32>
    %272 = arith.truncf %271 : vector<16x256xf32> to vector<16x256xbf16>
    %273 = arith.extf %272 : vector<16x256xbf16> to vector<16x256xf32>
    %274 = arith.subf %271, %273 : vector<16x256xf32>
    %275 = arith.truncf %274 : vector<16x256xf32> to vector<16x256xbf16>
    %c240_i32_74 = arith.constant 240 : i32
    %276 = tpu.dynamic_rotate %217 by %c240_i32_74 dim 1 : vector<16x256xf32>, i32 -> vector<16x256xf32>
    %cst_75 = arith.constant 0.000000e+00 : f32
    %277 = vector.shape_cast %20 : vector<1x256xi1> to vector<1x256xi1>
    %278 = vector.broadcast %277 : vector<1x256xi1> to vector<16x256xi1>
    %279 = vector.broadcast %cst_75 : f32 to vector<16x256xf32>
    %280 = arith.select %278, %276, %279 : vector<16x256xi1>, vector<16x256xf32>
    %281 = arith.truncf %280 : vector<16x256xf32> to vector<16x256xbf16>
    %282 = arith.extf %281 : vector<16x256xbf16> to vector<16x256xf32>
    %283 = arith.subf %280, %282 : vector<16x256xf32>
    %284 = arith.truncf %283 : vector<16x256xf32> to vector<16x256xbf16>
    %c239_i32_76 = arith.constant 239 : i32
    %285 = tpu.dynamic_rotate %217 by %c239_i32_76 dim 1 : vector<16x256xf32>, i32 -> vector<16x256xf32>
    %cst_77 = arith.constant 0.000000e+00 : f32
    %286 = vector.shape_cast %28 : vector<1x256xi1> to vector<1x256xi1>
    %287 = vector.broadcast %286 : vector<1x256xi1> to vector<16x256xi1>
    %288 = vector.broadcast %cst_77 : f32 to vector<16x256xf32>
    %289 = arith.select %287, %285, %288 : vector<16x256xi1>, vector<16x256xf32>
    %290 = arith.truncf %289 : vector<16x256xf32> to vector<16x256xbf16>
    %291 = arith.extf %290 : vector<16x256xbf16> to vector<16x256xf32>
    %292 = arith.subf %289, %291 : vector<16x256xf32>
    %293 = arith.truncf %292 : vector<16x256xf32> to vector<16x256xbf16>
    %294 = tpu.concatenate %223, %232, %241, %250, %254, %263, %272, %281, %290 in 0 : vector<16x256xbf16>, vector<16x256xbf16>, vector<16x256xbf16>, vector<16x256xbf16>, vector<16x256xbf16>, vector<16x256xbf16>, vector<16x256xbf16>, vector<16x256xbf16>, vector<16x256xbf16> -> vector<144x256xbf16>
    %295 = tpu.concatenate %226, %235, %244, %253, %257, %266, %275, %284, %293 in 0 : vector<16x256xbf16>, vector<16x256xbf16>, vector<16x256xbf16>, vector<16x256xbf16>, vector<16x256xbf16>, vector<16x256xbf16>, vector<16x256xbf16>, vector<16x256xbf16>, vector<16x256xbf16> -> vector<144x256xbf16>
    %cst_78 = arith.constant dense<0.000000e+00> : vector<32x256xf32>
    %296 = tpu.matmul %5, %294, %cst_78 {dimension_numbers = #tpu.dot_dimension_numbers<[1], [0], [0], [1], [0, 0, 1, 1], [], []>} : vector<32x144xbf16>, vector<144x256xbf16>, vector<32x256xf32> -> vector<32x256xf32>
    %cst_79 = arith.constant dense<0.000000e+00> : vector<32x256xf32>
    %297 = tpu.matmul %5, %295, %cst_79 {dimension_numbers = #tpu.dot_dimension_numbers<[1], [0], [0], [1], [0, 0, 1, 1], [], []>} : vector<32x144xbf16>, vector<144x256xbf16>, vector<32x256xf32> -> vector<32x256xf32>
    %298 = arith.addf %296, %297 : vector<32x256xf32>
    %cst_80 = arith.constant dense<0.000000e+00> : vector<32x256xf32>
    %299 = tpu.matmul %7, %294, %cst_80 {dimension_numbers = #tpu.dot_dimension_numbers<[1], [0], [0], [1], [0, 0, 1, 1], [], []>} : vector<32x144xbf16>, vector<144x256xbf16>, vector<32x256xf32> -> vector<32x256xf32>
    %300 = arith.addf %298, %299 : vector<32x256xf32>
    %cst_81 = arith.constant dense<0.000000e+00> : vector<32xf32>
    %301 = vector.multi_reduction <add>, %300, %cst_81 [1] : vector<32x256xf32> to vector<32xf32>
    %302 = vector.shape_cast %301 : vector<32xf32> to vector<32x1xf32>
    %303 = arith.mulf %300, %300 : vector<32x256xf32>
    %cst_82 = arith.constant dense<0.000000e+00> : vector<32xf32>
    %304 = vector.multi_reduction <add>, %303, %cst_82 [1] : vector<32x256xf32> to vector<32xf32>
    %305 = vector.shape_cast %304 : vector<32xf32> to vector<32x1xf32>
    %306 = tpu.concatenate %302, %305 in 1 : vector<32x1xf32>, vector<32x1xf32> -> vector<32x2xf32>
    %cst_83 = arith.constant dense<0.000000e+00> : vector<32x2xf32>
    %307 = tpu.matmul %13, %306, %cst_83 {dimension_numbers = #tpu.dot_dimension_numbers<[1], [0], [0], [1], [0, 0, 1, 1], [], []>} : vector<32x32xf32>, vector<32x2xf32>, vector<32x2xf32> -> vector<32x2xf32>
    %308 = vector.extract_strided_slice %307 {offsets = [0, 0], sizes = [32, 1], strides = [1, 1]} : vector<32x2xf32> to vector<32x1xf32>
    %309 = vector.extract_strided_slice %307 {offsets = [0, 1], sizes = [32, 1], strides = [1, 1]} : vector<32x2xf32> to vector<32x1xf32>
    %310 = arith.mulf %308, %308 : vector<32x1xf32>
    %311 = arith.subf %309, %310 : vector<32x1xf32>
    %cst_84 = arith.constant 9.99999974E-6 : f32
    %312 = vector.broadcast %cst_84 : f32 to vector<32x1xf32>
    %313 = arith.addf %311, %312 : vector<32x1xf32>
    %314 = math.rsqrt %313 : vector<32x1xf32>
    %315 = vector.broadcast %308 : vector<32x1xf32> to vector<32x256xf32>
    %316 = arith.subf %300, %315 : vector<32x256xf32>
    %317 = arith.mulf %314, %11 : vector<32x1xf32>
    %318 = vector.broadcast %317 : vector<32x1xf32> to vector<32x256xf32>
    %319 = arith.mulf %316, %318 : vector<32x256xf32>
    %320 = vector.broadcast %12 : vector<32x1xf32> to vector<32x256xf32>
    %321 = arith.addf %319, %320 : vector<32x256xf32>
    %cst_85 = arith.constant 0.000000e+00 : f32
    %322 = vector.broadcast %cst_85 : f32 to vector<32x256xf32>
    %323 = arith.cmpf ogt, %321, %322 : vector<32x256xf32>
    %cst_86 = arith.constant 1.000000e-01 : f32
    %324 = vector.broadcast %cst_86 : f32 to vector<32x256xf32>
    %325 = arith.mulf %324, %321 : vector<32x256xf32>
    %326 = arith.select %323, %321, %325 : vector<32x256xi1>, vector<32x256xf32>
    %327 = arith.addf %326, %181 : vector<32x256xf32>
    %c1_87 = arith.constant 1 : index
    %c0_88 = arith.constant 0 : index
    %c0_89 = arith.constant 0 : index
    %328 = vector.load %arg6[%c1_87, %c0_88, %c0_89] : memref<2x32x256xf32, #tpu.memory_space<vmem>>, vector<1x32x256xf32>
    %329 = vector.shape_cast %328 : vector<1x32x256xf32> to vector<32x256xf32>
    %330 = vector.shape_cast %327 : vector<32x256xf32> to vector<1x32x256xf32>
    tpu.vector_store %arg6[%c1_87, %c0_88, %c0_89], %330 {strides = array<i32>} : memref<2x32x256xf32, #tpu.memory_space<vmem>>, vector<1x32x256xf32>,
    return
  }
  func.func @transform_0(%arg0: i32) -> (i32, i32, i32) {
    %c0_i32 = arith.constant 0 : i32
    %c0_i32_0 = arith.constant 0 : i32
    %c0_i32_1 = arith.constant 0 : i32
    return %arg0, %c0_i32, %c0_i32_0 : i32, i32, i32
  }
  func.func @transform_1(%arg0: i32) -> (i32, i32, i32) {
    %c0_i32 = arith.constant 0 : i32
    %c0_i32_0 = arith.constant 0 : i32
    %c0_i32_1 = arith.constant 0 : i32
    %c0_i32_2 = arith.constant 0 : i32
    return %c0_i32, %c0_i32_0, %c0_i32_1 : i32, i32, i32
  }
  func.func @transform_2(%arg0: i32) -> (i32, i32, i32) {
    %c0_i32 = arith.constant 0 : i32
    %c0_i32_0 = arith.constant 0 : i32
    %c0_i32_1 = arith.constant 0 : i32
    %c0_i32_2 = arith.constant 0 : i32
    return %c0_i32, %c0_i32_0, %c0_i32_1 : i32, i32, i32
  }
  func.func @transform_3(%arg0: i32) -> (i32, i32) {
    %c0_i32 = arith.constant 0 : i32
    %c0_i32_0 = arith.constant 0 : i32
    %c0_i32_1 = arith.constant 0 : i32
    return %c0_i32, %c0_i32_0 : i32, i32
  }
  func.func @transform_4(%arg0: i32) -> (i32, i32) {
    %c0_i32 = arith.constant 0 : i32
    %c0_i32_0 = arith.constant 0 : i32
    %c0_i32_1 = arith.constant 0 : i32
    return %c0_i32, %c0_i32_0 : i32, i32
  }
  func.func @transform_5(%arg0: i32) -> (i32, i32, i32) {
    %c0_i32 = arith.constant 0 : i32
    %c0_i32_0 = arith.constant 0 : i32
    %c0_i32_1 = arith.constant 0 : i32
    return %arg0, %c0_i32, %c0_i32_0 : i32, i32, i32
  }
}

</mosaic_0001>

<bundles_post_ra>
// kernel: tpu_custom_call.1
= control target key start
LH: loop header
LB: loop body
LE: loop exit
PB: predicated region body
PF: predicated region fallthrough
CT: control target
= control target key end

     0   :  { %10 = vsyncpa [#allocation3], 0  ;;  %s4491_s0 = inlined_call_operand.hbm [shape: f32[4,32,256], index: 0, kind: input, shape index: {}]   ;;  %s4492_s1 = inlined_call_operand.vmem [shape: bf16[2,16,32], index: 1, kind: input, shape index: {}]   ;;  %s4493_s2 = inlined_call_operand.hbm [shape: bf16[2,32,144], index: 2, kind: input, shape index: {}]   ;;  %s4494_s3 = inlined_call_operand.vmem [shape: f32[48,2], index: 3, kind: input, shape index: {}]   ;;  %s4495_s4 = inlined_call_operand.vmem [shape: f32[32,32], index: 4, kind: input, shape index: {}]   ;;  %s4496_s5 = inlined_call_operand.hbm [shape: f32[4,32,256], index: 5, kind: output, shape index: {}]  }
   0x1   :  { %12 = vsyncpa [#allocation3 + $0x1], 0 }
   0x2   :  { %13 = vsyncpa [#allocation6], 0 }
   0x3   :  { %14 = vsyncpa [#allocation4], 0 }
   0x4   :  { %16 = vsyncpa [#allocation4 + $0x1], 0  ;;  %s3069_s18 = smov 0   ;;  %s3071_s19 = smov 0  }
   0x5   :  { %s3073_s20 = smov 0   ;;  %s3075_s21 = smov 0  }
   0x6 LB: > { %s3090_s22 = sadd.s32 4294967295, %s3019_s21   ;;  %s2396_s23 = sadd.s32 4294967294, %s3019_s21   ;;  %s3019_s21 = sphi %s3075_s21, %s4695_s21   ;;  %s3015_s20 = sphi %s3073_s20, %s4694_s20   ;;  %s3011_s19 = sphi %s3071_s19, %s4693_s19   ;;  %s3007_s18 = sphi %s3069_s18, %s4692_s18  }
   0x7   : > { %p42_p0 = scmp.ne.s32.totalorder %s3011_s19, %s3007_s18  ;;  %p4497_p1 = scmp.eq.s32.totalorder %s3090_s22, 0 }
   0x8   : > { %p156_p3 = scmp.eq.s32.totalorder %s2396_s23, 1  ;;  %p2397_p5 = scmp.ge.s32.totalorder %s3019_s21, 1 }
   0x9   : > { %p3099_p4 = por %p4497_p1, %p42_p0  ;;  %p163_p7 = scmp.lt.s32.totalorder %s3019_s21, 3 }
   0xa   : > { %p3104_p6 = por %p156_p3, %p42_p0  ;;  %s3021_s27 = smov [#allocation5]  }
   0xb   : > { %s4543_s24 = scalar_select %p3099_p4, 1, 0 }
   0xc   : > { %s4544_s25 = scalar_select %p3104_p6, 1, 0 }
   0xd   : > { %p3109_p8 = pnand %p2397_p5, %p163_p7  ;;  %s178_s28 = sshll.u32 %s3021_s27, 4  ;;  %s3113_s28 = int_to_ptr.vmem [resolvable:$true] %s178_s28 }
   0xe   : > { %s3125_s30 = sadd.s32 1, %s3019_s21   ;;  %s29_s6 = sadd.s32 1, %s3015_s20 }
   0xf   : > { %s4545_s26 = scalar_select %p3109_p8, 1, 0 }
  0x10   : > { %p2756_p9 = pneg %p3109_p8  ;;  %s26_s7 = ssub.s32 %s3019_s21, %s3125_s30 }
  0x11   : > { %s2891_s10 = scalar_lea.hbm %s4493_s2, 1024 }
  0x12   : > { %p3120_p11 = pnand %p2756_p9, %p4497_p1  ;;  %p2892_p12 = scmp.ne.s32.totalorder %s4493_s2, %s2891_s10 }
  0x13   : > { %p2898_p5 = scmp.lt.u32.totalorder %s2891_s10, %s4493_s2 }
  0x14   : > { %p2893_p13 = pneg %p3120_p11 }
  0x16   : > { %p2894_p0 = pnand %p2893_p13, %p2892_p12 }
  0x18   : > { %p2895_p3 = pneg %p2894_p0 }
  0x1a   : > { %p2900_p7 = pnand %p2898_p5, %p2895_p3 }
  0x1c   : > { %2903 = shalt.err (!%p2900_p7)
}
  0x1d   : > { %s2904_s15 = scalar_lea.vmem %s3113_s28, 1024  ;;  %p2912_p2 = scmp.lt.s32.totalorder %s3113_s28, %s3113_s28 }
  0x1e   : > { %p2905_p9 = scmp.ne.s32.totalorder %s3113_s28, %s2904_s15  ;;  %p2913_p6 = scmp.lt.s32.totalorder %s2904_s15, %s2904_s15 }
  0x20   : > { %p2907_p10 = pnand %p2905_p9, %p2893_p13  ;;  %p2914_p4 = por %p2913_p6, %p2912_p2 }
  0x22   : > { %p2908_p1 = pneg %p2907_p10 }
  0x24   : > { %p2915_p8 = pnand %p2914_p4, %p2908_p1 }
  0x26   : > { %2918 = shalt.err (!%p2915_p8)
}
  0x27   : > { %s3022_s16 = smov 128   ;;  %s3023_s17 = smov 8  }
  0x28   : > { %2759 = dma.hbm_to_vmem [thread:$0]  (!%p3120_p11), %s4493_s2, 1024, %s3113_s28, [#allocation6], %s3022_s16, %s3022_s16, %s3023_s17  }
  0x29   : > { %p27_p2 = scmp.eq.s32.totalorder %s26_s7, 0  ;;  %p36_p1 = scmp.ne.s32.totalorder %s3015_s20, %s3011_s19 }
  0x2a   : > { %p37_p4 = scmp.eq.s32.totalorder %s3019_s21, 0  ;;  %p2769_p6 = scmp.lt.s32.totalorder %s3019_s21, 2 }
  0x2b   : > { %s3156_s8 = scalar_select %p27_p2, %s3015_s20, %s29_s6  }
  0x2c   : > { %p38_p8 = por %p37_p4, %p36_p1  ;;  %p4547_p10 = scmp.eq.s32.totalorder %s3090_s22, 1 }
  0x2d   : > { %s198_s10 = sand.u32 1, %s3015_s20   ;;  %s2637_s11 = sshll.u32 %s3019_s21, 11 }
  0x2e   : > { %p3160_p12 = por %p4547_p10, %p36_p1  ;;  %s2400_s12 = sshll.u32 %s198_s10, 7 }
  0x2f   : > { %s3169_s14 = scalar_lea.hbm %s4491_s0, %s2637_s11  ;;  %s202_s28 = scalar_lea.vmem [#allocation2], %s2400_s12 }
  0x30   : > { %s210_s6 = sshll.u32 %s202_s28, 4  ;;  %p3171_p11 = pnand %p2769_p6, %p38_p8  ;;  %s3175_s6 = int_to_ptr.vmem [resolvable:$true] %s210_s6 }
  0x31   : > { %s3177_s15 = scalar_lea.sflag [#allocation3], %s198_s10  ;;  %s2919_s16 = scalar_lea.hbm %s3169_s14, 2048 }
  0x32   : > { %p2920_p13 = scmp.ne.s32.totalorder %s3169_s14, %s2919_s16  ;;  %p2921_p0 = pneg %p3171_p11 }
  0x33   : > { %s2924_s27 = scalar_lea.hbm %s4491_s0, 4096  ;;  %p2925_p7 = scmp.lt.u32.totalorder %s3169_s14, %s4491_s0 }
  0x34   : > { %p2922_p3 = pnand %p2921_p0, %p2920_p13  ;;  %p2926_p9 = scmp.lt.u32.totalorder %s2924_s27, %s2919_s16 }
  0x35   : > { %p2928_p1 = scmp.lt.u32.totalorder %s2919_s16, %s3169_s14 }
  0x36   : > { %p2923_p5 = pneg %p2922_p3  ;;  %p2927_p2 = por %p2926_p9, %p2925_p7 }
  0x38   : > { %p2929_p4 = por %p2928_p1, %p2927_p2 }
  0x3a   : > { %p2930_p6 = pnand %p2929_p4, %p2923_p5 }
  0x3c   : > { %2933 = shalt.err (!%p2930_p6)
}
  0x3d   : > { %s2934_s10 = scalar_lea.vmem %s3175_s6, 2048  ;;  %s3024_s29 = smov [#allocation2]  }
  0x3e   : > { %p2935_p8 = scmp.ne.s32.totalorder %s3175_s6, %s2934_s10  ;;  %s2939_s13 = sshll.u32 %s3024_s29, 4  ;;  %s2940_s13 = int_to_ptr.vmem [resolvable:$false] %s2939_s13 }
  0x3f   : > { %s2941_s28 = scalar_lea.vmem %s2940_s13, 4096  ;;  %p2942_p3 = scmp.lt.s32.totalorder %s3175_s6, %s2940_s13 }
  0x40   : > { %p2937_p10 = pnand %p2935_p8, %p2921_p0  ;;  %p2943_p7 = scmp.lt.s32.totalorder %s2941_s28, %s2934_s10 }
  0x42   : > { %p2938_p13 = pneg %p2937_p10  ;;  %p2944_p9 = por %p2943_p7, %p2942_p3 }
  0x44   : > { %p2945_p2 = pnand %p2944_p9, %p2938_p13 }
  0x46   : > { %2948 = shalt.err (!%p2945_p2)
}
  0x47   : > { %s3025_s16 = smov 256   ;;  %s3026_s17 = smov 16  }
  0x48   : > { %2763 = dma.hbm_to_vmem [thread:$0]  (!%p3171_p11), %s3169_s14, 2048, %s3175_s6, %s3177_s15, %s3025_s16, %s3025_s16, %s3026_s17  }
  0x49   : > { %p4550_p0 = scmp.ne.s32.totalorder %s4545_s26, 0 }
  0x4b   : > { %222 = sbr.rel (%p4550_p0) target bundleno = 3205 (0xc85), region = 40 }
  0x52   : > { %s3208_s23 = sand.u32 1, %s3011_s19   ;;  %p4551_p5 = scmp.ne.s32.totalorder %s4543_s24, 0 }
  0x53   : > { %s2405_s27 = sshll.u32 %s3208_s23, 7  ;;  %s225_s11 = scalar_lea.sflag [#allocation3], %s3208_s23 }
  0x54   : > { %s3214_s12 = scalar_lea.vmem [#allocation2], %s2405_s27 }
  0x55   : > { %2994 = dma.done.wait (%p4551_p5), %s225_s11, 2048  }
  0x56   : > { %2996 = vsyncadd (%p4551_p5), %s225_s11, 4294965248  ;;  %p4552_p11 = scmp.eq.s32.totalorder %s3090_s22, 0 }
  0x58   : > { %2998 = dma.done.wait (%p4552_p11), [#allocation6], 1024   ;;  %p4553_p1 = pmov %p4552_p11 }
  0x59   : > { %v4507_v0 = vmov 0   ;;  %v308_v1 = vld [vmem:[%s3214_s12 + $0x8] sm:$0xff]  ;;  %v310_v2 = vld [vmem:[%s3214_s12 + $0x18] sm:$0xff]  ;;  %v307_v3 = vld [vmem:[%s3214_s12] sm:$0xff]  ;;  %vm4516_vm0 = vcmask 261120   ;;  %vm4514_vm1 = vcmask 7168  }
  0x5a   : > { %3000 = vsyncadd (%p4553_p1), [#allocation6], 4294966272  ;;  %380 = vmatprep.mubr.bf16.mxu0 %v4507_v0  ;;  %2820 = vset.pattern.permute.xlu0 %v4507_v0  ;;  %v316_v4 = vpack.c.bf16 %v310_v2, %v308_v1  ;;  %v309_v5 = vld [vmem:[%s3214_s12 + $0x10] sm:$0xff]  ;;  %v312_v6 = vld [vmem:[%s3214_s12 + $0x28] sm:$0xff]  ;;  %s3028_s7 = smov 1   ;;  %v4505_v58 = vmov 1  }
  0x5b   : > { %2821 = vset.pattern.permute.xlu1 %v4507_v0  ;;  %v314_v7 = vld [vmem:[%s3214_s12 + $0x38] sm:$0xff]  ;;  %v315_v8 = vpack.c.bf16 %v309_v5, %v307_v3  ;;  %v311_v10 = vld [vmem:[%s3214_s12 + $0x20] sm:$0xff]  ;;  %v313_v11 = vld [vmem:[%s3214_s12 + $0x30] sm:$0xff]  ;;  %s3030_s28 = smov 17   ;;  %s3031_s16 = smov 16   ;;  %vm4517_vm6 = vcmask 130048  }
  0x5c   : > { %v318_v9 = vpack.c.bf16 %v314_v7, %v312_v6  ;;  %v320_v12 = vunpack.c.l.bf16 %v316_v4  ;;  %v322_v13 = vunpack.c.h.bf16 %v316_v4  ;;  %v317_v14 = vpack.c.bf16 %v313_v11, %v311_v10  ;;  %v2832_v33 = vld [vmem:[%s4492_s1] sm:$0xff]   ;;  %v2833_v34 = vld [vmem:[%s4492_s1 + $0x8] sm:$0xff]   ;;  %s3032_s17 = smov 15   ;;  %s3033_s11 = smov 127  }
  0x5d   : > { %v319_v15 = vunpack.c.l.bf16 %v315_v8  ;;  %v321_v16 = vunpack.c.h.bf16 %v315_v8  ;;  %v276_v57 = vld [vmem:[%s4494_s3] sm:$0xff]  ;;  %v277_v59 = vld [vmem:[%s4494_s3 + $0x8] sm:$0xff]  ;;  %s3034_s24 = smov 113   ;;  %s3035_s26 = smov 112  }
  0x5e   : > { %v324_v17 = vunpack.c.l.bf16 %v318_v9  ;;  %v326_v18 = vunpack.c.h.bf16 %v318_v9  ;;  %v328_v19 = vsub.f32 %v308_v1, %v320_v12  ;;  %v330_v20 = vsub.f32 %v310_v2, %v322_v13  ;;  %s3036_s14 = smov 111  }
  0x5f   : > { %v323_v21 = vunpack.c.l.bf16 %v317_v14  ;;  %v325_v22 = vunpack.c.h.bf16 %v317_v14  ;;  %v327_v23 = vsub.f32 %v307_v3, %v319_v15  ;;  %v329_v24 = vsub.f32 %v309_v5, %v321_v16 }
  0x60   : > { %v332_v25 = vsub.f32 %v312_v6, %v324_v17  ;;  %v334_v26 = vsub.f32 %v314_v7, %v326_v18  ;;  %v336_v27 = vpack.c.bf16 %v330_v20, %v328_v19 }
  0x61   : > { %v331_v28 = vsub.f32 %v311_v10, %v323_v21  ;;  %v333_v29 = vsub.f32 %v313_v11, %v325_v22  ;;  %v335_v30 = vpack.c.bf16 %v329_v24, %v327_v23 }
  0x62   : > { %v338_v31 = vpack.c.bf16 %v334_v26, %v332_v25  ;;  %348 = vmatprep.subr.bf16.mxu0 %v336_v27 }
  0x63   : > { %349 = vmatpush1.bf16.msra.mxu0 %v335_v30  ;;  %v337_v32 = vpack.c.bf16 %v333_v29, %v331_v28 }
  0x64   : > { %350 = vmatprep.subr.bf16.mxu0 %v338_v31 }
  0x67   : > { %351 = vmatpush1.bf16.msra.mxu0 %v337_v32 }
  0x68   : > { %391 = vmatprep.subr.bf16.mxu0 %v316_v4 }
  0x6a   : > { %2411 = vmatmul.mubr.msk.bf16.vlgmr.msra.gmra.mrb[0].mxu0 %vm4516_vm0, %v2832_v33 }
  0x6b   : > { %392 = vmatpush1.bf16.msra.mxu0 %v315_v8  ;;  %423 = vmatprep.mubr.bf16.mxu0 %v4507_v0 }
  0x6c   : > { %393 = vmatprep.subr.bf16.mxu0 %v318_v9 }
  0x6f   : > { %394 = vmatpush1.bf16.msra.mxu0 %v317_v14 }
  0x70   : > { %442 = vmatprep.subr.bf16.mxu0 %v316_v4 }
  0x76   : > { %2412 = vmatmul.mubr.msk.bf16.vlgmr.msra.gmra.mrb[0].mxu0 %vm4516_vm0, %v2832_v33 }
  0x77   : > { %443 = vmatpush1.bf16.msra.mxu0 %v315_v8  ;;  %474 = vmatprep.mubr.bf16.mxu0 %v4507_v0 }
  0x78   : > { %444 = vmatprep.subr.bf16.mxu0 %v318_v9 }
  0x7b   : > { %445 = vmatpush1.bf16.msra.mxu0 %v317_v14 }
  0x82   : > { %2414 = vmatmul.mubr.msk.bf16.vlgmr.msra.gmra.mrb[0].mxu0 %vm4516_vm0, %v2833_v34 }
 0x155   : > { %v3246_v35 = vpop.f32.mrb[0].mxu0 }
 0x156   : > { %v3248_v36 = vpop.f32.mrb[1].mxu0  ;;  %v495_v37 = vmul.f32 %v3246_v35, %v3246_v35 }
 0x157   : > { %v3252_v38 = vpop.f32.mrb[2].mxu0  ;;  %v489_v39 = vadd.f32 %v3248_v36, %v3246_v35  ;;  %v496_v40 = vmul.f32 %v3248_v36, %v3248_v36 }
 0x158   : > { %v3258_v41 = vpop.f32.mrb[3].mxu0  ;;  %v497_v42 = vmul.f32 %v3252_v38, %v3252_v38 }
 0x159   : > { %490 = vadd.xlane.f32.xlu0 %v489_v39  ;;  %v499_v43 = vadd.f32 %v496_v40, %v495_v37  ;;  %v492_v44 = vadd.f32 %v3258_v41, %v3252_v38  ;;  %v498_v45 = vmul.f32 %v3258_v41, %v3258_v41 }
 0x15b   : > { %500 = vadd.xlane.f32.xlu1 %v499_v43  ;;  %v502_v46 = vadd.f32 %v498_v45, %v497_v42 }
 0x15d   : > { %493 = vadd.xlane.f32.xlu0 %v492_v44 }
 0x15f   : > { %503 = vadd.xlane.f32.xlu1 %v502_v46 }
 0x1e6   : > { %v491_v47 = vpop.xlane.xlu0 %490 }
 0x1e8   : > { %v501_v48 = vpop.xlane.xlu1 %500 }
 0x1e9   : > { %v506_v49 = vsel %vm4514_vm1, %v491_v47, %v501_v48  ;;  %v3350_v47 = vld [vmem:[#allocation5 + $0x4] ss:$8 sps:$4 sm:$0xff]   ;;  %v286_v48 = vlaneseq }
 0x1ea   : > { %v508_v50 = vmul.f32 0.00390625, %v506_v49  ;;  %v494_v51 = vpop.xlane.xlu0 %493  ;;  %2419 = vmatprep.mubr.msk.bf16.mxu1 %vm4517_vm6, %v3350_v47 }
 0x1eb   : > { %v3355_v49 = vand.u32 127, %v286_v48 }
 0x1ec   : > { %v504_v52 = vpop.xlane.xlu1 %503  ;;  %v510_v53 = vmul.f32 %v508_v50, %v508_v50 }
 0x1ed   : > { %v507_v54 = vsel %vm4514_vm1, %v494_v51, %v504_v52  ;;  %v289_v51 = vand.u32 15, %v3355_v49  ;;  %vm4513_vm7 = vcmp.lt.s32.totalorder %v3355_v49, 17  ;;  %vm4515_vm8 = vcmp.ge.s32.totalorder %v3355_v49, 16 }
 0x1ee   : > { %v509_v55 = vmul.f32 0.00390625, %v507_v54  ;;  %514 = vrot.lane.b32.xlu0 %v510_v53, %s3028_s7  ;;  %v4555_v54 = vmov 0  ;;  %vm4512_vm12 = vcmp.lt.s32.totalorder %v3355_v49, 16  ;;  %vm4503_vm14 = vcmp.lt.s32.totalorder %v3355_v49, 15 }
 0x1ef   : > { %vm3364_vm9 = vcmp.ge.s32.totalorder %v289_v51, 1  ;;  %vm3418_vm13 = vcmp.lt.s32.totalorder %v289_v51, 15 }
 0x1f0   : > { %v511_v56 = vmul.f32 %v509_v55, %v509_v55  ;;  %v4556_v54 = vsel %vm3364_vm9, 4294967295, %v4555_v54  ;;  %vm3380_vm11 = vmand %vm4515_vm8, %vm3364_vm9 }
 0x1f1   : > { %vm3689_vm0 = vmpackc.low %vm3364_vm9, %vm3364_vm9 }
 0x1f2   : > { %528 = vperm.xlu0 %2820, %v508_v50   ;;  %516 = vrot.lane.b32.xlu1 %v511_v56, %s3028_s7 }
 0x1f6   : > { %542 = vrot.lane.b32.xlu1 %v276_v57, %s3028_s7  ;;  %2823 = vset.pattern.permute.xlu0 %v4505_v58 }
 0x1fa   : > { %544 = vrot.lane.b32.xlu1 %v277_v59, %s3028_s7 }
 0x1fe   : > { %533 = vperm.xlu1 %2821, %v509_v55  }
 0x202   : > { %2822 = vset.pattern.permute.xlu1 %v4505_v58 }
 0x260   : > { %v515_v60 = vpop.permute.xlu0 %514 }
 0x261   : > { %v520_v61 = vsub.f32 %v508_v50, %v515_v60  ;;  %v3358_v50 = vadd.s32 128, %v3355_v49 }
 0x263   : > { %v522_v62 = vadd.f32 1e-05, %v520_v61  ;;  %v290_v53 = vand.u32 15, %v3358_v50 }
 0x264   : > { %v517_v63 = vpop.permute.xlu1 %516 }
 0x265   : > { %2846 = vrsqrt.f32 %v522_v62  ;;  %v521_v1 = vsub.f32 %v509_v55, %v517_v63  ;;  %vm3372_vm10 = vcmp.ge.s32.totalorder %v290_v53, 1  ;;  %vm3424_vm15 = vcmp.lt.s32.totalorder %v290_v53, 15 }
 0x266   : > { %vm3658_vm1 = vmpackc.low %vm3424_vm15, %vm3424_vm15 }
 0x267   : > { %v523_v2 = vadd.f32 1e-05, %v521_v1 }
 0x268   : > { %v3280_v3 = vpop.permute.xlu1 %542 }
 0x269   : > { %2848 = vrsqrt.f32 %v523_v2 }
 0x26c   : > { %v3283_v6 = vpop.permute.xlu1 %544 }
 0x26f   : > { %v2847_v4 = vpop.eup %2846 }
 0x270   : > { %v548_v5 = vmul.f32 %v2847_v4, %v3280_v3 }
 0x271   : > { %v529_v10 = vpop.permute.xlu0 %528 }
 0x272   : > { %552 = vperm.xlu1 %2822, %v548_v5   ;;  %v536_v12 = vsub.f32 %v3246_v35, %v529_v10  ;;  %v537_v13 = vsub.f32 %v3248_v36, %v529_v10 }
 0x273   : > { %v2849_v7 = vpop.eup %2848 }
 0x274   : > { %v549_v8 = vmul.f32 %v2849_v7, %v3283_v6 }
 0x276   : > { %557 = vperm.xlu0 %2823, %v549_v8   ;;  %565 = vperm.xlu1 %2822, %v276_v57  }
 0x27a   : > { %569 = vperm.xlu1 %2822, %v277_v59  }
 0x27d   : > { %v534_v9 = vpop.permute.xlu1 %533 }
 0x27e   : > { %2824 = vset.pattern.permute.xlu1 %v4507_v0  ;;  %v538_v18 = vsub.f32 %v3252_v38, %v534_v9  ;;  %v539_v19 = vsub.f32 %v3258_v41, %v534_v9 }
 0x2f1   : > { %v553_v11 = vpop.permute.xlu1 %552 }
 0x2f2   : > { %v560_v14 = vmul.f32 %v553_v11, %v536_v12  ;;  %v561_v15 = vmul.f32 %v553_v11, %v537_v13 }
 0x2f5   : > { %v3289_v16 = vpop.permute.xlu1 %565  ;;  %v558_v17 = vpop.permute.xlu0 %557 }
 0x2f6   : > { %v572_v20 = vadd.f32 %v3289_v16, %v560_v14  ;;  %v573_v21 = vadd.f32 %v3289_v16, %v561_v15  ;;  %v562_v23 = vmul.f32 %v558_v17, %v538_v18  ;;  %v563_v24 = vmul.f32 %v558_v17, %v539_v19 }
 0x2f8   : > { %vm576_vm2 = vcmp.gt.f32.partialorder %v572_v20, 0.0  ;;  %v580_v22 = vmul.f32 0.1, %v572_v20  ;;  %v581_v26 = vmul.f32 0.1, %v573_v21  ;;  %vm577_vm3 = vcmp.gt.f32.partialorder %v573_v21, 0.0 }
 0x2f9   : > { %v3295_v25 = vpop.permute.xlu1 %569 }
 0x2fa   : > { %4554 = vst [vmem:[#allocation11_spill] sm:$0xff] %v3295_v25  ;;  %v584_v27 = vsel %vm576_vm2, %v572_v20, %v580_v22  ;;  %v574_v28 = vadd.f32 %v3295_v25, %v562_v23  ;;  %v575_v29 = vadd.f32 %v3295_v25, %v563_v24  ;;  %v585_v32 = vsel %vm577_vm3, %v573_v21, %v581_v26  ;;  %vm3432_vm2 = vmand %vm4515_vm8, %vm3418_vm13 }
 0x2fb   : > { %588 = vrot.lane.b32.xlu0 %v584_v27, %s3030_s28  ;;  %vm4501_vm3 = vcmp.lt.s32.totalorder %v3355_v49, 1 }
 0x2fc   : > { %vm578_vm4 = vcmp.gt.f32.partialorder %v574_v28, 0.0  ;;  %vm579_vm5 = vcmp.gt.f32.partialorder %v575_v29, 0.0  ;;  %v582_v30 = vmul.f32 0.1, %v574_v28  ;;  %v583_v31 = vmul.f32 0.1, %v575_v29 }
 0x2fe   : > { %v586_v33 = vsel %vm578_vm4, %v574_v28, %v582_v30  ;;  %v587_v34 = vsel %vm579_vm5, %v575_v29, %v583_v31  ;;  %vm4500_vm4 = vcmp.lt.s32.totalorder %v3355_v49, 127  ;;  %vm4518_vm5 = vcmp.lt.s32.totalorder %v3358_v50, 240 }
 0x2ff   : > { %592 = vrot.lane.b32.xlu0 %v585_v32, %s3030_s28  ;;  %590 = vrot.lane.b32.xlu1 %v586_v33, %s3030_s28  ;;  %v3302_v35 = vpack.c.bf16 %v587_v34, %v585_v32  ;;  %v3304_v36 = vpack.c.bf16 %v586_v33, %v584_v27 }
 0x301   : > { %v723_v37 = vunpack.c.l.bf16 %v3302_v35  ;;  %v725_v38 = vunpack.c.h.bf16 %v3302_v35  ;;  %v722_v39 = vunpack.c.l.bf16 %v3304_v36  ;;  %v724_v40 = vunpack.c.h.bf16 %v3304_v36 }
 0x303   : > { %621 = vrot.lane.b32.xlu0 %v584_v27, %s3031_s16  ;;  %594 = vrot.lane.b32.xlu1 %v587_v34, %s3030_s28  ;;  %v3312_v41 = vsub.f32 %v585_v32, %v723_v37  ;;  %v3314_v42 = vsub.f32 %v587_v34, %v725_v38  ;;  %v3316_v43 = vsub.f32 %v584_v27, %v722_v39 }
 0x304   : > { %v3318_v44 = vsub.f32 %v586_v33, %v724_v40 }
 0x305   : > { %v731_v45 = vpack.c.bf16 %v3314_v42, %v3312_v41 }
 0x306   : > { %v730_v46 = vpack.c.bf16 %v3318_v44, %v3316_v43 }
 0x307   : > { %625 = vrot.lane.b32.xlu0 %v585_v32, %s3031_s16  ;;  %623 = vrot.lane.b32.xlu1 %v586_v33, %s3031_s16 }
 0x30b   : > { %654 = vrot.lane.b32.xlu0 %v584_v27, %s3032_s17  ;;  %627 = vrot.lane.b32.xlu1 %v587_v34, %s3031_s16 }
 0x30f   : > { %658 = vrot.lane.b32.xlu0 %v585_v32, %s3032_s17  ;;  %656 = vrot.lane.b32.xlu1 %v586_v33, %s3032_s17 }
 0x313   : > { %687 = vrot.lane.b32.xlu0 %v584_v27, %s3028_s7  ;;  %660 = vrot.lane.b32.xlu1 %v587_v34, %s3032_s17 }
 0x317   : > { %691 = vrot.lane.b32.xlu0 %v585_v32, %s3028_s7  ;;  %689 = vrot.lane.b32.xlu1 %v586_v33, %s3028_s7 }
 0x31b   : > { %732 = vrot.lane.b32.xlu0 %v584_v27, %s3033_s11  ;;  %693 = vrot.lane.b32.xlu1 %v587_v34, %s3028_s7 }
 0x31f   : > { %736 = vrot.lane.b32.xlu0 %v585_v32, %s3033_s11  ;;  %734 = vrot.lane.b32.xlu1 %v586_v33, %s3033_s11 }
 0x323   : > { %765 = vrot.lane.b32.xlu0 %v584_v27, %s3034_s24  ;;  %738 = vrot.lane.b32.xlu1 %v587_v34, %s3033_s11 }
 0x327   : > { %769 = vrot.lane.b32.xlu0 %v585_v32, %s3034_s24  ;;  %767 = vrot.lane.b32.xlu1 %v586_v33, %s3034_s24 }
 0x32b   : > { %798 = vrot.lane.b32.xlu0 %v584_v27, %s3035_s26  ;;  %771 = vrot.lane.b32.xlu1 %v587_v34, %s3034_s24 }
 0x32f   : > { %802 = vrot.lane.b32.xlu0 %v585_v32, %s3035_s26  ;;  %800 = vrot.lane.b32.xlu1 %v586_v33, %s3035_s26 }
 0x333   : > { %831 = vrot.lane.b32.xlu0 %v584_v27, %s3036_s14  ;;  %804 = vrot.lane.b32.xlu1 %v587_v34, %s3035_s26 }
 0x337   : > { %835 = vrot.lane.b32.xlu0 %v585_v32, %s3036_s14  ;;  %833 = vrot.lane.b32.xlu1 %v586_v33, %s3036_s14 }
 0x33b   : > { %837 = vrot.lane.b32.xlu1 %v587_v34, %s3036_s14 }
 0x36d   : > { %v589_v52 = vpop.permute.xlu0 %588 }
 0x371   : > { %v591_v55 = vpop.permute.xlu1 %590  ;;  %v593_v56 = vpop.permute.xlu0 %592 }
 0x372   : > { %v597_v57 = vsel %vm4513_vm7, %v589_v52, %v593_v56  ;;  %v599_v59 = vsel %vm4513_vm7, %v593_v56, %v589_v52  ;;  %v4561_v52 = vmov 0 }
 0x373   : > { %v606_v4 = vsel %vm3372_vm10, %v597_v57, 0.0  ;;  %v605_v5 = vsel %vm3380_vm11, %v599_v59, 0.0  ;;  %v4562_v52 = vsel %vm3418_vm13, 4294967295, %v4561_v52 }
 0x375   : > { %v595_v62 = vpop.permute.xlu1 %594  ;;  %v622_v63 = vpop.permute.xlu0 %621 }
 0x376   : > { %v598_v1 = vsel %vm4513_vm7, %v591_v55, %v595_v62  ;;  %v600_v2 = vsel %vm4513_vm7, %v595_v62, %v591_v55  ;;  %vm3651_vm7 = vmpackc.low %vm4515_vm8, %vm4515_vm8 }
 0x377   : > { %v3392_v7 = vpack.c.bf16 %v598_v1, %v597_v57  ;;  %v3394_v8 = vpack.c.bf16 %v600_v2, %v599_v59  ;;  %v608_v9 = vsel %vm3372_vm10, %v598_v1, 0.0  ;;  %v607_v10 = vsel %vm3380_vm11, %v600_v2, 0.0 }
 0x378   : > { %v610_v11 = vpack.c.bf16 %v608_v9, %v606_v4  ;;  %v609_v12 = vpack.c.bf16 %v607_v10, %v605_v5 }
 0x379   : > { %v624_v13 = vpop.permute.xlu1 %623  ;;  %v626_v14 = vpop.permute.xlu0 %625 }
 0x37a   : > { %v612_v15 = vunpack.c.l.bf16 %v610_v11  ;;  %v614_v17 = vunpack.c.h.bf16 %v610_v11  ;;  %v632_v18 = vsel %vm4512_vm12, %v626_v14, %v622_v63  ;;  %v611_v19 = vunpack.c.l.bf16 %v609_v12 }
 0x37b   : > { %v613_v20 = vunpack.c.h.bf16 %v609_v12  ;;  %v630_v23 = vsel %vm4512_vm12, %v622_v63, %v626_v14  ;;  %v638_v29 = vsel %vm4515_vm8, %v632_v18, 0.0 }
 0x37c   : > { %v616_v21 = vsub.f32 %v606_v4, %v612_v15  ;;  %v618_v22 = vsub.f32 %v608_v9, %v614_v17  ;;  %v615_v27 = vsub.f32 %v605_v5, %v611_v19 }
 0x37d   : > { %v628_v24 = vpop.permute.xlu1 %627  ;;  %v655_v26 = vpop.permute.xlu0 %654  ;;  %v617_v28 = vsub.f32 %v607_v10, %v613_v20 }
 0x37e   : > { %v631_v30 = vsel %vm4512_vm12, %v624_v13, %v628_v24  ;;  %v633_v31 = vsel %vm4512_vm12, %v628_v24, %v624_v13  ;;  %v620_v32 = vpack.c.bf16 %v618_v22, %v616_v21  ;;  %vm3639_vm12 = vmpackc.low %vm3380_vm11, %vm3380_vm11 }
 0x37f   : > { %v640_v33 = vsel %vm4515_vm8, %v633_v31, 0.0  ;;  %v3413_v34 = vpack.c.bf16 %v631_v30, %v630_v23  ;;  %v3415_v37 = vpack.c.bf16 %v633_v31, %v632_v18  ;;  %v619_v38 = vpack.c.bf16 %v617_v28, %v615_v27  ;;  %vm3672_vm8 = vmpackc.low %vm3432_vm2, %vm3432_vm2 }
 0x380   : > { %v642_v39 = vpack.c.bf16 %v640_v33, %v638_v29  ;;  %889 = vmatprep.subr.bf16.mxu1 %v620_v32 }
 0x381   : > { %v647_v40 = vunpack.c.h.bf16 %v3413_v34  ;;  %v657_v48 = vpop.permute.xlu1 %656  ;;  %890 = vmatpush1.bf16.msra.mxu1 %v619_v38  ;;  %v659_v55 = vpop.permute.xlu0 %658  ;;  %v645_v56 = vunpack.c.l.bf16 %v3413_v34 }
 0x382   : > { %v644_v57 = vunpack.c.l.bf16 %v642_v39  ;;  %v646_v59 = vunpack.c.h.bf16 %v642_v39  ;;  %v3438_v4 = vsel %vm4503_vm14, %v655_v26, %v659_v55  ;;  %v3442_v53 = vsel %vm4503_vm14, %v659_v55, %v655_v26 }
 0x383   : > { %v651_v62 = vsub.f32 %v631_v30, %v647_v40  ;;  %v649_v1 = vsub.f32 %v630_v23, %v645_v56  ;;  %v671_v15 = vsel %vm3432_vm2, %v3442_v53, 0.0  ;;  %v672_v17 = vsel %vm3424_vm15, %v3438_v4, 0.0 }
 0x384   : > { %v650_v2 = vsub.f32 %v640_v33, %v646_v59  ;;  %v648_v5 = vsub.f32 %v638_v29, %v644_v57 }
 0x385   : > { %v661_v9 = vpop.permute.xlu1 %660  ;;  %v688_v10 = vpop.permute.xlu0 %687  ;;  %v653_v11 = vpack.c.bf16 %v651_v62, %v649_v1 }
 0x386   : > { %v3446_v12 = vsel %vm4503_vm14, %v657_v48, %v661_v9  ;;  %v3450_v13 = vsel %vm4503_vm14, %v661_v9, %v657_v48  ;;  %v652_v14 = vpack.c.bf16 %v650_v2, %v648_v5  ;;  %vm4509_vm14 = vcmp.lt.s32.totalorder %v3355_v49, 111 }
 0x387   : > { %v673_v18 = vsel %vm3432_vm2, %v3450_v13, 0.0  ;;  %v674_v19 = vsel %vm3424_vm15, %v3446_v12, 0.0  ;;  %891 = vmatprep.subr.bf16.mxu1 %v653_v11 }
 0x388   : > { %v675_v20 = vpack.c.bf16 %v673_v18, %v671_v15  ;;  %v676_v21 = vpack.c.bf16 %v674_v19, %v672_v17  ;;  %892 = vmatpush1.bf16.msra.mxu1 %v652_v14 }
 0x389   : > { %v690_v22 = vpop.permute.xlu1 %689  ;;  %v692_v23 = vpop.permute.xlu0 %691 }
 0x38a   : > { %v677_v24 = vunpack.c.l.bf16 %v675_v20  ;;  %v678_v26 = vunpack.c.l.bf16 %v676_v21  ;;  %v679_v27 = vunpack.c.h.bf16 %v675_v20  ;;  %v680_v28 = vunpack.c.h.bf16 %v676_v21 }
 0x38b   : > { %v3467_v31 = vsel %vm4501_vm3, %v688_v10, %v692_v23  ;;  %v3471_v32 = vsel %vm4501_vm3, %v692_v23, %v688_v10 }
 0x38c   : > { %v683_v29 = vsub.f32 %v673_v18, %v679_v27  ;;  %v684_v30 = vsub.f32 %v674_v19, %v680_v28  ;;  %v682_v39 = vsub.f32 %v672_v17, %v678_v26  ;;  %v681_v40 = vsub.f32 %v671_v15, %v677_v24 }
 0x38d   : > { %v694_v33 = vpop.permute.xlu1 %693  ;;  %v733_v38 = vpop.permute.xlu0 %732  ;;  %v704_v56 = vsel %vm3364_vm9, %v3471_v32, 0.0  ;;  %v705_v57 = vsel %vm3372_vm10, %v3467_v31, 0.0 }
 0x38e   : > { %v3475_v48 = vsel %vm4501_vm3, %v690_v22, %v694_v33  ;;  %v3479_v55 = vsel %vm4501_vm3, %v694_v33, %v690_v22  ;;  %v686_v5 = vpack.c.bf16 %v684_v30, %v682_v39  ;;  %v685_v9 = vpack.c.bf16 %v683_v29, %v681_v40  ;;  %vm3528_vm3 = vmand %vm4518_vm5, %vm3372_vm10 }
 0x38f   : > { %v706_v59 = vsel %vm3364_vm9, %v3479_v55, 0.0  ;;  %v707_v62 = vsel %vm3372_vm10, %v3475_v48, 0.0 }
 0x390   : > { %v708_v1 = vpack.c.bf16 %v706_v59, %v704_v56  ;;  %v709_v2 = vpack.c.bf16 %v707_v62, %v705_v57  ;;  %893 = vmatprep.subr.bf16.mxu1 %v686_v5 }
 0x391   : > { %v735_v10 = vpop.permute.xlu1 %734  ;;  %v737_v11 = vpop.permute.xlu0 %736  ;;  %894 = vmatpush1.bf16.msra.mxu1 %v685_v9 }
 0x392   : > { %v710_v14 = vunpack.c.l.bf16 %v708_v1  ;;  %v711_v15 = vunpack.c.l.bf16 %v709_v2  ;;  %v712_v17 = vunpack.c.h.bf16 %v708_v1  ;;  %v713_v18 = vunpack.c.h.bf16 %v709_v2 }
 0x393   : > { %v3496_v21 = vsel %vm4500_vm4, %v733_v38, %v737_v11  ;;  %v3500_v22 = vsel %vm4500_vm4, %v737_v11, %v733_v38 }
 0x394   : > { %v716_v19 = vsub.f32 %v706_v59, %v712_v17  ;;  %v717_v20 = vsub.f32 %v707_v62, %v713_v18  ;;  %v715_v26 = vsub.f32 %v705_v57, %v711_v15  ;;  %v714_v27 = vsub.f32 %v704_v56, %v710_v14 }
 0x395   : > { %v739_v23 = vpop.permute.xlu1 %738  ;;  %v766_v24 = vpop.permute.xlu0 %765  ;;  %v749_v30 = vsel %vm3418_vm13, %v3496_v21, 0.0  ;;  %v750_v33 = vsel %vm3424_vm15, %v3500_v22, 0.0  ;;  %v4567_v15 = vmov 0 }
 0x396   : > { %v3504_v28 = vsel %vm4500_vm4, %v735_v10, %v739_v23  ;;  %v3508_v29 = vsel %vm4500_vm4, %v739_v23, %v735_v10  ;;  %v719_v57 = vpack.c.bf16 %v717_v20, %v715_v26  ;;  %v718_v59 = vpack.c.bf16 %v716_v19, %v714_v27 }
 0x397   : > { %v751_v38 = vsel %vm3418_vm13, %v3504_v28, 0.0  ;;  %v752_v39 = vsel %vm3424_vm15, %v3508_v29, 0.0  ;;  %vm4502_vm4 = vcmp.lt.s32.totalorder %v3355_v49, 113  ;;  %v4568_v15 = vsel %vm3528_vm3, 4294967295, %v4567_v15 }
 0x398   : > { %v753_v40 = vpack.c.bf16 %v751_v38, %v749_v30  ;;  %v754_v56 = vpack.c.bf16 %v752_v39, %v750_v33  ;;  %895 = vmatprep.subr.bf16.mxu1 %v719_v57 }
 0x399   : > { %v768_v62 = vpop.permute.xlu1 %767  ;;  %v770_v1 = vpop.permute.xlu0 %769  ;;  %896 = vmatpush1.bf16.msra.mxu1 %v718_v59 }
 0x39a   : > { %v755_v2 = vunpack.c.l.bf16 %v753_v40  ;;  %v756_v5 = vunpack.c.l.bf16 %v754_v56  ;;  %v757_v9 = vunpack.c.h.bf16 %v753_v40  ;;  %v758_v10 = vunpack.c.h.bf16 %v754_v56  ;;  %897 = vmatprep.subr.bf16.mxu1 %v731_v45 }
 0x39b   : > { %v3534_v17 = vsel %vm4502_vm4, %v766_v24, %v770_v1  ;;  %v3538_v18 = vsel %vm4502_vm4, %v770_v1, %v766_v24 }
 0x39c   : > { %v761_v11 = vsub.f32 %v751_v38, %v757_v9  ;;  %v762_v14 = vsub.f32 %v752_v39, %v758_v10  ;;  %v760_v23 = vsub.f32 %v750_v33, %v756_v5  ;;  %v759_v26 = vsub.f32 %v749_v30, %v755_v2 }
 0x39d   : > { %v772_v19 = vpop.permute.xlu1 %771  ;;  %v799_v20 = vpop.permute.xlu0 %798  ;;  %v782_v24 = vsel %vm3364_vm9, %v3534_v17, 0.0  ;;  %v783_v41 = vsel %vm3528_vm3, %v3538_v18, 0.0  ;;  %898 = vmatpush1.bf16.msra.mxu1 %v730_v46 }
 0x39e   : > { %v3545_v27 = vsel %vm4502_vm4, %v768_v62, %v772_v19  ;;  %v3549_v38 = vsel %vm4502_vm4, %v772_v19, %v768_v62  ;;  %v764_v39 = vpack.c.bf16 %v762_v14, %v760_v23  ;;  %v763_v40 = vpack.c.bf16 %v761_v11, %v759_v26 }
 0x39f   : > { %v784_v42 = vsel %vm3364_vm9, %v3545_v27, 0.0  ;;  %v785_v45 = vsel %vm3528_vm3, %v3549_v38, 0.0  ;;  %vm4504_vm4 = vcmp.lt.s32.totalorder %v3355_v49, 112 }
 0x3a0   : > { %v786_v30 = vpack.c.bf16 %v784_v42, %v782_v24  ;;  %v787_v33 = vpack.c.bf16 %v785_v45, %v783_v41  ;;  %899 = vmatprep.subr.bf16.mxu1 %v764_v39 }
 0x3a1   : > { %v801_v56 = vpop.permute.xlu1 %800  ;;  %v803_v57 = vpop.permute.xlu0 %802  ;;  %900 = vmatpush1.bf16.msra.mxu1 %v763_v40 }
 0x3a2   : > { %v788_v59 = vunpack.c.l.bf16 %v786_v30  ;;  %v789_v62 = vunpack.c.l.bf16 %v787_v33  ;;  %v790_v1 = vunpack.c.h.bf16 %v786_v30  ;;  %v791_v2 = vunpack.c.h.bf16 %v787_v33 }
 0x3a3   : > { %v3569_v43 = vsel %vm4504_vm4, %v803_v57, %v799_v20  ;;  %v807_v14 = vsel %vm4504_vm4, %v799_v20, %v803_v57 }
 0x3a4   : > { %v794_v5 = vsub.f32 %v784_v42, %v790_v1  ;;  %v795_v9 = vsub.f32 %v785_v45, %v791_v2  ;;  %v793_v44 = vsub.f32 %v783_v41, %v789_v62  ;;  %v792_v11 = vsub.f32 %v782_v24, %v788_v59 }
 0x3a5   : > { %v805_v46 = vpop.permute.xlu1 %804  ;;  %v832_v10 = vpop.permute.xlu0 %831  ;;  %v816_v42 = vsel %vm4518_vm5, %v3569_v43, 0.0 }
 0x3a6   : > { %v808_v19 = vsel %vm4504_vm4, %v801_v56, %v805_v46  ;;  %v3577_v23 = vsel %vm4504_vm4, %v805_v46, %v801_v56  ;;  %v797_v26 = vpack.c.bf16 %v795_v9, %v793_v44  ;;  %v796_v45 = vpack.c.bf16 %v794_v5, %v792_v11  ;;  %vm3598_vm4 = vmand %vm4518_vm5, %vm3424_vm15 }
 0x3a7   : > { %v818_v41 = vsel %vm4518_vm5, %v3577_v23, 0.0  ;;  %v3585_v24 = vpack.c.bf16 %v808_v19, %v807_v14  ;;  %v4569_v5 = vmov 0  ;;  %vm3715_vm5 = vmpackc.low %vm3528_vm3, %vm3528_vm3 }
 0x3a8   : > { %v820_v20 = vpack.c.bf16 %v818_v41, %v816_v42  ;;  %901 = vmatprep.subr.bf16.mxu1 %v797_v26  ;;  %v4570_v5 = vsel %vm3598_vm4, 4294967295, %v4569_v5  ;;  %vm3743_vm3 = vmpackc.low %vm3598_vm4, %vm3598_vm4 }
 0x3a9   : > { %v823_v30 = vunpack.c.h.bf16 %v3585_v24  ;;  %v834_v33 = vpop.permute.xlu1 %833  ;;  %902 = vmatpush1.bf16.msra.mxu1 %v796_v45  ;;  %v836_v39 = vpop.permute.xlu0 %835  ;;  %v821_v40 = vunpack.c.l.bf16 %v3585_v24 }
 0x3aa   : > { %v822_v56 = vunpack.c.l.bf16 %v820_v20  ;;  %v824_v57 = vunpack.c.h.bf16 %v820_v20  ;;  %v3592_v62 = vsel %vm4509_vm14, %v832_v10, %v836_v39  ;;  %v3604_v9 = vsel %vm4509_vm14, %v836_v39, %v832_v10 }
 0x3ab   : > { %v827_v59 = vsub.f32 %v808_v19, %v823_v30  ;;  %v825_v1 = vsub.f32 %v807_v14, %v821_v40  ;;  %v848_v11 = vsel %vm3418_vm13, %v3592_v62, 0.0  ;;  %v849_v10 = vsel %vm3598_vm4, %v3604_v9, 0.0 }
 0x3ac   : > { %v828_v2 = vsub.f32 %v818_v41, %v824_v57  ;;  %v826_v44 = vsub.f32 %v816_v42, %v822_v56 }
 0x3ad   : > { %v838_v46 = vpop.permute.xlu1 %837  ;;  %v829_v45 = vpack.c.bf16 %v827_v59, %v825_v1  ;;  %v2836_v59 = vld [vmem:[#allocation5] ss:$8 sps:$4 sm:$0xff]   ;;  %v2837_v1 = vld [vmem:[#allocation5 + $0x14] ss:$8 sps:$4 sm:$0xff]  }
 0x3ae   : > { %v3611_v14 = vsel %vm4509_vm14, %v834_v33, %v838_v46  ;;  %v3615_v19 = vsel %vm4509_vm14, %v838_v46, %v834_v33  ;;  %v830_v26 = vpack.c.bf16 %v828_v2, %v826_v44  ;;  %vm3629_vm14 = vmpackc.low %vm3372_vm10, %vm3372_vm10 }
 0x3af   : > { %v850_v42 = vsel %vm3418_vm13, %v3611_v14, 0.0  ;;  %v851_v41 = vsel %vm3598_vm4, %v3615_v19, 0.0 }
 0x3b0   : > { %v852_v20 = vpack.c.bf16 %v850_v42, %v848_v11  ;;  %v853_v30 = vpack.c.bf16 %v851_v41, %v849_v10  ;;  %903 = vmatprep.subr.bf16.mxu1 %v830_v26  ;;  %v2431_v26 = vpack.c.bf16 %v3446_v12, %v3438_v4  ;;  %v2437_v4 = vpack.c.bf16 %v3475_v48, %v3467_v31 }
 0x3b1   : > { %904 = vmatpush1.bf16.msra.mxu1 %v829_v45 }
 0x3b2   : > { %v854_v33 = vunpack.c.l.bf16 %v852_v20  ;;  %v855_v39 = vunpack.c.l.bf16 %v853_v30  ;;  %v856_v40 = vunpack.c.h.bf16 %v852_v20  ;;  %v857_v56 = vunpack.c.h.bf16 %v853_v30 }
 0x3b4   : > { %v860_v57 = vsub.f32 %v850_v42, %v856_v40  ;;  %v861_v2 = vsub.f32 %v851_v41, %v857_v56  ;;  %v859_v44 = vsub.f32 %v849_v10, %v855_v39  ;;  %v858_v46 = vsub.f32 %v848_v11, %v854_v33  ;;  %v2839_v10 = vld [vmem:[#allocation5 + $0x10] ss:$8 sps:$4 sm:$0xff]  }
 0x3b5   : > { %v2434_v41 = vpack.c.bf16 %v3450_v13, %v3442_v53  ;;  %v2440_v53 = vpack.c.bf16 %v3479_v55, %v3471_v32  ;;  %v2443_v13 = vpack.c.bf16 %v3508_v29, %v3500_v22  ;;  %v2446_v32 = vpack.c.bf16 %v3504_v28, %v3496_v21 }
 0x3b6   : > { %v863_v58 = vpack.c.bf16 %v861_v2, %v859_v44  ;;  %v862_v0 = vpack.c.bf16 %v860_v57, %v858_v46  ;;  %v2449_v55 = vpack.c.bf16 %v3549_v38, %v3538_v18  ;;  %v2452_v22 = vpack.c.bf16 %v3545_v27, %v3534_v17  ;;  %v3767_v27 = vld [vmem:[#allocation5 + $0x24] ss:$8 sps:$4 sm:$0xff]  }
 0x3b7   : > { %v4588_v21 = vmov 0  ;;  %v2455_v28 = vpack.c.bf16 %v3577_v23, %v3569_v43  ;;  %v4590_v29 = vmov 0  ;;  %v2458_v17 = vpack.c.bf16 %v3615_v19, %v3604_v9 }
 0x3b8   : > { %905 = vmatprep.subr.bf16.mxu1 %v863_v58  ;;  %v4591_v29 = vsel %vm3743_vm3, 4294967295, %v4590_v29  ;;  %v2461_v18 = vpack.c.bf16 %v3611_v14, %v3592_v62 }
 0x3b9   : > { %906 = vmatpush1.bf16.msra.mxu1 %v862_v0 }
 0x3ba   : > { %2423 = vmatprep.subr.msk.bf16.mxu1 %vm3629_vm14, %v3392_v7 }
 0x3bc   : > { %922 = vmatmul.mubr.bf16.vlgmr.msra.gmra.mrb[0].mxu1 %v2836_v59 }
 0x3bd   : > { %2426 = vmatpush1.bf16.msk.msra.mxu1 %vm3639_vm12, %v3394_v8  ;;  %2420 = vmatprep.mubr.msk.bf16.mxu1 %vm4517_vm6, %v2837_v1 }
 0x3be   : > { %944 = vmatprep.subr.bf16.mxu1 %v3413_v34 }
 0x3c1   : > { %2429 = vmatpush1.bf16.msk.msra.mxu1 %vm3651_vm7, %v3415_v37 }
 0x3c2   : > { %2432 = vmatprep.subr.msk.bf16.mxu1 %vm3658_vm1, %v2431_v26 }
 0x3c4   : > { %932 = vmatmul.mubr.bf16.gmra.mrb[4].mxu1 %v2839_v10 }
 0x3c5   : > { %2435 = vmatpush1.bf16.msk.msra.mxu1 %vm3672_vm8, %v2434_v41  ;;  %2463 = vmatprep.mubr.msk.bf16.mxu1 %vm4517_vm6, %v3350_v47  ;;  %vm3706_vm6 = vmpackc.low %vm3418_vm13, %vm3418_vm13  ;;  %vm4587_vm13 = vcmp.lt.s32.totalorder %v3358_v50, 240 }
 0x3c6   : > { %2438 = vmatprep.subr.msk.bf16.mxu1 %vm3629_vm14, %v2437_v4  ;;  %vm3730_vm9 = vmpackc.low %vm4587_vm13, %vm4587_vm13  ;;  %vm4592_vm13 = vcmask 130048  }
 0x3c7   : > { %v4589_v21 = vsel %vm3730_vm9, 4294967295, %v4588_v21  ;;  %vm4593_vm4 = vmmov %vm4592_vm13 }
 0x3c9   : > { %2441 = vmatpush1.bf16.msk.msra.mxu1 %vm3689_vm0, %v2440_v53 }
 0x3ca   : > { %950 = vmatprep.subr.bf16.mxu1 %v3302_v35 }
 0x3cd   : > { %951 = vmatpush1.bf16.msra.mxu1 %v3304_v36 }
 0x3ce   : > { %2444 = vmatprep.subr.msk.bf16.mxu1 %vm3658_vm1, %v2443_v13 }
 0x3d1   : > { %2447 = vmatpush1.bf16.msk.msra.mxu1 %vm3706_vm6, %v2446_v32 }
 0x3d2   : > { %2450 = vmatprep.subr.msk.bf16.mxu1 %vm3715_vm5, %v2449_v55 }
 0x3d5   : > { %2453 = vmatpush1.bf16.msk.msra.mxu1 %vm3689_vm0, %v2452_v22 }
 0x3d6   : > { %2456 = vmatprep.subr.msk.bf16.mxu1 %vm3730_vm9, %v2455_v28 }
 0x3d9   : > { %957 = vmatpush1.bf16.msra.mxu1 %v3585_v24 }
 0x3da   : > { %2459 = vmatprep.subr.msk.bf16.mxu1 %vm3743_vm3, %v2458_v17 }
 0x3dd   : > { %2462 = vmatpush1.bf16.msk.msra.mxu1 %vm3706_vm6, %v2461_v18 }
 0x3de   : > { %2471 = vmatprep.subr.msk.bf16.mxu1 %vm3629_vm14, %v3392_v7  ;;  %v3803_v7 = vld [vmem:[#allocation5 + $0x30] ss:$8 sps:$4 sm:$0xff]  }
 0x3e0   : > { %975 = vmatmul.mubr.bf16.vlgmr.msra.gmra.mrb[0].mxu1 %v2836_v59 }
 0x3e1   : > { %2474 = vmatpush1.bf16.msk.msra.mxu1 %vm3639_vm12, %v3394_v8  ;;  %2464 = vmatprep.mubr.msk.bf16.mxu1 %vm4592_vm13, %v2837_v1  ;;  %vm4594_vm13 = vmmov %vm4593_vm4 }
 0x3e2   : > { %1021 = vmatprep.subr.bf16.mxu1 %v3413_v34 }
 0x3e5   : > { %2477 = vmatpush1.bf16.msk.msra.mxu1 %vm3651_vm7, %v3415_v37 }
 0x3e6   : > { %2480 = vmatprep.subr.msk.bf16.mxu1 %vm3658_vm1, %v2431_v26  ;;  %v3851_v26 = vld [vmem:[%s4495_s4] sm:$0xff] }
 0x3e8   : > { %985 = vmatmul.mubr.bf16.gmra.mrb[4].mxu1 %v2839_v10 }
 0x3e9   : > { %2483 = vmatpush1.bf16.msk.msra.mxu1 %vm3672_vm8, %v2434_v41  ;;  %2511 = vmatprep.mubr.msk.bf16.mxu1 %vm4593_vm4, %v3767_v27  ;;  %v2518_v41 = vld [vmem:[%s3214_s12 + $0x48] sm:$0xff] }
 0x3ea   : > { %2486 = vmatprep.subr.msk.bf16.mxu1 %vm3629_vm14, %v2437_v4  ;;  %v2520_v4 = vld [vmem:[%s3214_s12 + $0x58] sm:$0xff] }
 0x3ed   : > { %2489 = vmatpush1.bf16.msk.msra.mxu1 %vm3689_vm0, %v2440_v53 }
 0x3ee   : > { %1027 = vmatprep.subr.bf16.mxu1 %v3302_v35  ;;  %v3794_v35 = vld [vmem:[#allocation5 + $0x20] ss:$8 sps:$4 sm:$0xff]  }
 0x3f1   : > { %1028 = vmatpush1.bf16.msra.mxu1 %v3304_v36  ;;  %v3798_v36 = vld [vmem:[#allocation5 + $0x34] ss:$8 sps:$4 sm:$0xff]  }
 0x3f2   : > { %2492 = vmatprep.subr.msk.bf16.mxu1 %vm3658_vm1, %v2443_v13  ;;  %v2517_v13 = vld [vmem:[%s3214_s12 + $0x40] sm:$0xff] }
 0x3f5   : > { %2495 = vmatpush1.bf16.msk.msra.mxu1 %vm3706_vm6, %v2446_v32  ;;  %v2519_v32 = vld [vmem:[%s3214_s12 + $0x50] sm:$0xff] }
 0x3f6   : > { %2498 = vmatprep.subr.msk.bf16.mxu1 %vm3715_vm5, %v2449_v55 }
 0x3f9   : > { %2501 = vmatpush1.bf16.msk.msra.mxu1 %vm3689_vm0, %v2452_v22  ;;  %v1395_v22 = vpack.c.bf16 %v2520_v4, %v2518_v41 }
 0x3fa   : > { %2504 = vmatprep.subr.msk.bf16.mxu1 %vm3730_vm9, %v2455_v28  ;;  %v2522_v28 = vld [vmem:[%s3214_s12 + $0x68] sm:$0xff] }
 0x3fd   : > { %1034 = vmatpush1.bf16.msra.mxu1 %v3585_v24 }
 0x3fe   : > { %2507 = vmatprep.subr.msk.bf16.mxu1 %vm3743_vm3, %v2458_v17  ;;  %v2524_v17 = vld [vmem:[%s3214_s12 + $0x78] sm:$0xff] }
 0x401   : > { %2510 = vmatpush1.bf16.msk.msra.mxu1 %vm3706_vm6, %v2461_v18 }
 0x404   : > { %1052 = vmatmul.mubr.bf16.vlgmr.msra.gmra.mrb[0].mxu1 %v3794_v35 }
 0x405   : > { %2512 = vmatprep.mubr.msk.bf16.mxu1 %vm4593_vm4, %v3798_v36  ;;  %vm4603_vm4 = vcmask 261120  }
 0x406   : > { %2664 = vmatprep.mubr.msk.f32.mxu0 %vm4603_vm4, %v3851_v26 }
 0x40c   : > { %1062 = vmatmul.mubr.bf16.gmra.mrb[4].mxu1 %v3803_v7 }
 0x40d   : > { %2528 = vmatprep.mubr.msk.bf16.mxu1 %vm4594_vm13, %v3350_v47  ;;  %vm4604_vm13 = vcmask 7168  }
 0x40e   : > { %vm4605_vm3 = vmmov %vm4604_vm13 }
 0x40f   : > { %vm4606_vm4 = vmmov %vm4605_vm3 }
 0x4d7   : > { %v3808_v8 = vpop.f32.mrb[0].mxu1 }
 0x4d8   : > { %4595 = vst [vmem:[#allocation12_spill] sm:$0xff] %v3808_v8  ;;  %v3810_v34 = vpop.f32.mrb[1].mxu1  ;;  %v1092_v37 = vmul.f32 %v3808_v8, %v3808_v8 }
 0x4d9   : > { %4596 = vst [vmem:[#allocation13_spill] sm:$0xff] %v3810_v34  ;;  %v3814_v38 = vpop.f32.mrb[2].mxu1  ;;  %v1080_v43 = vadd.f32 %v3810_v34, %v3808_v8  ;;  %v1093_v23 = vmul.f32 %v3810_v34, %v3810_v34 }
 0x4da   : > { %4597 = vst [vmem:[#allocation14_spill] sm:$0xff] %v3814_v38  ;;  %v3820_v24 = vpop.f32.mrb[3].mxu1  ;;  %v1094_v62 = vmul.f32 %v3814_v38, %v3814_v38 }
 0x4db   : > { %4598 = vst [vmem:[#allocation15_spill] sm:$0xff] %v3820_v24  ;;  %1081 = vadd.xlane.f32.xlu0 %v1080_v43  ;;  %v1083_v9 = vadd.f32 %v3820_v24, %v3814_v38  ;;  %v1100_v14 = vadd.f32 %v1093_v23, %v1092_v37  ;;  %v1095_v19 = vmul.f32 %v3820_v24, %v3820_v24 }
 0x4dc   : > { %v1394_v37 = vpack.c.bf16 %v2519_v32, %v2517_v13 }
 0x4dd   : > { %1084 = vadd.xlane.f32.xlu1 %v1083_v9  ;;  %v1103_v45 = vadd.f32 %v1095_v19, %v1094_v62  ;;  %v1401_v19 = vunpack.c.h.bf16 %v1395_v22 }
 0x4df   : > { %1101 = vadd.xlane.f32.xlu0 %v1100_v14  ;;  %v3828_v20 = vpop.f32.mrb[4].mxu1  ;;  %v1399_v14 = vunpack.c.l.bf16 %v1395_v22 }
 0x4e0   : > { %4599 = vst [vmem:[#allocation16_spill] sm:$0xff] %v3828_v20  ;;  %v3830_v30 = vpop.f32.mrb[5].mxu1  ;;  %v1096_v33 = vmul.f32 %v3828_v20, %v3828_v20 }
 0x4e1   : > { %4600 = vst [vmem:[#allocation17_spill] sm:$0xff] %v3830_v30  ;;  %v3834_v39 = vpop.f32.mrb[6].mxu1  ;;  %v1086_v40 = vadd.f32 %v3830_v30, %v3828_v20  ;;  %v1097_v56 = vmul.f32 %v3830_v30, %v3830_v30 }
 0x4e2   : > { %4601 = vst [vmem:[#allocation18_spill] sm:$0xff] %v3834_v39  ;;  %v3840_v57 = vpop.f32.mrb[7].mxu1  ;;  %v1098_v2 = vmul.f32 %v3834_v39, %v3834_v39 }
 0x4e3   : > { %4602 = vst [vmem:[#allocation19_spill] sm:$0xff] %v3840_v57  ;;  %1104 = vadd.xlane.f32.xlu0 %v1103_v45  ;;  %v1089_v44 = vadd.f32 %v3840_v57, %v3834_v39  ;;  %v1099_v46 = vmul.f32 %v3840_v57, %v3840_v57  ;;  %v1106_v59 = vadd.f32 %v1097_v56, %v1096_v33  ;;  %v2521_v33 = vld [vmem:[%s3214_s12 + $0x60] sm:$0xff] }
 0x4e4   : > { %v1397_v45 = vpack.c.bf16 %v2524_v17, %v2522_v28  ;;  %v1409_v57 = vsub.f32 %v2520_v4, %v1401_v19 }
 0x4e5   : > { %1090 = vadd.xlane.f32.xlu1 %v1089_v44  ;;  %v1109_v1 = vadd.f32 %v1099_v46, %v1098_v2  ;;  %v1398_v2 = vunpack.c.l.bf16 %v1394_v37  ;;  %v1400_v44 = vunpack.c.h.bf16 %v1394_v37 }
 0x4e6   : > { %v1403_v39 = vunpack.c.l.bf16 %v1397_v45 }
 0x4e7   : > { %1087 = vadd.xlane.f32.xlu0 %v1086_v40  ;;  %v2523_v40 = vld [vmem:[%s3214_s12 + $0x70] sm:$0xff] }
 0x4e8   : > { %v1396_v46 = vpack.c.bf16 %v2523_v40, %v2521_v33  ;;  %v1411_v34 = vsub.f32 %v2522_v28, %v1403_v39 }
 0x4e9   : > { %1110 = vadd.xlane.f32.xlu1 %v1109_v1  ;;  %v1407_v1 = vsub.f32 %v2518_v41, %v1399_v14  ;;  %v3870_v41 = vld [vmem:[%s4495_s4 + $0x8] sm:$0xff] }
 0x4ea   : > { %v1402_v24 = vunpack.c.l.bf16 %v1396_v46  ;;  %v1404_v38 = vunpack.c.h.bf16 %v1396_v46  ;;  %4607 = vst [vmem:[#allocation20_spill] sm:$0xff] %v3870_v41 }
 0x4eb   : > { %1107 = vadd.xlane.f32.xlu0 %v1106_v59  ;;  %v1415_v20 = vpack.c.bf16 %v1409_v57, %v1407_v1 }
 0x568   : > { %v1082_v10 = vpop.xlane.xlu0 %1081 }
 0x56a   : > { %v1085_v55 = vpop.xlane.xlu1 %1084 }
 0x56c   : > { %v1102_v53 = vpop.xlane.xlu0 %1101 }
 0x56d   : > { %v1112_v43 = vsel %vm4604_vm13, %v1082_v10, %v1102_v53  ;;  %v1405_v10 = vunpack.c.h.bf16 %v1397_v45  ;;  %vm4609_vm13 = vcmask 261120  }
 0x56f   : > { %v1413_v8 = vsub.f32 %v2524_v17, %v1405_v10 }
 0x570   : > { %v1105_v18 = vpop.xlane.xlu0 %1104 }
 0x571   : > { %v1113_v23 = vsel %vm4605_vm3, %v1085_v55, %v1105_v18  ;;  %v1406_v55 = vsub.f32 %v2517_v13, %v1398_v2  ;;  %v1408_v18 = vsub.f32 %v2519_v32, %v1400_v44  ;;  %v1410_v13 = vsub.f32 %v2521_v33, %v1402_v24 }
 0x572   : > { %v2684_v62 = vpack.c.bf16 %v1113_v23, %v1112_v43  ;;  %v1091_v9 = vpop.xlane.xlu1 %1090  ;;  %v1412_v32 = vsub.f32 %v2523_v40, %v1404_v38  ;;  %v4613_v24 = vmov 0  }
 0x573   : > { %v1414_v4 = vpack.c.bf16 %v1408_v18, %v1406_v55 }
 0x574   : > { %2685 = vmatprep.subr.bf16.mxu0 %v2684_v62  ;;  %v1088_v56 = vpop.xlane.xlu0 %1087  ;;  %v1416_v38 = vpack.c.bf16 %v1412_v32, %v1410_v13  ;;  %v4619_v13 = vmov 1  }
 0x575   : > { %2687 = vmatpush3.bf16.msra.mxu0 %v2684_v62  ;;  %v3875_v62 = vld [vmem:[%s4495_s4 + $0x10] sm:$0xff] }
 0x576   : > { %v1111_v59 = vpop.xlane.xlu1 %1110  ;;  %4608 = vst [vmem:[#allocation21_spill] sm:$0xff] %v3875_v62 }
 0x577   : > { %v1115_v43 = vsel %vm4605_vm3, %v1091_v9, %v1111_v59  ;;  %v1417_v9 = vpack.c.bf16 %v1413_v8, %v1411_v34  ;;  %vm4610_vm3 = vmmov %vm4609_vm13  ;;  %v2870_v8 = vld [vmem:[%s4492_s1] sm:$0xff]   ;;  %v2871_v34 = vld [vmem:[%s4492_s1 + $0x8] sm:$0xff]  }
 0x578   : > { %v1108_v53 = vpop.xlane.xlu0 %1107 }
 0x579   : > { %v1114_v23 = vsel %vm4606_vm4, %v1088_v56, %v1108_v53  ;;  %vm4612_vm4 = vmmov %vm4610_vm3 }
 0x57a   : > { %v2688_v30 = vpack.c.bf16 %v1115_v43, %v1114_v23 }
 0x57c   : > { %2689 = vmatprep.subr.bf16.mxu0 %v2688_v30 }
 0x57d   : > { %2691 = vmatpush3.bf16.msra.mxu0 %v2688_v30  ;;  %v3884_v30 = vld [vmem:[%s4495_s4 + $0x18] sm:$0xff] }
 0x57e   : > { %1418 = vmatprep.subr.bf16.mxu0 %v1415_v20  ;;  %4611 = vst [vmem:[#allocation22_spill] sm:$0xff] %v3884_v30 }
 0x580   : > { %2665 = vmatmul.mubr.msk.f32.vlgmr.msra.gmra.mrb[4].mxu0 %vm4609_vm13, %v3870_v41  ;;  %vm4614_vm13 = vmmov %vm4610_vm3 }
 0x581   : > { %1419 = vmatpush1.bf16.msra.mxu0 %v1414_v4  ;;  %2667 = vmatprep.mubr.msk.f32.mxu0 %vm4610_vm3, %v3875_v62 }
 0x582   : > { %1420 = vmatprep.subr.bf16.mxu0 %v1417_v9 }
 0x584   : > { %2668 = vmatmul.mubr.msk.f32.gmra.mrb[6].mxu0 %vm4612_vm4, %v3884_v30  ;;  %vm4615_vm4 = vmmov %vm4610_vm3 }
 0x585   : > { %1421 = vmatpush1.bf16.msra.mxu0 %v1416_v38  ;;  %1450 = vmatprep.mubr.bf16.mxu0 %v4613_v24 }
 0x586   : > { %1461 = vmatprep.subr.bf16.mxu0 %v1395_v22 }
 0x588   : > { %2525 = vmatmul.mubr.msk.bf16.vlgmr.msra.gmra.mrb[8].mxu0 %vm4614_vm13, %v2870_v8  ;;  %vm4616_vm13 = vcmask 130048  }
 0x589   : > { %1462 = vmatpush1.bf16.msra.mxu0 %v1394_v37  ;;  %1493 = vmatprep.mubr.bf16.mxu0 %v4613_v24 }
 0x58a   : > { %1463 = vmatprep.subr.bf16.mxu0 %v1397_v45 }
 0x58d   : > { %1464 = vmatpush1.bf16.msra.mxu0 %v1396_v46 }
 0x58e   : > { %1504 = vmatprep.subr.bf16.mxu0 %v1395_v22 }
 0x594   : > { %2526 = vmatmul.mubr.msk.bf16.vlgmr.msra.gmra.mrb[8].mxu0 %vm4610_vm3, %v2870_v8  ;;  %vm4617_vm3 = vcmask 7168  }
 0x595   : > { %1505 = vmatpush1.bf16.msra.mxu0 %v1394_v37  ;;  %1536 = vmatprep.mubr.bf16.mxu0 %v4613_v24 }
 0x596   : > { %1506 = vmatprep.subr.bf16.mxu0 %v1397_v45 }
 0x599   : > { %1507 = vmatpush1.bf16.msra.mxu0 %v1396_v46 }
 0x5a0   : > { %2527 = vmatmul.mubr.msk.bf16.vlgmr.msra.gmra.mrb[8].mxu0 %vm4615_vm4, %v2871_v34  ;;  %vm4618_vm4 = vmmov %vm4617_vm3 }
 0x5a1   : > { %2572 = vmatprep.mubr.msk.bf16.mxu0 %vm4616_vm13, %v3350_v47 }
 0x653   : > { %v3902_v20 = vpop.f32.mrb[4].mxu0 }
 0x654   : > { %v3904_v39 = vpop.f32.mrb[5].mxu0 }
 0x657   : > { %v3906_v57 = vpop.f32.mrb[6].mxu0 }
 0x658   : > { %v3908_v22 = vpop.f32.mrb[7].mxu0 }
 0x673   : > { %v1538_v28 = vpop.f32.mrb[8].mxu0 }
 0x674   : > { %v1540_v17 = vpop.f32.mrb[9].mxu0  ;;  %v1557_v37 = vmul.f32 %v1538_v28, %v1538_v28 }
 0x675   : > { %v1542_v14 = vpop.f32.mrb[10].mxu0  ;;  %v1551_v19 = vadd.f32 %v1540_v17, %v1538_v28  ;;  %v1558_v45 = vmul.f32 %v1540_v17, %v1540_v17 }
 0x676   : > { %v1544_v33 = vpop.f32.mrb[11].mxu0  ;;  %v1559_v40 = vmul.f32 %v1542_v14, %v1542_v14 }
 0x677   : > { %1552 = vadd.xlane.f32.xlu0 %v1551_v19  ;;  %v1554_v56 = vadd.f32 %v1544_v33, %v1542_v14  ;;  %v1561_v2 = vadd.f32 %v1558_v45, %v1557_v37  ;;  %v1560_v47 = vmul.f32 %v1544_v33, %v1544_v33 }
 0x679   : > { %1555 = vadd.xlane.f32.xlu1 %v1554_v56  ;;  %v1564_v44 = vadd.f32 %v1560_v47, %v1559_v40 }
 0x67b   : > { %1562 = vadd.xlane.f32.xlu0 %v1561_v2 }
 0x67d   : > { %1565 = vadd.xlane.f32.xlu1 %v1564_v44 }
 0x704   : > { %v1553_v46 = vpop.xlane.xlu0 %1552 }
 0x706   : > { %v1556_v59 = vpop.xlane.xlu1 %1555 }
 0x708   : > { %v1563_v1 = vpop.xlane.xlu0 %1562 }
 0x709   : > { %v1567_v10 = vsel %vm4617_vm3, %v1553_v46, %v1563_v1 }
 0x70a   : > { %v1569_v53 = vmul.f32 0.00390625, %v1567_v10  ;;  %v1566_v55 = vpop.xlane.xlu1 %1565 }
 0x70b   : > { %v1568_v18 = vsel %vm4618_vm4, %v1556_v59, %v1566_v55 }
 0x70c   : > { %v1570_v43 = vmul.f32 0.00390625, %v1568_v18  ;;  %v1571_v23 = vmul.f32 %v1569_v53, %v1569_v53 }
 0x70e   : > { %1575 = vrot.lane.b32.xlu0 %v1571_v23, %s3028_s7  ;;  %v1572_v4 = vmul.f32 %v1570_v43, %v1570_v43 }
 0x710   : > { %1577 = vrot.lane.b32.xlu1 %v1572_v4, %s3028_s7 }
 0x714   : > { %1589 = vperm.xlu1 %2824, %v1569_v53  }
 0x718   : > { %1594 = vperm.xlu1 %2824, %v1570_v43  }
 0x71c   : > { %2825 = vset.pattern.permute.xlu1 %v4619_v13 }
 0x780   : > { %v1576_v32 = vpop.permute.xlu0 %1575 }
 0x781   : > { %v1581_v9 = vsub.f32 %v1569_v53, %v1576_v32 }
 0x782   : > { %v1578_v38 = vpop.permute.xlu1 %1577 }
 0x783   : > { %v1583_v8 = vadd.f32 1e-05, %v1581_v9  ;;  %v1582_v34 = vsub.f32 %v1570_v43, %v1578_v38  ;;  %v4620_v9 = vld [vmem:[#allocation11_spill] sm:$0xff] }
 0x785   : > { %2850 = vrsqrt.f32 %v1583_v8  ;;  %v1584_v37 = vadd.f32 1e-05, %v1582_v34 }
 0x787   : > { %2852 = vrsqrt.f32 %v1584_v37 }
 0x78f   : > { %v2851_v19 = vpop.eup %2850 }
 0x790   : > { %v1601_v45 = vmul.f32 %v2851_v19, %v3280_v3 }
 0x791   : > { %v2853_v40 = vpop.eup %2852 }
 0x792   : > { %1605 = vperm.xlu0 %2823, %v1601_v45   ;;  %v1602_v56 = vmul.f32 %v2853_v40, %v3283_v6 }
 0x793   : > { %v1590_v2 = vpop.permute.xlu1 %1589 }
 0x794   : > { %1610 = vperm.xlu1 %2825, %v1602_v56   ;;  %v1597_v44 = vsub.f32 %v1538_v28, %v1590_v2  ;;  %v1598_v46 = vsub.f32 %v1540_v17, %v1590_v2 }
 0x796   : > { %2826 = vset.pattern.permute.xlu0 %v4613_v24 }
 0x797   : > { %v1595_v47 = vpop.permute.xlu1 %1594 }
 0x798   : > { %2827 = vset.pattern.permute.xlu1 %v4613_v24  ;;  %v1599_v1 = vsub.f32 %v1542_v14, %v1595_v47  ;;  %v1600_v10 = vsub.f32 %v1544_v33, %v1595_v47 }
 0x811   : > { %v1606_v59 = vpop.permute.xlu0 %1605 }
 0x812   : > { %v1613_v53 = vmul.f32 %v1606_v59, %v1597_v44  ;;  %v1614_v55 = vmul.f32 %v1606_v59, %v1598_v46 }
 0x813   : > { %v1611_v18 = vpop.permute.xlu1 %1610 }
 0x814   : > { %v1617_v3 = vadd.f32 %v1613_v53, %v3289_v16  ;;  %v1618_v43 = vadd.f32 %v1614_v55, %v3289_v16  ;;  %v1615_v6 = vmul.f32 %v1611_v18, %v1599_v1  ;;  %v1616_v23 = vmul.f32 %v1611_v18, %v1600_v10 }
 0x816   : > { %vm1621_vm13 = vcmp.gt.f32.partialorder %v1617_v3, 0.0  ;;  %v1625_v4 = vmul.f32 0.1, %v1617_v3  ;;  %v1626_v32 = vmul.f32 0.1, %v1618_v43  ;;  %v1619_v38 = vadd.f32 %v1615_v6, %v4620_v9 }
 0x817   : > { %v1620_v28 = vadd.f32 %v1616_v23, %v4620_v9  ;;  %vm1622_vm3 = vcmp.gt.f32.partialorder %v1618_v43, 0.0 }
 0x818   : > { %v1629_v17 = vsel %vm1621_vm13, %v1617_v3, %v1625_v4  ;;  %vm1623_vm4 = vcmp.gt.f32.partialorder %v1619_v38, 0.0  ;;  %v1627_v14 = vmul.f32 0.1, %v1619_v38  ;;  %v1630_v8 = vsel %vm1622_vm3, %v1618_v43, %v1626_v32 }
 0x819   : > { %vm1624_vm9 = vcmp.gt.f32.partialorder %v1620_v28, 0.0  ;;  %v1628_v33 = vmul.f32 0.1, %v1620_v28  ;;  %1633 = vrot.lane.b32.xlu0 %v1629_v17, %s3030_s28 }
 0x81a   : > { %v1631_v34 = vsel %vm1623_vm4, %v1619_v38, %v1627_v14 }
 0x81b   : > { %v1632_v16 = vsel %vm1624_vm9, %v1620_v28, %v1628_v33  ;;  %1635 = vrot.lane.b32.xlu1 %v1631_v34, %s3030_s28  ;;  %v3927_v19 = vpack.c.bf16 %v1631_v34, %v1629_v17  ;;  %vm4621_vm9 = vcmp.lt.s32.totalorder %v3355_v49, 17 }
 0x81c   : > { %v3925_v37 = vpack.c.bf16 %v1632_v16, %v1630_v8  ;;  %vm4622_vm13 = vmmov %vm4621_vm9 }
 0x81d   : > { %1637 = vrot.lane.b32.xlu0 %v1630_v8, %s3030_s28  ;;  %v1747_v56 = vunpack.c.l.bf16 %v3927_v19  ;;  %v1749_v2 = vunpack.c.h.bf16 %v3927_v19  ;;  %vm4623_vm3 = vmmov %vm4621_vm9 }
 0x81e   : > { %v1748_v45 = vunpack.c.l.bf16 %v3925_v37  ;;  %v1750_v40 = vunpack.c.h.bf16 %v3925_v37  ;;  %vm4624_vm4 = vmmov %vm4623_vm3 }
 0x81f   : > { %1639 = vrot.lane.b32.xlu1 %v1632_v16, %s3030_s28  ;;  %v3939_v46 = vsub.f32 %v1629_v17, %v1747_v56  ;;  %v3941_v59 = vsub.f32 %v1631_v34, %v1749_v2  ;;  %s2299_s28 = scalar_lea.sflag [#allocation4], %s3208_s23 }
 0x820   : > { %v3935_v47 = vsub.f32 %v1630_v8, %v1748_v45  ;;  %v3937_v44 = vsub.f32 %v1632_v16, %v1750_v40 }
 0x821   : > { %1661 = vrot.lane.b32.xlu0 %v1629_v17, %s3031_s16 }
 0x823   : > { %1663 = vrot.lane.b32.xlu1 %v1631_v34, %s3031_s16 }
 0x825   : > { %1665 = vrot.lane.b32.xlu0 %v1630_v8, %s3031_s16 }
 0x827   : > { %1667 = vrot.lane.b32.xlu1 %v1632_v16, %s3031_s16 }
 0x829   : > { %1689 = vrot.lane.b32.xlu0 %v1629_v17, %s3032_s17 }
 0x82b   : > { %1691 = vrot.lane.b32.xlu1 %v1631_v34, %s3032_s17 }
 0x82d   : > { %1693 = vrot.lane.b32.xlu0 %v1630_v8, %s3032_s17 }
 0x82f   : > { %1695 = vrot.lane.b32.xlu1 %v1632_v16, %s3032_s17 }
 0x831   : > { %1717 = vrot.lane.b32.xlu0 %v1629_v17, %s3028_s7 }
 0x833   : > { %1719 = vrot.lane.b32.xlu1 %v1631_v34, %s3028_s7 }
 0x835   : > { %1721 = vrot.lane.b32.xlu0 %v1630_v8, %s3028_s7 }
 0x837   : > { %1723 = vrot.lane.b32.xlu1 %v1632_v16, %s3028_s7 }
 0x839   : > { %1757 = vrot.lane.b32.xlu0 %v1629_v17, %s3033_s11 }
 0x83b   : > { %1759 = vrot.lane.b32.xlu1 %v1631_v34, %s3033_s11 }
 0x83d   : > { %1761 = vrot.lane.b32.xlu0 %v1630_v8, %s3033_s11 }
 0x83f   : > { %1763 = vrot.lane.b32.xlu1 %v1632_v16, %s3033_s11  ;;  %s3037_s11 = smov [#allocation7]  }
 0x841   : > { %1785 = vrot.lane.b32.xlu0 %v1629_v17, %s3034_s24 }
 0x843   : > { %1787 = vrot.lane.b32.xlu1 %v1631_v34, %s3034_s24 }
 0x845   : > { %1789 = vrot.lane.b32.xlu0 %v1630_v8, %s3034_s24 }
 0x847   : > { %1791 = vrot.lane.b32.xlu1 %v1632_v16, %s3034_s24  ;;  %s2953_s24 = sshll.u32 %s3037_s11, 4  ;;  %s2954_s24 = int_to_ptr.vmem [resolvable:$false] %s2953_s24 }
 0x849   : > { %1813 = vrot.lane.b32.xlu0 %v1629_v17, %s3035_s26 }
 0x84b   : > { %1815 = vrot.lane.b32.xlu1 %v1631_v34, %s3035_s26 }
 0x84d   : > { %1817 = vrot.lane.b32.xlu0 %v1630_v8, %s3035_s26 }
 0x84f   : > { %1819 = vrot.lane.b32.xlu1 %v1632_v16, %s3035_s26 }
 0x851   : > { %1841 = vrot.lane.b32.xlu0 %v1629_v17, %s3036_s14 }
 0x853   : > { %1843 = vrot.lane.b32.xlu1 %v1631_v34, %s3036_s14 }
 0x855   : > { %1845 = vrot.lane.b32.xlu0 %v1630_v8, %s3036_s14 }
 0x857   : > { %1847 = vrot.lane.b32.xlu1 %v1632_v16, %s3036_s14 }
 0x88b   : > { %v1634_v53 = vpop.permute.xlu0 %1633 }
 0x88d   : > { %v1636_v55 = vpop.permute.xlu1 %1635 }
 0x88f   : > { %v1638_v18 = vpop.permute.xlu0 %1637 }
 0x890   : > { %v1641_v3 = vsel %vm4621_vm9, %v1634_v53, %v1638_v18  ;;  %v1643_v43 = vsel %vm4622_vm13, %v1638_v18, %v1634_v53  ;;  %vm4627_vm13 = vcmp.ge.s32.totalorder %v3355_v49, 16 }
 0x891   : > { %v1640_v6 = vpop.permute.xlu1 %1639  ;;  %v1645_v23 = vsel %vm3380_vm11, %v1643_v43, 0.0  ;;  %v1646_v4 = vsel %vm3372_vm10, %v1641_v3, 0.0 }
 0x892   : > { %v1642_v32 = vsel %vm4623_vm3, %v1636_v55, %v1640_v6  ;;  %v1644_v9 = vsel %vm4624_vm4, %v1640_v6, %v1636_v55 }
 0x893   : > { %v1662_v38 = vpop.permute.xlu0 %1661  ;;  %v1647_v28 = vsel %vm3380_vm11, %v1644_v9, 0.0  ;;  %v1648_v17 = vsel %vm3372_vm10, %v1642_v32, 0.0  ;;  %v3991_v14 = vpack.c.bf16 %v1642_v32, %v1641_v3  ;;  %v3993_v33 = vpack.c.bf16 %v1644_v9, %v1643_v43 }
 0x894   : > { %v1649_v8 = vpack.c.bf16 %v1647_v28, %v1645_v23  ;;  %v1650_v34 = vpack.c.bf16 %v1648_v17, %v1646_v4  ;;  %vm4625_vm11 = vcmp.lt.s32.totalorder %v3355_v49, 16 }
 0x895   : > { %2532 = vmatprep.subr.msk.bf16.mxu0 %vm3629_vm14, %v3991_v14  ;;  %v1664_v16 = vpop.permute.xlu1 %1663  ;;  %vm4626_vm9 = vmmov %vm4625_vm11 }
 0x896   : > { %v1651_v45 = vunpack.c.l.bf16 %v1649_v8  ;;  %v1652_v40 = vunpack.c.l.bf16 %v1650_v34  ;;  %v1653_v56 = vunpack.c.h.bf16 %v1649_v8  ;;  %v1654_v2 = vunpack.c.h.bf16 %v1650_v34  ;;  %2535 = vmatpush1.bf16.msk.msra.mxu0 %vm3639_vm12, %v3993_v33  ;;  %vm4628_vm3 = vmmov %vm4626_vm9 }
 0x897   : > { %v1666_v61 = vpop.permute.xlu0 %1665  ;;  %vm4629_vm4 = vmmov %vm4628_vm3 }
 0x898   : > { %v1671_v53 = vsel %vm4625_vm11, %v1666_v61, %v1662_v38  ;;  %v1655_v55 = vsub.f32 %v1645_v23, %v1651_v45  ;;  %v1657_v18 = vsub.f32 %v1647_v28, %v1653_v56  ;;  %v1658_v3 = vsub.f32 %v1648_v17, %v1654_v2  ;;  %vm4630_vm11 = vmmov %vm4627_vm13 }
 0x899   : > { %v1669_v43 = vsel %vm4626_vm9, %v1662_v38, %v1666_v61  ;;  %v1668_v6 = vpop.permute.xlu1 %1667  ;;  %v1656_v32 = vsub.f32 %v1646_v4, %v1652_v40  ;;  %v1673_v8 = vsel %vm4627_vm13, %v1671_v53, 0.0  ;;  %vm4631_vm9 = vcmp.lt.s32.totalorder %v3355_v49, 15 }
 0x89a   : > { %v1659_v9 = vpack.c.bf16 %v1657_v18, %v1655_v55  ;;  %v1670_v34 = vsel %vm4628_vm3, %v1664_v16, %v1668_v6  ;;  %v1672_v10 = vsel %vm4629_vm4, %v1668_v6, %v1664_v16  ;;  %vm4632_vm13 = vmmov %vm4631_vm9 }
 0x89b   : > { %v1690_v1 = vpop.permute.xlu0 %1689  ;;  %v1675_v23 = vsel %vm4630_vm11, %v1672_v10, 0.0  ;;  %v4013_v28 = vpack.c.bf16 %v1670_v34, %v1669_v43  ;;  %v4015_v17 = vpack.c.bf16 %v1672_v10, %v1671_v53  ;;  %v1660_v38 = vpack.c.bf16 %v1658_v3, %v1656_v32  ;;  %vm4633_vm3 = vmmov %vm4631_vm9 }
 0x89c   : > { %v1677_v4 = vpack.c.bf16 %v1675_v23, %v1673_v8  ;;  %vm4634_vm4 = vmmov %vm4633_vm3 }
 0x89d   : > { %v1682_v45 = vunpack.c.h.bf16 %v4013_v28  ;;  %1869 = vmatprep.subr.bf16.mxu1 %v1660_v38  ;;  %1924 = vmatprep.subr.bf16.mxu0 %v4013_v28  ;;  %v1692_v40 = vpop.permute.xlu1 %1691  ;;  %v1680_v56 = vunpack.c.l.bf16 %v4013_v28 }
 0x89e   : > { %v1679_v2 = vunpack.c.l.bf16 %v1677_v4  ;;  %v1681_v16 = vunpack.c.h.bf16 %v1677_v4  ;;  %1870 = vmatpush1.bf16.msra.mxu1 %v1659_v9  ;;  %2538 = vmatpush1.bf16.msk.msra.mxu0 %vm3651_vm7, %v4015_v17 }
 0x89f   : > { %v1694_v61 = vpop.permute.xlu0 %1693  ;;  %v1686_v10 = vsub.f32 %v1670_v34, %v1682_v45  ;;  %v1684_v18 = vsub.f32 %v1669_v43, %v1680_v56 }
 0x8a0   : > { %v1697_v53 = vsel %vm4631_vm9, %v1690_v1, %v1694_v61  ;;  %v1699_v55 = vsel %vm4632_vm13, %v1694_v61, %v1690_v1  ;;  %v1683_v3 = vsub.f32 %v1673_v8, %v1679_v2  ;;  %v1685_v6 = vsub.f32 %v1675_v23, %v1681_v16 }
 0x8a1   : > { %v1701_v32 = vsel %vm3432_vm2, %v1699_v55, 0.0  ;;  %v1696_v38 = vpop.permute.xlu1 %1695  ;;  %v1688_v9 = vpack.c.bf16 %v1686_v10, %v1684_v18  ;;  %v1702_v24 = vsel %vm3424_vm15, %v1697_v53, 0.0  ;;  %vm4637_vm9 = vnez %v4556_v54 }
 0x8a2   : > { %v1687_v4 = vpack.c.bf16 %v1685_v6, %v1683_v3  ;;  %v1698_v34 = vsel %vm4633_vm3, %v1692_v40, %v1696_v38  ;;  %v1700_v45 = vsel %vm4634_vm4, %v1696_v38, %v1692_v40 }
 0x8a3   : > { %v1718_v13 = vpop.permute.xlu0 %1717  ;;  %v1703_v1 = vsel %vm3432_vm2, %v1700_v45, 0.0  ;;  %v1704_v43 = vsel %vm3424_vm15, %v1698_v34, 0.0  ;;  %v4039_v8 = vpack.c.bf16 %v1698_v34, %v1697_v53  ;;  %v4041_v23 = vpack.c.bf16 %v1700_v45, %v1699_v55  ;;  %1871 = vmatprep.subr.bf16.mxu1 %v1688_v9 }
 0x8a4   : > { %v1705_v56 = vpack.c.bf16 %v1703_v1, %v1701_v32  ;;  %v1706_v2 = vpack.c.bf16 %v1704_v43, %v1702_v24  ;;  %1872 = vmatpush1.bf16.msra.mxu1 %v1687_v4  ;;  %vm4635_vm2 = vcmp.lt.s32.totalorder %v3355_v49, 1 }
 0x8a5   : > { %2541 = vmatprep.subr.msk.bf16.mxu0 %vm3658_vm1, %v4039_v8  ;;  %v1720_v40 = vpop.permute.xlu1 %1719  ;;  %vm4636_vm11 = vmmov %vm4635_vm2 }
 0x8a6   : > { %v1707_v16 = vunpack.c.l.bf16 %v1705_v56  ;;  %v1708_v61 = vunpack.c.l.bf16 %v1706_v2  ;;  %v1709_v51 = vunpack.c.h.bf16 %v1705_v56  ;;  %v1710_v10 = vunpack.c.h.bf16 %v1706_v2  ;;  %2544 = vmatpush1.bf16.msk.msra.mxu0 %vm3672_vm8, %v4041_v23  ;;  %vm4638_vm13 = vmmov %vm4635_vm2 }
 0x8a7   : > { %v1722_v53 = vpop.permute.xlu0 %1721  ;;  %vm4639_vm3 = vmmov %vm4635_vm2 }
 0x8a8   : > { %v1725_v55 = vsel %vm4635_vm2, %v1718_v13, %v1722_v53  ;;  %v1727_v18 = vsel %vm4636_vm11, %v1722_v53, %v1718_v13  ;;  %v1711_v3 = vsub.f32 %v1701_v32, %v1707_v16  ;;  %v1713_v6 = vsub.f32 %v1703_v1, %v1709_v51 }
 0x8a9   : > { %v1714_v38 = vsub.f32 %v1704_v43, %v1710_v10  ;;  %v1729_v9 = vsel %vm4637_vm9, %v1727_v18, 0.0  ;;  %v1724_v4 = vpop.permute.xlu1 %1723  ;;  %v1712_v34 = vsub.f32 %v1702_v24, %v1708_v61  ;;  %v1730_v56 = vsel %vm3372_vm10, %v1725_v55, 0.0 }
 0x8aa   : > { %v1715_v45 = vpack.c.bf16 %v1713_v6, %v1711_v3  ;;  %v1726_v2 = vsel %vm4638_vm13, %v1720_v40, %v1724_v4  ;;  %v1728_v30 = vsel %vm4639_vm3, %v1724_v4, %v1720_v40  ;;  %vm4642_vm2 = vnez %v4562_v52 }
 0x8ab   : > { %v1758_v62 = vpop.permute.xlu0 %1757  ;;  %v1731_v13 = vsel %vm4637_vm9, %v1728_v30, 0.0  ;;  %v1732_v32 = vsel %vm3372_vm10, %v1726_v2, 0.0  ;;  %v4065_v1 = vpack.c.bf16 %v1726_v2, %v1725_v55  ;;  %v4067_v24 = vpack.c.bf16 %v1728_v30, %v1727_v18 }
 0x8ac   : > { %v1733_v43 = vpack.c.bf16 %v1731_v13, %v1729_v9  ;;  %v1734_v16 = vpack.c.bf16 %v1732_v32, %v1730_v56  ;;  %v1716_v61 = vpack.c.bf16 %v1714_v38, %v1712_v34  ;;  %vm4640_vm10 = vcmp.lt.s32.totalorder %v3355_v49, 127 }
 0x8ad   : > { %2547 = vmatprep.subr.msk.bf16.mxu0 %vm3629_vm14, %v4065_v1  ;;  %v1760_v51 = vpop.permute.xlu1 %1759  ;;  %vm4641_vm4 = vmmov %vm4640_vm10 }
 0x8ae   : > { %v1735_v40 = vunpack.c.l.bf16 %v1733_v43  ;;  %v1736_v10 = vunpack.c.l.bf16 %v1734_v16  ;;  %v1737_v53 = vunpack.c.h.bf16 %v1733_v43  ;;  %v1738_v3 = vunpack.c.h.bf16 %v1734_v16  ;;  %1873 = vmatprep.subr.bf16.mxu1 %v1716_v61  ;;  %2550 = vmatpush1.bf16.msk.msra.mxu0 %vm3689_vm0, %v4067_v24  ;;  %vm4643_vm11 = vmmov %vm4641_vm4 }
 0x8af   : > { %v1762_v60 = vpop.permute.xlu0 %1761  ;;  %1874 = vmatpush1.bf16.msra.mxu1 %v1715_v45  ;;  %1930 = vmatprep.subr.bf16.mxu0 %v3925_v37  ;;  %vm4644_vm13 = vmmov %vm4641_vm4 }
 0x8b0   : > { %v1765_v30 = vsel %vm4640_vm10, %v1758_v62, %v1762_v60  ;;  %v1767_v55 = vsel %vm4641_vm4, %v1762_v60, %v1758_v62  ;;  %v1739_v18 = vsub.f32 %v1729_v9, %v1735_v40  ;;  %v1741_v6 = vsub.f32 %v1731_v13, %v1737_v53 }
 0x8b1   : > { %v1742_v38 = vsub.f32 %v1732_v32, %v1738_v3  ;;  %v1769_v4 = vsel %vm4642_vm2, %v1765_v30, 0.0  ;;  %v1764_v34 = vpop.permute.xlu1 %1763  ;;  %v1740_v2 = vsub.f32 %v1730_v56, %v1736_v10  ;;  %v1770_v45 = vsel %vm3424_vm15, %v1767_v55, 0.0 }
 0x8b2   : > { %v1743_v43 = vpack.c.bf16 %v1741_v6, %v1739_v18  ;;  %v1766_v16 = vsel %vm4643_vm11, %v1760_v51, %v1764_v34  ;;  %v1768_v62 = vsel %vm4644_vm13, %v1764_v34, %v1760_v51  ;;  %1931 = vmatpush1.bf16.msra.mxu0 %v3927_v19  ;;  %vm4648_vm10 = vnez %v4568_v15 }
 0x8b3   : > { %v1786_v9 = vpop.permute.xlu0 %1785  ;;  %v1771_v13 = vsel %vm4642_vm2, %v1766_v16, 0.0  ;;  %v1772_v32 = vsel %vm3424_vm15, %v1768_v62, 0.0  ;;  %v4093_v56 = vpack.c.bf16 %v1768_v62, %v1767_v55  ;;  %v4095_v61 = vpack.c.bf16 %v1766_v16, %v1765_v30 }
 0x8b4   : > { %v1773_v40 = vpack.c.bf16 %v1771_v13, %v1769_v4  ;;  %v1774_v10 = vpack.c.bf16 %v1772_v32, %v1770_v45  ;;  %v1744_v53 = vpack.c.bf16 %v1742_v38, %v1740_v2  ;;  %vm4645_vm15 = vcmp.lt.s32.totalorder %v3355_v49, 113 }
 0x8b5   : > { %v1788_v3 = vpop.permute.xlu1 %1787  ;;  %2553 = vmatprep.subr.msk.bf16.mxu0 %vm3658_vm1, %v4093_v56  ;;  %vm4646_vm3 = vmmov %vm4645_vm15  ;;  %v4647_v16 = vpack.c.bf16 %v3937_v44, %v3935_v47 }
 0x8b6   : > { %v1775_v51 = vunpack.c.l.bf16 %v1773_v40  ;;  %v1776_v60 = vunpack.c.l.bf16 %v1774_v10  ;;  %v1777_v18 = vunpack.c.h.bf16 %v1773_v40  ;;  %v1778_v6 = vunpack.c.h.bf16 %v1774_v10  ;;  %1875 = vmatprep.subr.bf16.mxu1 %v1744_v53  ;;  %2556 = vmatpush1.bf16.msk.msra.mxu0 %vm3706_vm6, %v4095_v61  ;;  %vm4649_vm4 = vmmov %vm4646_vm3 }
 0x8b7   : > { %v1790_v63 = vpop.permute.xlu0 %1789  ;;  %1876 = vmatpush1.bf16.msra.mxu1 %v1743_v43  ;;  %vm4650_vm11 = vmmov %vm4646_vm3 }
 0x8b8   : > { %v1793_v30 = vsel %vm4645_vm15, %v1786_v9, %v1790_v63  ;;  %v1795_v55 = vsel %vm4646_vm3, %v1790_v63, %v1786_v9  ;;  %v1779_v38 = vsub.f32 %v1769_v4, %v1775_v51  ;;  %v1781_v34 = vsub.f32 %v1771_v13, %v1777_v18  ;;  %1877 = vmatprep.subr.bf16.mxu1 %v4647_v16 }
 0x8b9   : > { %v1782_v2 = vsub.f32 %v1772_v32, %v1778_v6  ;;  %v1797_v62 = vsel %vm4637_vm9, %v1793_v30, 0.0  ;;  %v1792_v40 = vpop.permute.xlu1 %1791  ;;  %v1780_v10 = vsub.f32 %v1770_v45, %v1776_v60  ;;  %v1798_v43 = vsel %vm4648_vm10, %v1795_v55, 0.0 }
 0x8ba   : > { %v1783_v53 = vpack.c.bf16 %v1781_v34, %v1779_v38  ;;  %v1794_v41 = vsel %vm4649_vm4, %v1788_v3, %v1792_v40  ;;  %v1796_v4 = vsel %vm4650_vm11, %v1792_v40, %v1788_v3  ;;  %v4651_v32 = vpack.c.bf16 %v3941_v59, %v3939_v46 }
 0x8bb   : > { %v1814_v9 = vpop.permute.xlu0 %1813  ;;  %v1799_v47 = vsel %vm4637_vm9, %v1794_v41, 0.0  ;;  %v1800_v44 = vsel %vm4648_vm10, %v1796_v4, 0.0  ;;  %v4122_v13 = vpack.c.bf16 %v1796_v4, %v1795_v55  ;;  %v4124_v45 = vpack.c.bf16 %v1794_v41, %v1793_v30 }
 0x8bc   : > { %1878 = vmatpush1.bf16.msra.mxu1 %v4651_v32  ;;  %v1801_v51 = vpack.c.bf16 %v1799_v47, %v1797_v62  ;;  %v1802_v60 = vpack.c.bf16 %v1800_v44, %v1798_v43  ;;  %v1784_v18 = vpack.c.bf16 %v1782_v2, %v1780_v10  ;;  %vm4652_vm9 = vcmp.lt.s32.totalorder %v3355_v49, 112 }
 0x8bd   : > { %v1816_v6 = vpop.permute.xlu1 %1815  ;;  %2559 = vmatprep.subr.msk.bf16.mxu0 %vm3715_vm5, %v4122_v13  ;;  %vm4653_vm13 = vmmov %vm4652_vm9  ;;  %vm4654_vm15 = vcmp.lt.s32.totalorder %v3358_v50, 240  ;;  %vm4658_vm11 = vnez %v4589_v21 }
 0x8be   : > { %v1803_v54 = vunpack.c.l.bf16 %v1801_v51  ;;  %v1804_v3 = vunpack.c.l.bf16 %v1802_v60  ;;  %v1805_v15 = vunpack.c.h.bf16 %v1801_v51  ;;  %v1806_v63 = vunpack.c.h.bf16 %v1802_v60  ;;  %1879 = vmatprep.subr.bf16.mxu1 %v1784_v18  ;;  %2562 = vmatpush1.bf16.msk.msra.mxu0 %vm3689_vm0, %v4124_v45  ;;  %vm4655_vm3 = vmmov %vm4652_vm9 }
 0x8bf   : > { %v1818_v41 = vpop.permute.xlu0 %1817  ;;  %vm4656_vm10 = vmmov %vm4655_vm3 }
 0x8c0   : > { %1880 = vmatpush1.bf16.msra.mxu1 %v1783_v53  ;;  %v1823_v46 = vsel %vm4652_vm9, %v1818_v41, %v1814_v9  ;;  %v1807_v59 = vsub.f32 %v1797_v62, %v1803_v54  ;;  %v1809_v30 = vsub.f32 %v1799_v47, %v1805_v15  ;;  %v1810_v55 = vsub.f32 %v1800_v44, %v1806_v63  ;;  %vm4657_vm4 = vmmov %vm4654_vm15 }
 0x8c1   : > { %v1821_v38 = vsel %vm4653_vm13, %v1814_v9, %v1818_v41  ;;  %v1820_v34 = vpop.permute.xlu1 %1819  ;;  %v1808_v2 = vsub.f32 %v1798_v43, %v1804_v3  ;;  %v1826_v40 = vsel %vm4654_vm15, %v1823_v46, 0.0  ;;  %vm4659_vm9 = vcmp.lt.s32.totalorder %v3355_v49, 111 }
 0x8c2   : > { %v1811_v16 = vpack.c.bf16 %v1809_v30, %v1807_v59  ;;  %v1822_v10 = vsel %vm4655_vm3, %v1816_v6, %v1820_v34  ;;  %v1824_v53 = vsel %vm4656_vm10, %v1820_v34, %v1816_v6  ;;  %vm4660_vm13 = vmmov %vm4659_vm9  ;;  %vm4661_vm15 = vnez %v4570_v5 }
 0x8c3   : > { %v1842_v4 = vpop.permute.xlu0 %1841  ;;  %v1828_v62 = vsel %vm4657_vm4, %v1824_v53, 0.0  ;;  %v4147_v47 = vpack.c.bf16 %v1822_v10, %v1821_v38  ;;  %v4149_v44 = vpack.c.bf16 %v1824_v53, %v1823_v46  ;;  %v1812_v9 = vpack.c.bf16 %v1810_v55, %v1808_v2  ;;  %vm4662_vm3 = vmmov %vm4659_vm9 }
 0x8c4   : > { %v1830_v43 = vpack.c.bf16 %v1828_v62, %v1826_v40  ;;  %vm4663_vm10 = vmmov %vm4662_vm3  ;;  %vm4664_vm4 = vnez %v4591_v29 }
 0x8c5   : > { %v1831_v32 = vunpack.c.l.bf16 %v4147_v47  ;;  %v1833_v51 = vunpack.c.h.bf16 %v4147_v47  ;;  %1881 = vmatprep.subr.bf16.mxu1 %v1812_v9  ;;  %v1844_v60 = vpop.permute.xlu1 %1843  ;;  %2565 = vmatprep.subr.msk.bf16.mxu0 %vm4658_vm11, %v4149_v44 }
 0x8c6   : > { %v1832_v18 = vunpack.c.l.bf16 %v1830_v43  ;;  %v1834_v6 = vunpack.c.h.bf16 %v1830_v43  ;;  %1882 = vmatpush1.bf16.msra.mxu1 %v1811_v16  ;;  %1937 = vmatpush1.bf16.msra.mxu0 %v4147_v47 }
 0x8c7   : > { %v1846_v50 = vpop.permute.xlu0 %1845  ;;  %v1835_v54 = vsub.f32 %v1821_v38, %v1831_v32  ;;  %v1837_v3 = vsub.f32 %v1822_v10, %v1833_v51 }
 0x8c8   : > { %v1849_v15 = vsel %vm4659_vm9, %v1842_v4, %v1846_v50  ;;  %v1851_v63 = vsel %vm4660_vm13, %v1846_v50, %v1842_v4  ;;  %v1838_v41 = vsub.f32 %v1828_v62, %v1834_v6  ;;  %v1836_v46 = vsub.f32 %v1826_v40, %v1832_v18  ;;  %v2872_v6 = vld [vmem:[#allocation5] ss:$8 sps:$4 sm:$0xff]  }
 0x8c9   : > { %v1853_v59 = vsel %vm4642_vm2, %v1849_v15, 0.0  ;;  %v1854_v30 = vsel %vm4661_vm15, %v1851_v63, 0.0  ;;  %v1848_v55 = vpop.permute.xlu1 %1847  ;;  %v1839_v34 = vpack.c.bf16 %v1837_v3, %v1835_v54  ;;  %v2873_v3 = vld [vmem:[#allocation5 + $0x14] ss:$8 sps:$4 sm:$0xff]  }
 0x8ca   : > { %v1850_v38 = vsel %vm4662_vm3, %v1844_v60, %v1848_v55  ;;  %v1852_v2 = vsel %vm4663_vm10, %v1848_v55, %v1844_v60  ;;  %v1840_v16 = vpack.c.bf16 %v1838_v41, %v1836_v46 }
 0x8cb   : > { %v1855_v10 = vsel %vm4642_vm2, %v1850_v38, 0.0  ;;  %v1856_v40 = vsel %vm4661_vm15, %v1852_v2, 0.0  ;;  %v2567_v53 = vpack.c.bf16 %v1852_v2, %v1851_v63  ;;  %v2570_v4 = vpack.c.bf16 %v1850_v38, %v1849_v15 }
 0x8cc   : > { %v1857_v62 = vpack.c.bf16 %v1855_v10, %v1853_v59  ;;  %v1858_v9 = vpack.c.bf16 %v1856_v40, %v1854_v30  ;;  %1883 = vmatprep.subr.bf16.mxu1 %v1840_v16  ;;  %vm4665_vm2 = vcmask 130048   ;;  %v1214_v16 = vmul.f32 %v3902_v20, %v3902_v20 }
 0x8cd   : > { %1884 = vmatpush1.bf16.msra.mxu1 %v1839_v34  ;;  %2568 = vmatprep.subr.msk.bf16.mxu0 %vm4664_vm4, %v2567_v53  ;;  %vm4667_vm9 = vmmov %vm4665_vm2 }
 0x8ce   : > { %v1859_v43 = vunpack.c.l.bf16 %v1857_v62  ;;  %v1860_v32 = vunpack.c.l.bf16 %v1858_v9  ;;  %v1861_v49 = vunpack.c.h.bf16 %v1857_v62  ;;  %v1862_v51 = vunpack.c.h.bf16 %v1858_v9  ;;  %2571 = vmatpush1.bf16.msk.msra.mxu0 %vm3706_vm6, %v2570_v4 }
 0x8cf   : > { %2576 = vmatprep.subr.msk.bf16.mxu0 %vm3629_vm14, %v3991_v14  ;;  %v2874_v14 = vld [vmem:[#allocation5 + $0x10] ss:$8 sps:$4 sm:$0xff]  }
 0x8d0   : > { %v1863_v52 = vsub.f32 %v1853_v59, %v1859_v43  ;;  %v1865_v5 = vsub.f32 %v1855_v10, %v1861_v49  ;;  %v1866_v60 = vsub.f32 %v1856_v40, %v1862_v51  ;;  %v1864_v18 = vsub.f32 %v1854_v30, %v1860_v32 }
 0x8d1   : > { %1955 = vmatmul.mubr.bf16.vlgmr.msra.gmra.mrb[12].mxu0 %v2872_v6  ;;  %v1215_v10 = vmul.f32 %v3908_v22, %v3908_v22  ;;  %v1213_v40 = vmul.f32 %v3904_v39, %v3904_v39 }
 0x8d2   : > { %v1867_v50 = vpack.c.bf16 %v1865_v5, %v1863_v52  ;;  %2579 = vmatpush1.bf16.msk.msra.mxu0 %vm3639_vm12, %v3993_v33  ;;  %v1868_v54 = vpack.c.bf16 %v1866_v60, %v1864_v18  ;;  %2573 = vmatprep.mubr.msk.bf16.mxu0 %vm4665_vm2, %v2873_v3  ;;  %vm4666_vm12 = vmmov %vm4665_vm2 }
 0x8d3   : > { %1977 = vmatprep.subr.bf16.mxu0 %v4013_v28 }
 0x8d4   : > { %1885 = vmatprep.subr.bf16.mxu1 %v1868_v54 }
 0x8d5   : > { %1886 = vmatpush1.bf16.msra.mxu1 %v1867_v50 }
 0x8d6   : > { %2582 = vmatpush1.bf16.msk.msra.mxu0 %vm3651_vm7, %v4015_v17 }
 0x8d7   : > { %2585 = vmatprep.subr.msk.bf16.mxu0 %vm3658_vm1, %v4039_v8 }
 0x8d8   : > { %1902 = vmatmul.mubr.bf16.vlgmr.msra.gmra.mrb[8].mxu1 %v2872_v6 }
 0x8d9   : > { %1965 = vmatmul.mubr.bf16.gmra.mrb[16].mxu0 %v2874_v14  ;;  %2529 = vmatprep.mubr.msk.bf16.mxu1 %vm4666_vm12, %v2873_v3  ;;  %v4674_v3 = vld [vmem:[#allocation20_spill] sm:$0xff] }
 0x8da   : > { %2588 = vmatpush1.bf16.msk.msra.mxu0 %vm3672_vm8, %v4041_v23  ;;  %2616 = vmatprep.mubr.msk.bf16.mxu0 %vm4667_vm9, %v3767_v27 }
 0x8db   : > { %2591 = vmatprep.subr.msk.bf16.mxu0 %vm3629_vm14, %v4065_v1 }
 0x8de   : > { %2594 = vmatpush1.bf16.msk.msra.mxu0 %vm3689_vm0, %v4067_v24 }
 0x8df   : > { %1983 = vmatprep.subr.bf16.mxu0 %v3925_v37 }
 0x8e0   : > { %1912 = vmatmul.mubr.bf16.gmra.mrb[12].mxu1 %v2874_v14  ;;  %v4676_v14 = vld [vmem:[#allocation21_spill] sm:$0xff] }
 0x8e2   : > { %1984 = vmatpush1.bf16.msra.mxu0 %v3927_v19 }
 0x8e3   : > { %2597 = vmatprep.subr.msk.bf16.mxu0 %vm3658_vm1, %v4093_v56  ;;  %vm4668_vm1 = vmmov %vm4665_vm2 }
 0x8e6   : > { %2600 = vmatpush1.bf16.msk.msra.mxu0 %vm3706_vm6, %v4095_v61 }
 0x8e7   : > { %2603 = vmatprep.subr.msk.bf16.mxu0 %vm3715_vm5, %v4122_v13 }
 0x8ea   : > { %2606 = vmatpush1.bf16.msk.msra.mxu0 %vm3689_vm0, %v4124_v45  ;;  %vm4669_vm0 = vcmask 261120  }
 0x8eb   : > { %2609 = vmatprep.subr.msk.bf16.mxu0 %vm4658_vm11, %v4149_v44  ;;  %vm4675_vm5 = vmmov %vm4669_vm0 }
 0x8ec   : > { %vm4677_vm11 = vmmov %vm4669_vm0 }
 0x8ed   : > { %vm4679_vm13 = vmmov %vm4669_vm0 }
 0x8ee   : > { %1990 = vmatpush1.bf16.msra.mxu0 %v4147_v47 }
 0x8ef   : > { %2612 = vmatprep.subr.msk.bf16.mxu0 %vm4664_vm4, %v2567_v53  ;;  %v1216_v53 = vmul.f32 %v3906_v57, %v3906_v57 }
 0x8f2   : > { %2615 = vmatpush1.bf16.msk.msra.mxu0 %vm3706_vm6, %v2570_v4  ;;  %vm4670_vm6 = vcmask 7168  }
 0x8f3   : > { %vm4671_vm7 = vmmov %vm4670_vm6 }
 0x8f4   : > { %vm4672_vm8 = vmmov %vm4670_vm6 }
 0x8f5   : > { %2008 = vmatmul.mubr.bf16.vlgmr.msra.gmra.mrb[12].mxu0 %v3794_v35  ;;  %vm4673_vm14 = vmmov %vm4670_vm6 }
 0x8f6   : > { %2617 = vmatprep.mubr.msk.bf16.mxu0 %vm4668_vm1, %v3798_v36 }
 0x8fd   : > { %2018 = vmatmul.mubr.bf16.gmra.mrb[16].mxu0 %v3803_v7 }
 0x8fe   : > { %2678 = vmatprep.mubr.msk.f32.mxu0 %vm4669_vm0, %v3851_v26 }
 0x9ab   : > { %v1903_v25 = vpop.f32.mrb[8].mxu1 }
 0x9ac   : > { %v1905_v11 = vpop.f32.mrb[9].mxu1 }
 0x9ad   : > { %v1907_v0 = vpop.f32.mrb[10].mxu1 }
 0x9ae   : > { %v1909_v58 = vpop.f32.mrb[11].mxu1 }
 0x9b3   : > { %v1913_v42 = vpop.f32.mrb[12].mxu1 }
 0x9b4   : > { %v1915_v12 = vpop.f32.mrb[13].mxu1 }
 0x9b5   : > { %v1917_v48 = vpop.f32.mrb[14].mxu1 }
 0x9b6   : > { %v1919_v21 = vpop.f32.mrb[15].mxu1 }
 0x9c8   : > { %v2009_v31 = vpop.f32.mrb[12].mxu0 }
 0x9c9   : > { %v4231_v29 = vadd.f32 %v2009_v31, %v1903_v25  ;;  %v2011_v27 = vpop.f32.mrb[13].mxu0  ;;  %v4678_v25 = vld [vmem:[#allocation22_spill] sm:$0xff] }
 0x9ca   : > { %v4233_v35 = vadd.f32 %v2011_v27, %v1905_v11  ;;  %v2013_v36 = vpop.f32.mrb[14].mxu0  ;;  %v4316_v27 = vld [vmem:[%s4494_s3 + $0x18] sm:$0xff] }
 0x9cb   : > { %v4235_v37 = vadd.f32 %v2013_v36, %v1907_v0  ;;  %v2015_v7 = vpop.f32.mrb[15].mxu0  ;;  %v2048_v33 = vmul.f32 %v4231_v29, %v4231_v29  ;;  %v278_v36 = vld [vmem:[%s4494_s3 + $0x10] sm:$0xff] }
 0x9cc   : > { %v4237_v19 = vadd.f32 %v2015_v7, %v1909_v58  ;;  %v2036_v26 = vadd.f32 %v4233_v35, %v4231_v29  ;;  %v2049_v28 = vmul.f32 %v4233_v35, %v4233_v35  ;;  %v4327_v7 = vld [vmem:[%s4494_s3 + $0x28] sm:$0xff] }
 0x9cd   : > { %v2050_v1 = vmul.f32 %v4235_v37, %v4235_v37 }
 0x9ce   : > { %2037 = vadd.xlane.f32.xlu0 %v2036_v26  ;;  %v2039_v17 = vadd.f32 %v4237_v19, %v4235_v37  ;;  %v2056_v23 = vadd.f32 %v2049_v28, %v2048_v33  ;;  %v2051_v24 = vmul.f32 %v4237_v19, %v4237_v19  ;;  %v4332_v26 = vld [vmem:[%s4494_s3 + $0x20] sm:$0xff]  ;;  %v4680_v33 = vmov 1  }
 0x9d0   : > { %v2019_v8 = vpop.f32.mrb[16].mxu0  ;;  %2040 = vadd.xlane.f32.xlu1 %v2039_v17  ;;  %v2059_v63 = vadd.f32 %v2051_v24, %v2050_v1 }
 0x9d1   : > { %v4251_v56 = vadd.f32 %v2019_v8, %v1913_v42  ;;  %v2021_v61 = vpop.f32.mrb[17].mxu0 }
 0x9d2   : > { %v4253_v13 = vadd.f32 %v2021_v61, %v1915_v12  ;;  %v2023_v45 = vpop.f32.mrb[18].mxu0  ;;  %2057 = vadd.xlane.f32.xlu0 %v2056_v23 }
 0x9d3   : > { %v4255_v47 = vadd.f32 %v2023_v45, %v1917_v48  ;;  %v2025_v44 = vpop.f32.mrb[19].mxu0  ;;  %v2052_v30 = vmul.f32 %v4251_v56, %v4251_v56 }
 0x9d4   : > { %v4257_v15 = vadd.f32 %v2025_v44, %v1919_v21  ;;  %v2053_v55 = vmul.f32 %v4253_v13, %v4253_v13  ;;  %v2042_v34 = vadd.f32 %v4253_v13, %v4251_v56 }
 0x9d5   : > { %v2054_v41 = vmul.f32 %v4255_v47, %v4255_v47 }
 0x9d6   : > { %v2055_v46 = vmul.f32 %v4257_v15, %v4257_v15  ;;  %2060 = vadd.xlane.f32.xlu0 %v2059_v63  ;;  %v2045_v59 = vadd.f32 %v4257_v15, %v4255_v47  ;;  %v2062_v2 = vadd.f32 %v2053_v55, %v2052_v30 }
 0x9d8   : > { %2046 = vadd.xlane.f32.xlu1 %v2045_v59  ;;  %v2065_v38 = vadd.f32 %v2055_v46, %v2054_v41 }
 0x9da   : > { %2043 = vadd.xlane.f32.xlu0 %v2042_v34 }
 0x9dc   : > { %2066 = vadd.xlane.f32.xlu1 %v2065_v38 }
 0x9de   : > { %2063 = vadd.xlane.f32.xlu0 %v2062_v2 }
 0x9ed   : > { %1223 = vrot.lane.b32.xlu1 %v1214_v16, %s3028_s7 }
 0x9f1   : > { %1225 = vrot.lane.b32.xlu1 %v1215_v10, %s3028_s7 }
 0x9f4   : > { %1221 = vrot.lane.b32.xlu0 %v1213_v40, %s3028_s7 }
 0x9f5   : > { %1227 = vrot.lane.b32.xlu1 %v1216_v53, %s3028_s7 }
 0xa5b   : > { %v2038_v4 = vpop.xlane.xlu0 %2037 }
 0xa5d   : > { %v2041_v9 = vpop.xlane.xlu1 %2040 }
 0xa5f   : > { %v2058_v62 = vpop.xlane.xlu0 %2057 }
 0xa60   : > { %v2068_v32 = vsel %vm4670_vm6, %v2038_v4, %v2058_v62 }
 0xa63   : > { %v2061_v43 = vpop.xlane.xlu0 %2060 }
 0xa64   : > { %v2069_v49 = vsel %vm4671_vm7, %v2041_v9, %v2061_v43 }
 0xa65   : > { %v2692_v51 = vpack.c.bf16 %v2069_v49, %v2068_v32  ;;  %v2047_v52 = vpop.xlane.xlu1 %2046 }
 0xa67   : > { %2693 = vmatprep.subr.bf16.mxu0 %v2692_v51  ;;  %v2044_v5 = vpop.xlane.xlu0 %2043 }
 0xa68   : > { %2695 = vmatpush3.bf16.msra.mxu0 %v2692_v51 }
 0xa69   : > { %v2067_v60 = vpop.xlane.xlu1 %2066 }
 0xa6a   : > { %v2071_v6 = vsel %vm4672_vm8, %v2047_v52, %v2067_v60 }
 0xa6b   : > { %v2064_v18 = vpop.xlane.xlu0 %2063 }
 0xa6c   : > { %v2070_v50 = vsel %vm4673_vm14, %v2044_v5, %v2064_v18  ;;  %v4681_v5 = vmov 0  }
 0xa6d   : > { %v2696_v54 = vpack.c.bf16 %v2071_v6, %v2070_v50  ;;  %v1224_v28 = vpop.permute.xlu1 %1223 }
 0xa6e   : > { %v1234_v23 = vsub.f32 %v3902_v20, %v1224_v28  ;;  %v4683_v28 = vld [vmem:[#allocation13_spill] sm:$0xff] }
 0xa6f   : > { %2697 = vmatprep.subr.bf16.mxu0 %v2696_v54  ;;  %v1222_v8 = vpop.permute.xlu0 %1221 }
 0xa70   : > { %2699 = vmatpush3.bf16.msra.mxu0 %v2696_v54  ;;  %v1233_v1 = vsub.f32 %v3904_v39, %v1222_v8  ;;  %v1238_v61 = vadd.f32 1e-05, %v1234_v23 }
 0xa71   : > { %v1226_v17 = vpop.permute.xlu1 %1225 }
 0xa72   : > { %v1237_v44 = vadd.f32 1e-05, %v1233_v1  ;;  %v1235_v63 = vsub.f32 %v3908_v22, %v1226_v17  ;;  %2854 = vrsqrt.f32 %v1238_v61 }
 0xa73   : > { %2679 = vmatmul.mubr.msk.f32.vlgmr.msra.gmra.mrb[20].mxu0 %vm4675_vm5, %v4674_v3 }
 0xa74   : > { %2681 = vmatprep.mubr.msk.f32.mxu0 %vm4677_vm11, %v4676_v14  ;;  %2856 = vrsqrt.f32 %v1237_v44  ;;  %v1239_v46 = vadd.f32 1e-05, %v1235_v63 }
 0xa75   : > { %v1228_v24 = vpop.permute.xlu1 %1227 }
 0xa76   : > { %v1236_v45 = vsub.f32 %v3906_v57, %v1228_v24 }
 0xa77   : > { %2682 = vmatmul.mubr.msk.f32.gmra.mrb[22].mxu0 %vm4679_vm13, %v4678_v25 }
 0xa78   : > { %v1240_v41 = vadd.f32 1e-05, %v1236_v45 }
 0xa7a   : > { %2858 = vrsqrt.f32 %v1240_v41 }
 0xa7b   : > { %2860 = vrsqrt.f32 %v1239_v46  ;;  %v4684_v46 = vld [vmem:[#allocation16_spill] sm:$0xff] }
 0xb46   : > { %v4293_v11 = vpop.f32.mrb[20].mxu0 }
 0xb47   : > { %v2158_v0 = vmul.f32 %v4293_v11, %v4293_v11  ;;  %v4297_v58 = vpop.f32.mrb[21].mxu0 }
 0xb48   : > { %v2157_v42 = vmul.f32 %v4297_v58, %v4297_v58 }
 0xb49   : > { %2167 = vrot.lane.b32.xlu1 %v2158_v0, %s3028_s7 }
 0xb4a   : > { %2165 = vrot.lane.b32.xlu0 %v2157_v42, %s3028_s7  ;;  %v4303_v12 = vpop.f32.mrb[22].mxu0 }
 0xb4b   : > { %v2160_v48 = vmul.f32 %v4303_v12, %v4303_v12  ;;  %v4307_v21 = vpop.f32.mrb[23].mxu0 }
 0xb4c   : > { %v2159_v31 = vmul.f32 %v4307_v21, %v4307_v21 }
 0xb4d   : > { %2171 = vrot.lane.b32.xlu1 %v2160_v48, %s3028_s7 }
 0xb4e   : > { %2169 = vrot.lane.b32.xlu0 %v2159_v31, %s3028_s7 }
 0xb51   : > { %1279 = vrot.lane.b32.xlu1 %v4316_v27, %s3028_s7 }
 0xb52   : > { %1277 = vrot.lane.b32.xlu0 %v278_v36, %s3028_s7 }
 0xb55   : > { %1283 = vrot.lane.b32.xlu1 %v4327_v7, %s3028_s7 }
 0xb56   : > { %1281 = vrot.lane.b32.xlu0 %v4332_v26, %s3028_s7  ;;  %s4383_s7 = scalar_lea.vmem [#allocation7], %s2405_s27  ;;  %s2639_s27 = sshll.u32 %s3090_s22, 11 }
 0xb57   : > { %s2313_s13 = sshll.u32 %s4383_s7, 4  ;;  %s4438_s15 = scalar_lea.hbm %s4496_s5, %s2639_s27  ;;  %s4442_s13 = int_to_ptr.vmem [resolvable:$true] %s2313_s13 }
 0xb58   : > { %s2949_s17 = scalar_lea.vmem %s4442_s13, 2048  ;;  %p2956_p10 = scmp.lt.s32.totalorder %s4442_s13, %s2954_s24 }
 0xb59   : > { %1252 = vperm.xlu1 %2827, %v3902_v20   ;;  %p2950_p4 = scmp.ne.s32.totalorder %s4442_s13, %s2949_s17 }
 0xb5a   : > { %1247 = vperm.xlu0 %2826, %v3904_v39   ;;  %v2855_v39 = vpop.eup %2854 }
 0xb5b   : > { %v2857_v16 = vpop.eup %2856  ;;  %p2951_p6 = pnand %p2950_p4, %p3160_p12 }
 0xb5c   : > { %v2859_v40 = vpop.eup %2858 }
 0xb5d   : > { %1257 = vperm.xlu1 %2827, %v3908_v22   ;;  %v2861_v4 = vpop.eup %2860  ;;  %p2952_p8 = pneg %p2951_p6 }
 0xb5e   : > { %1262 = vperm.xlu0 %2826, %v3906_v57  }
 0xb61   : > { %2828 = vset.pattern.permute.xlu1 %v4680_v33 }
 0xb62   : > { %2196 = vperm.xlu0 %2826, %v4293_v11  }
 0xb66   : > { %2830 = vset.pattern.permute.xlu0 %v4680_v33 }
 0xbbb   : > { %v2168_v59 = vpop.permute.xlu1 %2167 }
 0xbbc   : > { %v2166_v30 = vpop.permute.xlu0 %2165  ;;  %v2178_v32 = vsub.f32 %v4293_v11, %v2168_v59 }
 0xbbd   : > { %v2177_v51 = vsub.f32 %v4297_v58, %v2166_v30  ;;  %v4685_v30 = vld [vmem:[#allocation17_spill] sm:$0xff] }
 0xbbe   : > { %v2182_v49 = vadd.f32 1e-05, %v2178_v32 }
 0xbbf   : > { %v2172_v55 = vpop.permute.xlu1 %2171  ;;  %v2181_v18 = vadd.f32 1e-05, %v2177_v51 }
 0xbc0   : > { %v2170_v34 = vpop.permute.xlu0 %2169  ;;  %v2180_v6 = vsub.f32 %v4303_v12, %v2172_v55 }
 0xbc1   : > { %v2179_v20 = vsub.f32 %v4307_v21, %v2170_v34 }
 0xbc2   : > { %v2184_v50 = vadd.f32 1e-05, %v2180_v6 }
 0xbc3   : > { %v2183_v38 = vadd.f32 1e-05, %v2179_v20  ;;  %v1280_v2 = vpop.permute.xlu1 %1279 }
 0xbc4   : > { %v1290_v57 = vmul.f32 %v2855_v39, %v1280_v2  ;;  %v1278_v10 = vpop.permute.xlu0 %1277  ;;  %v2875_v39 = vld [vmem:[%s3214_s12] sm:$0xff] }
 0xbc5   : > { %2862 = vrsqrt.f32 %v2183_v38  ;;  %v1289_v22 = vmul.f32 %v2857_v16, %v1278_v10 }
 0xbc6   : > { %1300 = vperm.xlu0 %2830, %v1290_v57   ;;  %2864 = vrsqrt.f32 %v2182_v49  ;;  %v4686_v49 = vld [vmem:[#allocation14_spill] sm:$0xff] }
 0xbc7   : > { %1295 = vperm.xlu1 %2828, %v1289_v22   ;;  %v1284_v53 = vpop.permute.xlu1 %1283  ;;  %2866 = vrsqrt.f32 %v2181_v18 }
 0xbc8   : > { %v1292_v62 = vmul.f32 %v2859_v40, %v1284_v53  ;;  %v1282_v9 = vpop.permute.xlu0 %1281  ;;  %2868 = vrsqrt.f32 %v2184_v50 }
 0xbc9   : > { %v1291_v43 = vmul.f32 %v2861_v4, %v1282_v9 }
 0xbca   : > { %1310 = vperm.xlu0 %2830, %v1292_v62  }
 0xbcb   : > { %1305 = vperm.xlu1 %2828, %v1291_v43  }
 0xbce   : > { %1322 = vperm.xlu0 %2830, %v278_v36  }
 0xbcf   : > { %v2863_v52 = vpop.eup %2862  ;;  %2829 = vset.pattern.permute.xlu1 %v4681_v5 }
 0xbd0   : > { %v2219_v60 = vmul.f32 %v2863_v52, %v1282_v9  ;;  %2191 = vperm.xlu1 %2829, %v4297_v58   ;;  %v2865_v54 = vpop.eup %2864  ;;  %v4687_v52 = vld [vmem:[#allocation15_spill] sm:$0xff] }
 0xbd1   : > { %v2218_v3 = vmul.f32 %v2865_v54, %v1280_v2  ;;  %v2867_v14 = vpop.eup %2866  ;;  %v2876_v2 = vld [vmem:[%s3214_s12 + $0x8] sm:$0xff] }
 0xbd2   : > { %2233 = vperm.xlu0 %2830, %v2219_v60   ;;  %v2217_v25 = vmul.f32 %v2867_v14, %v1278_v10  ;;  %v2869_v11 = vpop.eup %2868 }
 0xbd3   : > { %v2220_v0 = vmul.f32 %v2869_v11, %v1284_v53 }
 0xbd4   : > { %2201 = vperm.xlu1 %2829, %v4307_v21  }
 0xbd6   : > { %1330 = vperm.xlu0 %2830, %v4332_v26   ;;  %v4682_v26 = vld [vmem:[#allocation12_spill] sm:$0xff] }
 0xbd8   : > { %2206 = vperm.xlu1 %2829, %v4303_v12   ;;  %v1253_v12 = vpop.permute.xlu1 %1252 }
 0xbd9   : > { %v1248_v58 = vpop.permute.xlu0 %1247  ;;  %v1267_v51 = vsub.f32 %v4686_v49, %v1253_v12  ;;  %v4688_v49 = vld [vmem:[#allocation18_spill] sm:$0xff] }
 0xbda   : > { %v1266_v17 = vsub.f32 %v4683_v28, %v1248_v58 }
 0xbdc   : > { %2831 = vset.pattern.permute.xlu1 %v4680_v33  ;;  %v1258_v21 = vpop.permute.xlu1 %1257  ;;  %v1265_v33 = vsub.f32 %v4682_v26, %v1248_v58 }
 0xbdd   : > { %1326 = vperm.xlu1 %2831, %v4316_v27   ;;  %v4361_v42 = vpop.permute.xlu0 %1262  ;;  %v1269_v59 = vsub.f32 %v4684_v46, %v1258_v21  ;;  %v1270_v55 = vsub.f32 %v4685_v30, %v1258_v21 }
 0xbe1   : > { %2228 = vperm.xlu1 %2831, %v2218_v3   ;;  %v4363_v48 = vpop.permute.xlu0 %2196 }
 0xbe2   : > { %v2212_v28 = vsub.f32 %v4237_v19, %v4363_v48 }
 0xbe5   : > { %2223 = vperm.xlu1 %2831, %v2217_v25   ;;  %v2877_v25 = vld [vmem:[%s3214_s12 + $0x20] sm:$0xff] }
 0xbe9   : > { %2238 = vperm.xlu1 %2831, %v2220_v0   ;;  %v2878_v0 = vld [vmem:[%s3214_s12 + $0x28] sm:$0xff] }
 0xbed   : > { %1334 = vperm.xlu1 %2831, %v4327_v7  }
 0xc45   : > { %v1301_v31 = vpop.permute.xlu0 %1300 }
 0xc46   : > { %v1296_v36 = vpop.permute.xlu1 %1295  ;;  %v1315_v50 = vmul.f32 %v1301_v31, %v1267_v51  ;;  %v1271_v51 = vsub.f32 %v4688_v49, %v4361_v42 }
 0xc47   : > { %v1313_v23 = vmul.f32 %v1296_v36, %v1265_v33  ;;  %v1314_v1 = vmul.f32 %v1296_v36, %v1266_v17 }
 0xc49   : > { %v4365_v27 = vpop.permute.xlu0 %1310 }
 0xc4a   : > { %v1306_v8 = vpop.permute.xlu1 %1305 }
 0xc4b   : > { %v1317_v10 = vmul.f32 %v1306_v8, %v1269_v59  ;;  %v1318_v22 = vmul.f32 %v1306_v8, %v1270_v55  ;;  %v2881_v59 = vld [vmem:[%s3214_s12 + $0x10] sm:$0xff]  ;;  %v2882_v55 = vld [vmem:[%s3214_s12 + $0x18] sm:$0xff] }
 0xc4d   : > { %v4369_v7 = vpop.permute.xlu0 %1322 }
 0xc4e   : > { %v1337_v24 = vadd.f32 %v4369_v7, %v1313_v23  ;;  %v1338_v61 = vadd.f32 %v4369_v7, %v1314_v1  ;;  %v2879_v23 = vld [vmem:[%s3214_s12 + $0x60] sm:$0xff] }
 0xc4f   : > { %v4373_v45 = vpop.permute.xlu1 %2191 }
 0xc50   : > { %vm1345_vm15 = vcmp.gt.f32.partialorder %v1337_v24, 0.0  ;;  %vm1346_vm3 = vcmp.gt.f32.partialorder %v1338_v61, 0.0  ;;  %v1353_v44 = vmul.f32 0.1, %v1337_v24  ;;  %v1354_v63 = vmul.f32 0.1, %v1338_v61 }
 0xc51   : > { %v2234_v41 = vpop.permute.xlu0 %2233 }
 0xc52   : > { %v1361_v34 = vsel %vm1345_vm15, %v1337_v24, %v1353_v44  ;;  %v1362_v20 = vsel %vm1346_vm3, %v1338_v61, %v1354_v63  ;;  %v2880_v24 = vld [vmem:[%s3214_s12 + $0x68] sm:$0xff] }
 0xc53   : > { %v1369_v38 = vadd.f32 %v2875_v39, %v1361_v34  ;;  %v1370_v16 = vadd.f32 %v2876_v2, %v1362_v20  ;;  %v2202_v57 = vpop.permute.xlu1 %2201  ;;  %v2210_v2 = vsub.f32 %v4233_v35, %v4373_v45 }
 0xc54   : > { %v2213_v40 = vsub.f32 %v4251_v56, %v2202_v57  ;;  %v2214_v53 = vsub.f32 %v4253_v13, %v2202_v57  ;;  %v1268_v56 = vsub.f32 %v4687_v52, %v1253_v12  ;;  %v4689_v52 = vld [vmem:[#allocation19_spill] sm:$0xff] }
 0xc55   : > { %1377 = vst [vmem:[%s4383_s7] sm:$0xff] %v1369_v38  ;;  %1378 = vst [vmem:[%s4383_s7 + $0x8] sm:$0xff] %v1370_v16  ;;  %v1331_v4 = vpop.permute.xlu0 %1330  ;;  %v2209_v38 = vsub.f32 %v4231_v29, %v4373_v45 }
 0xc56   : > { %v2245_v62 = vmul.f32 %v2234_v41, %v2213_v40  ;;  %v2246_v9 = vmul.f32 %v2234_v41, %v2214_v53  ;;  %v1341_v43 = vadd.f32 %v1331_v4, %v1317_v10  ;;  %v1342_v32 = vadd.f32 %v1331_v4, %v1318_v22 }
 0xc57   : > { %v4389_v5 = vpop.permute.xlu1 %2206  ;;  %v1316_v54 = vmul.f32 %v1301_v31, %v1268_v56  ;;  %v2211_v31 = vsub.f32 %v4235_v37, %v4363_v48  ;;  %v1272_v56 = vsub.f32 %v4689_v52, %v4361_v42 }
 0xc58   : > { %vm1349_vm10 = vcmp.gt.f32.partialorder %v1341_v43, 0.0  ;;  %vm1350_vm4 = vcmp.gt.f32.partialorder %v1342_v32, 0.0  ;;  %v1357_v13 = vmul.f32 0.1, %v1341_v43  ;;  %v1358_v60 = vmul.f32 0.1, %v1342_v32 }
 0xc59   : > { %v2253_v18 = vadd.f32 %v2245_v62, %v1331_v4  ;;  %v2254_v6 = vadd.f32 %v2246_v9, %v1331_v4  ;;  %v2883_v62 = vld [vmem:[%s3214_s12 + $0x50] sm:$0xff]  ;;  %v1320_v42 = vmul.f32 %v4365_v27, %v1272_v56 }
 0xc5a   : > { %v1365_v3 = vsel %vm1349_vm10, %v1341_v43, %v1357_v13  ;;  %v1366_v14 = vsel %vm1350_vm4, %v1342_v32, %v1358_v60  ;;  %v2884_v43 = vld [vmem:[%s3214_s12 + $0x58] sm:$0xff]  ;;  %v2215_v13 = vsub.f32 %v4255_v47, %v4389_v5  ;;  %v2216_v60 = vsub.f32 %v4257_v15, %v4389_v5  ;;  %v2885_v5 = vld [vmem:[%s3214_s12 + $0x40] sm:$0xff] }
 0xc5b   : > { %v1373_v11 = vadd.f32 %v2877_v25, %v1365_v3  ;;  %v1374_v58 = vadd.f32 %v2878_v0, %v1366_v14  ;;  %vm2261_vm2 = vcmp.gt.f32.partialorder %v2253_v18, 0.0  ;;  %vm2262_vm12 = vcmp.gt.f32.partialorder %v2254_v6, 0.0  ;;  %v2886_v25 = vld [vmem:[%s3214_s12 + $0x48] sm:$0xff] }
 0xc5c   : > { %v2269_v12 = vmul.f32 0.1, %v2253_v18  ;;  %v2270_v21 = vmul.f32 0.1, %v2254_v6  ;;  %v1327_v36 = vpop.permute.xlu1 %1326 }
 0xc5d   : > { %1381 = vst [vmem:[%s4383_s7 + $0x20] sm:$0xff] %v1373_v11  ;;  %1382 = vst [vmem:[%s4383_s7 + $0x28] sm:$0xff] %v1374_v58  ;;  %v1339_v26 = vadd.f32 %v1327_v36, %v1315_v50  ;;  %v1340_v33 = vadd.f32 %v1327_v36, %v1316_v54 }
 0xc5e   : > { %v2277_v17 = vsel %vm2261_vm2, %v2253_v18, %v2269_v12  ;;  %v2278_v8 = vsel %vm2262_vm12, %v2254_v6, %v2270_v21  ;;  %v1319_v6 = vmul.f32 %v4365_v27, %v1271_v51 }
 0xc5f   : > { %v2285_v1 = vadd.f32 %v2879_v23, %v2277_v17  ;;  %v2286_v61 = vadd.f32 %v2880_v24, %v2278_v8  ;;  %vm1347_vm9 = vcmp.gt.f32.partialorder %v1339_v26, 0.0  ;;  %vm1348_vm1 = vcmp.gt.f32.partialorder %v1340_v33, 0.0  ;;  %v2887_v17 = vld [vmem:[%s3214_s12 + $0x30] sm:$0xff]  ;;  %v2888_v23 = vld [vmem:[%s3214_s12 + $0x38] sm:$0xff] }
 0xc60   : > { %v1355_v44 = vmul.f32 0.1, %v1339_v26  ;;  %v1356_v63 = vmul.f32 0.1, %v1340_v33  ;;  %v2229_v41 = vpop.permute.xlu1 %2228 }
 0xc61   : > { %2626 = vst [vmem:[%s4383_s7 + $0x60] sm:$0xff] %v2285_v1  ;;  %2627 = vst [vmem:[%s4383_s7 + $0x68] sm:$0xff] %v2286_v61  ;;  %v2243_v37 = vmul.f32 %v2229_v41, %v2211_v31  ;;  %v2244_v46 = vmul.f32 %v2229_v41, %v2212_v28  ;;  %v2890_v41 = vld [vmem:[%s3214_s12 + $0x78] sm:$0xff] }
 0xc62   : > { %v1363_v19 = vsel %vm1347_vm9, %v1339_v26, %v1355_v44  ;;  %v1364_v48 = vsel %vm1348_vm1, %v1340_v33, %v1356_v63  ;;  %v2889_v44 = vld [vmem:[%s3214_s12 + $0x70] sm:$0xff]  ;;  %s2955_s12 = scalar_lea.vmem %s2954_s24, 4096 }
 0xc63   : > { %v1371_v30 = vadd.f32 %v2881_v59, %v1363_v19  ;;  %v1372_v34 = vadd.f32 %v2882_v55, %v1364_v48  ;;  %v2251_v20 = vadd.f32 %v2243_v37, %v1327_v36  ;;  %v2252_v39 = vadd.f32 %v2244_v46, %v1327_v36  ;;  %p2957_p13 = scmp.lt.s32.totalorder %s2955_s12, %s2949_s17 }
 0xc64   : > { %v2224_v16 = vpop.permute.xlu1 %2223 }
 0xc65   : > { %1379 = vst [vmem:[%s4383_s7 + $0x10] sm:$0xff] %v1371_v30  ;;  %1380 = vst [vmem:[%s4383_s7 + $0x18] sm:$0xff] %v1372_v34  ;;  %vm2259_vm0 = vcmp.gt.f32.partialorder %v2251_v20, 0.0  ;;  %vm2260_vm6 = vcmp.gt.f32.partialorder %v2252_v39, 0.0  ;;  %v2267_v57 = vmul.f32 0.1, %v2251_v20  ;;  %v2241_v22 = vmul.f32 %v2224_v16, %v2209_v38  ;;  %p2958_p3 = por %p2957_p13, %p2956_p10 }
 0xc66   : > { %v2268_v10 = vmul.f32 0.1, %v2252_v39  ;;  %v2242_v40 = vmul.f32 %v2224_v16, %v2210_v2 }
 0xc67   : > { %v2275_v53 = vsel %vm2259_vm0, %v2251_v20, %v2267_v57  ;;  %v2249_v32 = vadd.f32 %v2241_v22, %v4369_v7  ;;  %p2959_p7 = pnand %p2958_p3, %p2952_p8 }
 0xc68   : > { %v2276_v4 = vsel %vm2260_vm6, %v2252_v39, %v2268_v10  ;;  %v2283_v9 = vadd.f32 %v2883_v62, %v2275_v53  ;;  %v2250_v35 = vadd.f32 %v2242_v40, %v4369_v7  ;;  %v2239_v45 = vpop.permute.xlu1 %2238 }
 0xc69   : > { %v2284_v29 = vadd.f32 %v2884_v43, %v2276_v4  ;;  %vm2257_vm7 = vcmp.gt.f32.partialorder %v2249_v32, 0.0  ;;  %v2265_v7 = vmul.f32 0.1, %v2249_v32  ;;  %v2247_v54 = vmul.f32 %v2239_v45, %v2215_v13 }
 0xc6a   : > { %2624 = vst [vmem:[%s4383_s7 + $0x50] sm:$0xff] %v2283_v9  ;;  %vm2258_vm8 = vcmp.gt.f32.partialorder %v2250_v35, 0.0  ;;  %v2266_v18 = vmul.f32 0.1, %v2250_v35  ;;  %v2248_v3 = vmul.f32 %v2239_v45, %v2216_v60 }
 0xc6b   : > { %2625 = vst [vmem:[%s4383_s7 + $0x58] sm:$0xff] %v2284_v29  ;;  %v2273_v50 = vsel %vm2257_vm7, %v2249_v32, %v2265_v7 }
 0xc6c   : > { %v2274_v47 = vsel %vm2258_vm8, %v2250_v35, %v2266_v18  ;;  %v1335_v15 = vpop.permute.xlu1 %1334  ;;  %v2281_v14 = vadd.f32 %v2885_v5, %v2273_v50 }
 0xc6d   : > { %v2282_v11 = vadd.f32 %v2886_v25, %v2274_v47  ;;  %v1343_v0 = vadd.f32 %v1335_v15, %v1319_v6  ;;  %v1344_v58 = vadd.f32 %v1335_v15, %v1320_v42  ;;  %v2255_v12 = vadd.f32 %v2247_v54, %v1335_v15 }
 0xc6e   : > { %v2256_v21 = vadd.f32 %v2248_v3, %v1335_v15  ;;  %2622 = vst [vmem:[%s4383_s7 + $0x40] sm:$0xff] %v2281_v14 }
 0xc6f   : > { %2623 = vst [vmem:[%s4383_s7 + $0x48] sm:$0xff] %v2282_v11  ;;  %vm1351_vm14 = vcmp.gt.f32.partialorder %v1343_v0, 0.0  ;;  %vm1352_vm5 = vcmp.gt.f32.partialorder %v1344_v58, 0.0  ;;  %v1359_v27 = vmul.f32 0.1, %v1343_v0  ;;  %vm2263_vm11 = vcmp.gt.f32.partialorder %v2255_v12, 0.0 }
 0xc70   : > { %v1360_v36 = vmul.f32 0.1, %v1344_v58  ;;  %vm2264_vm13 = vcmp.gt.f32.partialorder %v2256_v21, 0.0  ;;  %v2271_v26 = vmul.f32 0.1, %v2255_v12 }
 0xc71   : > { %v2272_v33 = vmul.f32 0.1, %v2256_v21  ;;  %v1367_v31 = vsel %vm1351_vm14, %v1343_v0, %v1359_v27 }
 0xc72   : > { %v1368_v28 = vsel %vm1352_vm5, %v1344_v58, %v1360_v36  ;;  %v1375_v8 = vadd.f32 %v2887_v17, %v1367_v31  ;;  %v2279_v24 = vsel %vm2263_vm11, %v2255_v12, %v2271_v26 }
 0xc73   : > { %v1376_v1 = vadd.f32 %v2888_v23, %v1368_v28  ;;  %v2280_v61 = vsel %vm2264_vm13, %v2256_v21, %v2272_v33  ;;  %v2287_v63 = vadd.f32 %v2889_v44, %v2279_v24 }
 0xc74   : > { %v2288_v37 = vadd.f32 %v2890_v41, %v2280_v61  ;;  %1383 = vst [vmem:[%s4383_s7 + $0x30] sm:$0xff] %v1375_v8 }
 0xc75   : > { %1384 = vst [vmem:[%s4383_s7 + $0x38] sm:$0xff] %v1376_v1  ;;  %2628 = vst [vmem:[%s4383_s7 + $0x70] sm:$0xff] %v2287_v63 }
 0xc76   : > { %2629 = vst [vmem:[%s4383_s7 + $0x78] sm:$0xff] %v2288_v37 }
 0xc77   : > { %2962 = shalt.err (!%p2959_p7)
}
 0xc78   : > { %s2963_s26 = scalar_lea.hbm %s4438_s15, 2048  ;;  %s2967_s29 = scalar_lea.hbm %s4496_s5, 4096 }
 0xc79   : > { %p2964_p9 = scmp.ne.s32.totalorder %s4438_s15, %s2963_s26  ;;  %p2968_p5 = scmp.lt.u32.totalorder %s4438_s15, %s4496_s5 }
 0xc7a   : > { %p2969_p11 = scmp.lt.u32.totalorder %s2967_s29, %s2963_s26  ;;  %p2971_p4 = scmp.lt.u32.totalorder %s2963_s26, %s4438_s15 }
 0xc7b   : > { %p2965_p2 = pnand %p2964_p9, %p3160_p12 }
 0xc7c   : > { %p2970_p1 = por %p2969_p11, %p2968_p5 }
 0xc7d   : > { %p2966_p0 = pneg %p2965_p2 }
 0xc7e   : > { %p2972_p6 = por %p2971_p4, %p2970_p1 }
 0xc80   : > { %p2973_p8 = pnand %p2972_p6, %p2966_p0 }
 0xc82   : > { %2976 = shalt.err (!%p2973_p8)
}
 0xc83   : > { %s3038_s22 = smov 256  }
 0xc84   : > { %2754 = dma.vmem_to_hbm [thread:$0]  (%p3160_p12), %s4442_s13, 2048, %s4438_s15, %s2299_s28, %s3038_s22, %s3038_s22, %s3031_s16  }
 0xc85 PF: > { %s2328_s6 = sand.u32 1, %s3007_s18   ;;  %p4690_p10 = scmp.ne.s32.totalorder %s4544_s25, 0 }
 0xc86   : > { %p4691_p13 = scmp.ge.s32.totalorder %s3019_s21, 2  ;;  %s2329_s17 = scalar_lea.sflag [#allocation4], %s2328_s6 }
 0xc88   : > { %p2765_p3 = pnand %p4691_p13, %p4690_p10 }
 0xc8a   : > { %3002 = dma.done.wait (!%p2765_p3), %s2329_s17, 2048  }
 0xc8b   : > { %3004 = vsyncadd (!%p2765_p3), %s2329_s17, 4294965248  ;;  %p19_p7 = scmp.ge.s32.totalorder %s3125_s30, 4   ;;  %s4692_s18 = smov %s3011_s19 }
 0xc8c   : > { %s4693_s19 = smov %s3015_s20  ;;  %s4694_s20 = smov %s3156_s8 }
 0xc8d   : > { %s4695_s21 = smov %s3125_s30  ;;  %21 = sbr.rel (!%p19_p7) target bundleno = 6 (0x6), region = 93 }
 0xc94   :  { %2334 = vsyncpa [#allocation3], 1 }
 0xc95   :  { %2336 = vsyncpa [#allocation3 + $0x1], 1 }
 0xc96   :  { %2337 = vsyncpa [#allocation6], 1 }
 0xc97   :  { %2338 = vsyncpa [#allocation4], 1 }
 0xc98   :  { %2340 = vsyncpa [#allocation4 + $0x1], 1 }

</bundles_post_ra>
